<compile_context>
chip_gen: v6e
topology: v6e:2x2x1
jax: 0.10.0
libtpu: 0.0.40
codegen_flags: <defaults>
</compile_context>

<pallas_src>
import numpy as np
import jax
import jax.numpy as jnp
from jax.experimental import pallas as pl
from jax.experimental.pallas import tpu as pltpu


def _largest_tile(n, candidates):
    """Largest candidate that evenly divides n (falls back to n itself)."""
    for c in candidates:
        if n % c == 0:
            return c
    return n


def _vmem_limit_bytes():
    """Explicit scoped-VMEM budget: above the conservative defaults, below the
    smallest physical VMEM across generations (v7x: 64 MiB / TensorCore)."""
    try:
        cap = pltpu.get_tpu_info().vmem_capacity_bytes
        return int(min(96 * 1024 * 1024, cap * 3 // 4))
    except Exception:
        return None  # fall back to compiler default


# ----------------------------------------------------------------------------
# Kernel 1: batched GRU recurrence + fused LayerNorm (one batch tile per step).
# ----------------------------------------------------------------------------
def _gru_ln_kernel(lens_ref,      # (TB, 1)    int32 sequence lengths
                   tgt_ref,       # (T*TB, E)  bf16  time-major target embeddings
                   ctx_ref,       # (TB, C)    bf16  context vectors
                   h0_ref,        # (TB, H)    f32   initial hidden state
                   wih_t_ref,     # (E, 3H)    bf16  input weights (target rows)
                   wih_c_ref,     # (C, 3H)    bf16  input weights (context rows)
                   whh_ref,       # (H, 3H)    bf16  fused recurrent weights r|z|n
                   bih_ref,       # (1, 3H)    f32
                   bhh_ref,       # (1, 3H)    f32
                   gamma_ref,     # (1, H)     f32   LayerNorm scale
                   beta_ref,      # (1, H)     f32   LayerNorm shift
                   hidden_ref,    # out (TB, H)    f32  final hidden state
                   normed_ref,    # out (T*TB, H)  bf16 LayerNorm(GRU output)
                   xg_sc):        # scratch (T*TB, 3H) f32 precomputed input gates
    TB, H = h0_ref.shape
    T = tgt_ref.shape[0] // TB

    # Hoisted input projection: one big (T*TB, E)x(E, 3H) MXU matmul for all
    # timesteps of this batch tile, plus one (TB, C)x(C, 3H) for the context.
    xg_sc[...] = jnp.dot(tgt_ref[...], wih_t_ref[...],
                         preferred_element_type=jnp.float32)
    cg = (jnp.dot(ctx_ref[...], wih_c_ref[...],
                  preferred_element_type=jnp.float32) + bih_ref[...])   # (TB, 3H)

    lens_col = lens_ref[...]                      # (TB, 1) int32
    gamma = gamma_ref[...]                        # (1, H)
    beta = beta_ref[...]                          # (1, H)

    # TODO(synk): for very long T, drive whh weight-stationary on the MXU
    # (pltpu.matmul_push_rhs / matmul_acc_lhs) instead of re-pushing it via
    # jnp.dot every unrolled step; also consider padding 3H up to a multiple
    # of 256 on v6e/v7x.
    def step(t, h_prev):                          # h_prev: (TB, H) f32
        off = pl.multiple_of(t * TB, TB)
        gx = xg_sc[pl.ds(off, TB), :] + cg        # (TB, 3H) f32
        gh = jnp.dot(h_prev.astype(whh_ref.dtype), whh_ref[...],
                     preferred_element_type=jnp.float32) + bhh_ref[...]
        r = jax.nn.sigmoid(gx[:, 0:H] + gh[:, 0:H])
        z = jax.nn.sigmoid(gx[:, H:2 * H] + gh[:, H:2 * H])
        n = jnp.tanh(gx[:, 2 * H:3 * H] + r * gh[:, 2 * H:3 * H])
        h_new = (1.0 - z) * n + z * h_prev

        # Padded positions (t >= len) emit a zero GRU row, exactly like
        # pad_packed_sequence; the fused LayerNorm maps that zero row to beta,
        # matching the reference which LayerNorms the padded zeros too.
        valid = t < lens_col                      # (TB, 1) bool
        h_out = jnp.where(valid, h_new, 0.0)
        mu = jnp.mean(h_out, axis=-1, keepdims=True)
        var = jnp.mean((h_out - mu) ** 2, axis=-1, keepdims=True)
        nrm = (h_out - mu) * jax.lax.rsqrt(var + 1e-5) * gamma + beta
        normed_ref[pl.ds(off, TB), :] = nrm.astype(normed_ref.dtype)

        return jnp.where(valid, h_new, h_prev)    # freeze h past seq_len

    h_last = jax.lax.fori_loop(0, T, step, h0_ref[...], unroll=min(T, 8))
    hidden_ref[...] = h_last


# ----------------------------------------------------------------------------
# Kernel 2: streamed-V logit statistics (running max / sum-exp per row).
# ----------------------------------------------------------------------------
def _logit_stats_kernel(normed_ref,    # (RT, H) bf16
                        wd_ref,        # (H, VT) bf16
                        bd_ref,        # (1, VT) f32
                        m_ref,         # out (RT, 1) f32 running max (accumulator)
                        s_ref):        # out (RT, 1) f32 running sum-exp
    @pl.when(pl.program_id(1) == 0)
    def _():
        m_ref[...] = jnp.full(m_ref.shape, -jnp.inf, dtype=m_ref.dtype)
        s_ref[...] = jnp.zeros(s_ref.shape, dtype=s_ref.dtype)

    logits = (jnp.dot(normed_ref[...], wd_ref[...],
                      preferred_element_type=jnp.float32) + bd_ref[...])
    m_prev = m_ref[...]
    m_new = jnp.maximum(m_prev, jnp.max(logits, axis=-1, keepdims=True))
    s_ref[...] = (s_ref[...] * jnp.exp(m_prev - m_new)
                  + jnp.sum(jnp.exp(logits - m_new), axis=-1, keepdims=True))
    m_ref[...] = m_new


# ----------------------------------------------------------------------------
# Kernel 3: normalized softmax, lane-dense (RT, VT) output tiles.
# ----------------------------------------------------------------------------
def _softmax_kernel(normed_ref,    # (RT, H) bf16
                    wd_ref,        # (H, VT) bf16
                    bd_ref,        # (1, VT) f32
                    m_ref,         # (RT, 1) f32 per-row max
                    s_ref,         # (RT, 1) f32 per-row sum-exp
                    probs_ref):    # out (RT, VT) f32
    logits = (jnp.dot(normed_ref[...], wd_ref[...],
                      preferred_element_type=jnp.float32) + bd_ref[...])
    inv_s = pl.reciprocal(s_ref[...], approx=False)   # exact: rows sum to 1
    probs_ref[...] = jnp.exp(logits - m_ref[...]) * inv_s


# ----------------------------------------------------------------------------
# Wrapper
# ----------------------------------------------------------------------------
def decoder_forward(params, context_vector, init_hidden_state, targets,
                    target_seq_lens):
    B, T, E = targets.shape
    C = context_vector.shape[-1]
    H = params["whh"].shape[0]
    V = params["wd"].shape[-1]

    # ---- batch padding / tiling -------------------------------------------
    BP = ((B + 15) // 16) * 16                       # pad batch to bf16 tile rows
    TB = _largest_tile(BP, (128, 64, 32, 16))        # batch-tile rows per grid step
    G = BP // TB                                     # GRU grid (parallel axis)
    rows = BP * T                                    # LN'd rows fed to the epilogue
    RT = _largest_tile(rows, (512, 256, 128, 64, 32, 16))
    VT = _largest_tile(V, (2048, 1024, 512, 256, 128))
    NV = V // VT
    vmem_limit = _vmem_limit_bytes()

    f32, bf16 = jnp.float32, jnp.bfloat16
    pad_b = BP - B

    # Time-major layout inside each batch tile so every timestep's rows are a
    # contiguous, sublane-aligned (TB, ...) slab.
    tgt_tm = (jnp.pad(targets.astype(f32), ((0, pad_b), (0, 0), (0, 0)))
              .reshape(G, TB, T, E).transpose(0, 2, 1, 3)
              .reshape(rows, E).astype(bf16))
    ctx_p = jnp.pad(context_vector.astype(f32), ((0, pad_b), (0, 0))).astype(bf16)
    h0_p = jnp.pad(init_hidden_state[0].astype(f32), ((0, pad_b), (0, 0)))
    lens_p = jnp.pad(target_seq_lens.astype(jnp.int32), (0, pad_b)).reshape(BP, 1)

    wih_t = params["wih_t"].astype(bf16)
    wih_c = params["wih_c"].astype(bf16)
    whh = params["whh"].astype(bf16)
    wd = params["wd"].astype(bf16)

    # ---- kernel 1: batched GRU recurrence + fused LayerNorm ----------------
    hidden_p, normed_flat = pl.pallas_call(
        _gru_ln_kernel,
        out_shape=(jax.ShapeDtypeStruct((BP, H), f32),
                   jax.ShapeDtypeStruct((rows, H), bf16)),
        grid=(G,),
        in_specs=[
            pl.BlockSpec((TB, 1), lambda g: (g, 0)),          # lens
            pl.BlockSpec((T * TB, E), lambda g: (g, 0)),      # targets (time-major)
            pl.BlockSpec((TB, C), lambda g: (g, 0)),          # context
            pl.BlockSpec((TB, H), lambda g: (g, 0)),          # h0
            pl.BlockSpec((E, 3 * H), lambda g: (0, 0)),       # W_ih target rows
            pl.BlockSpec((C, 3 * H), lambda g: (0, 0)),       # W_ih context rows
            pl.BlockSpec((H, 3 * H), lambda g: (0, 0)),       # W_hh fused
            pl.BlockSpec((1, 3 * H), lambda g: (0, 0)),       # b_ih
            pl.BlockSpec((1, 3 * H), lambda g: (0, 0)),       # b_hh
            pl.BlockSpec((1, H), lambda g: (0, 0)),           # gamma
            pl.BlockSpec((1, H), lambda g: (0, 0)),           # beta
        ],
        out_specs=[
            pl.BlockSpec((TB, H), lambda g: (g, 0)),          # final hidden
            pl.BlockSpec((T * TB, H), lambda g: (g, 0)),      # LayerNorm(GRU out)
        ],
        scratch_shapes=[pltpu.VMEM((T * TB, 3 * H), f32)],    # hoisted input gates
        compiler_params=pltpu.CompilerParams(
            dimension_semantics=("parallel",),
            vmem_limit_bytes=vmem_limit),
    )(lens_p, tgt_tm, ctx_p, h0_p, wih_t, wih_c, whh,
      params["bih"], params["bhh"], params["gamma"], params["beta"])

    # ---- kernel 2: V-tiled logit stats (running max / sum-exp) -------------
    m_rows, s_rows = pl.pallas_call(
        _logit_stats_kernel,
        out_shape=(jax.ShapeDtypeStruct((rows, 1), f32),
                   jax.ShapeDtypeStruct((rows, 1), f32)),
        grid=(rows // RT, NV),
        in_specs=[
            pl.BlockSpec((RT, H), lambda r, v: (r, 0)),
            pl.BlockSpec((H, VT), lambda r, v: (0, v)),
            pl.BlockSpec((1, VT), lambda r, v: (0, v)),
        ],
        out_specs=[
            pl.BlockSpec((RT, 1), lambda r, v: (r, 0)),
            pl.BlockSpec((RT, 1), lambda r, v: (r, 0)),
        ],
        compiler_params=pltpu.CompilerParams(
            dimension_semantics=("parallel", "arbitrary"),
            vmem_limit_bytes=vmem_limit),
    )(normed_flat, wd, params["bd"])

    # ---- kernel 3: normalized softmax probabilities ------------------------
    probs_flat = pl.pallas_call(
        _softmax_kernel,
        out_shape=jax.ShapeDtypeStruct((rows, V), f32),
        grid=(rows // RT, NV),
        in_specs=[
            pl.BlockSpec((RT, H), lambda r, v: (r, 0)),
            pl.BlockSpec((H, VT), lambda r, v: (0, v)),
            pl.BlockSpec((1, VT), lambda r, v: (0, v)),
            pl.BlockSpec((RT, 1), lambda r, v: (r, 0)),
            pl.BlockSpec((RT, 1), lambda r, v: (r, 0)),
        ],
        out_specs=pl.BlockSpec((RT, VT), lambda r, v: (r, v)),
        compiler_params=pltpu.CompilerParams(
            dimension_semantics=("parallel", "parallel"),
            vmem_limit_bytes=vmem_limit),
    )(normed_flat, wd, params["bd"], m_rows, s_rows)

    # ---- undo padding / time-major layout ----------------------------------
    probs = (probs_flat.reshape(G, T, TB, V).transpose(0, 2, 1, 3)
             .reshape(BP, T, V)[:B])
    hidden = hidden_p[:B][None]                      # (1, B, H) like nn.GRU
    return hidden, probs


# ----------------------------------------------------------------------------
# Pure-JAX reference reproducing the PyTorch forward semantics (f32).
# ----------------------------------------------------------------------------
def decoder_reference(params, context_vector, init_hidden_state, targets, target_seq_lens):
    B, T, _ = targets.shape
    H = params["whh"].shape[0]
    hp = jax.lax.Precision.HIGHEST
    wih = jnp.concatenate([params["wih_t"], params["wih_c"]], axis=0)      # (E+C, 3H)
    whh, bih, bhh = params["whh"], params["bih"], params["bhh"]
    ctx = jnp.broadcast_to(context_vector[:, None, :],
                           (B, T, context_vector.shape[-1]))
    x = jnp.concatenate([targets, ctx], axis=-1)
    h = init_hidden_state[0]
    outs = []
    for t in range(T):
        gx = jnp.dot(x[:, t, :], wih, precision=hp) + bih
        gh = jnp.dot(h, whh, precision=hp) + bhh
        r = jax.nn.sigmoid(gx[:, 0:H] + gh[:, 0:H])
        z = jax.nn.sigmoid(gx[:, H:2 * H] + gh[:, H:2 * H])
        n = jnp.tanh(gx[:, 2 * H:3 * H] + r * gh[:, 2 * H:3 * H])
        h_new = (1.0 - z) * n + z * h
        mask = (t < target_seq_lens)[:, None]
        h = jnp.where(mask, h_new, h)
        outs.append(jnp.where(mask, h_new, 0.0))
    outs = jnp.stack(outs, axis=1)
    mu = outs.mean(-1, keepdims=True)
    var = ((outs - mu) ** 2).mean(-1, keepdims=True)
    normed = (outs - mu) / jnp.sqrt(var + 1e-5) * params["gamma"][0] + params["beta"][0]
    logits = jnp.dot(normed, params["wd"], precision=hp) + params["bd"][0]
    probs = jax.nn.softmax(logits, axis=-1)
    return h[None], probs


def init_params(key, emb_dim, enc_hidden_dim, dec_hidden_dim, vocab_size):
    E, C, H, V = emb_dim, enc_hidden_dim, dec_hidden_dim, vocab_size
    Din = E + C
    k = 1.0 / np.sqrt(H)
    ks = jax.random.split(key, 6)
    wih = jax.random.uniform(ks[0], (Din, 3 * H), jnp.float32, -k, k)  # columns: r | z | n
    return dict(
        wih_t=wih[:E],                                                  # (E, 3H)
        wih_c=wih[E:],                                                  # (C, 3H)
        whh=jax.random.uniform(ks[1], (H, 3 * H), jnp.float32, -k, k),  # (H, 3H)
        bih=jax.random.uniform(ks[2], (1, 3 * H), jnp.float32, -k, k),
        bhh=jax.random.uniform(ks[3], (1, 3 * H), jnp.float32, -k, k),
        gamma=jnp.ones((1, H), jnp.float32),    # nn.LayerNorm default init
        beta=jnp.zeros((1, H), jnp.float32),
        wd=jax.random.uniform(ks[4], (H, V), jnp.float32, -k, k),
        bd=jax.random.uniform(ks[5], (1, V), jnp.float32, -k, k),
    )


if __name__ == "__main__":
    # Small shapes consistent with the module; H and V chosen lane-friendly.
    B, T = 3, 8
    emb_dim, enc_hidden_dim, dec_hidden_dim, vocab_size = 64, 128, 128, 256

    root = jax.random.PRNGKey(0)
    kp, kc, kh, kt = jax.random.split(root, 4)
    params = init_params(kp, emb_dim, enc_hidden_dim, dec_hidden_dim, vocab_size)

    context_vector = jax.random.normal(kc, (B, enc_hidden_dim), jnp.float32)
    init_hidden_state = jax.random.normal(kh, (1, B, dec_hidden_dim), jnp.float32)
    targets = jax.random.normal(kt, (B, T, emb_dim), jnp.float32)
    target_seq_lens = jnp.array([T, 5, 3], dtype=jnp.int32)   # max(lens) == T

    hidden, probs = jax.jit(decoder_forward)(
        params, context_vector, init_hidden_state, targets, target_seq_lens)
    jax.block_until_ready((hidden, probs))

    hidden_ref, probs_ref = decoder_reference(
        params, context_vector, init_hidden_state, targets, target_seq_lens)

    assert hidden.shape == (1, B, dec_hidden_dim)
    assert probs.shape == (B, T, vocab_size)
    # bf16 MXU operands (f32 accumulation): the hidden tolerance accounts for
    # the 8-step recurrence; probs are tighter because softmax damps the error.
    assert float(jnp.max(jnp.abs(hidden - hidden_ref))) < 3e-2
    assert float(jnp.max(jnp.abs(probs - probs_ref))) < 5e-3
    assert float(jnp.max(jnp.abs(jnp.sum(probs, axis=-1) - 1.0))) < 1e-3

    print("KERNEL_OK")
</pallas_src>

<mosaic_0001>
module attributes {stable_mosaic.version = 11 : i64} {
  func.func @_logit_stats_kernel(%arg0: i32, %arg1: i32, %arg2: memref<128x128xbf16, #tpu.memory_space<vmem>>, %arg3: memref<128x256xbf16, #tpu.memory_space<vmem>>, %arg4: memref<1x256xf32, #tpu.memory_space<vmem>>, %arg5: memref<128x1xf32, #tpu.memory_space<vmem>>, %arg6: memref<128x1xf32, #tpu.memory_space<vmem>>) attributes {dimension_semantics = [#tpu.dimension_semantics<parallel>, #tpu.dimension_semantics<arbitrary>], iteration_bounds = array<i64: 1, 1>, scalar_prefetch = 0 : i64, scratch_operands = 0 : i64, tpu.core_type = #tpu.core_type<tc>, window_params = [{transform_indices = @transform_0, window_bounds = array<i64: 128, 128>}, {transform_indices = @transform_1, window_bounds = array<i64: 128, 256>}, {transform_indices = @transform_2, window_bounds = array<i64: 1, 256>}, {transform_indices = @transform_3, window_bounds = array<i64: 128, 1>}, {transform_indices = @transform_4, window_bounds = array<i64: 128, 1>}]} {
    %c0_i32 = arith.constant 0 : i32
    %0 = arith.cmpi eq, %arg1, %c0_i32 : i32
    %1 = arith.extui %0 : i1 to i32
    %c0_i32_0 = arith.constant 0 : i32
    %2 = arith.cmpi ne, %1, %c0_i32_0 : i32
    scf.if %2 {
      %cst_16 = arith.constant 0xFF800000 : f32
      %25 = vector.broadcast %cst_16 : f32 to vector<128x1xf32>
      %c0_17 = arith.constant 0 : index
      %c0_18 = arith.constant 0 : index
      %26 = vector.load %arg5[%c0_17, %c0_18] : memref<128x1xf32, #tpu.memory_space<vmem>>, vector<128x1xf32>
      tpu.vector_store %arg5[%c0_17, %c0_18], %25 {strides = array<i32>} : memref<128x1xf32, #tpu.memory_space<vmem>>, vector<128x1xf32>,
      %cst_19 = arith.constant 0.000000e+00 : f32
      %27 = vector.broadcast %cst_19 : f32 to vector<128x1xf32>
      %c0_20 = arith.constant 0 : index
      %c0_21 = arith.constant 0 : index
      %28 = vector.load %arg6[%c0_20, %c0_21] : memref<128x1xf32, #tpu.memory_space<vmem>>, vector<128x1xf32>
      tpu.vector_store %arg6[%c0_20, %c0_21], %27 {strides = array<i32>} : memref<128x1xf32, #tpu.memory_space<vmem>>, vector<128x1xf32>,
    } else {
    }
    %c0 = arith.constant 0 : index
    %c0_1 = arith.constant 0 : index
    %3 = vector.load %arg2[%c0, %c0_1] : memref<128x128xbf16, #tpu.memory_space<vmem>>, vector<128x128xbf16>
    %c0_2 = arith.constant 0 : index
    %c0_3 = arith.constant 0 : index
    %4 = vector.load %arg3[%c0_2, %c0_3] : memref<128x256xbf16, #tpu.memory_space<vmem>>, vector<128x256xbf16>
    %cst = arith.constant dense<0.000000e+00> : vector<128x256xf32>
    %5 = tpu.matmul %3, %4, %cst {dimension_numbers = #tpu.dot_dimension_numbers<[1], [0], [0], [1], [0, 0, 1, 1], [], []>} : vector<128x128xbf16>, vector<128x256xbf16>, vector<128x256xf32> -> vector<128x256xf32>
    %c0_4 = arith.constant 0 : index
    %c0_5 = arith.constant 0 : index
    %6 = vector.load %arg4[%c0_4, %c0_5] : memref<1x256xf32, #tpu.memory_space<vmem>>, vector<1x256xf32>
    %7 = vector.broadcast %6 : vector<1x256xf32> to vector<128x256xf32>
    %8 = arith.addf %5, %7 : vector<128x256xf32>
    %c0_6 = arith.constant 0 : index
    %c0_7 = arith.constant 0 : index
    %9 = vector.load %arg5[%c0_6, %c0_7] : memref<128x1xf32, #tpu.memory_space<vmem>>, vector<128x1xf32>
    %cst_8 = arith.constant dense<0xFF800000> : vector<128xf32>
    %10 = vector.multi_reduction <maximumf>, %8, %cst_8 [1] : vector<128x256xf32> to vector<128xf32>
    %11 = vector.shape_cast %10 : vector<128xf32> to vector<128x1xf32>
    %12 = arith.maximumf %9, %11 : vector<128x1xf32>
    %c0_9 = arith.constant 0 : index
    %c0_10 = arith.constant 0 : index
    %13 = vector.load %arg6[%c0_9, %c0_10] : memref<128x1xf32, #tpu.memory_space<vmem>>, vector<128x1xf32>
    %14 = arith.subf %9, %12 : vector<128x1xf32>
    %15 = math.exp %14 : vector<128x1xf32>
    %16 = arith.mulf %13, %15 : vector<128x1xf32>
    %17 = vector.broadcast %12 : vector<128x1xf32> to vector<128x256xf32>
    %18 = arith.subf %8, %17 : vector<128x256xf32>
    %19 = math.exp %18 : vector<128x256xf32>
    %cst_11 = arith.constant dense<0.000000e+00> : vector<128xf32>
    %20 = vector.multi_reduction <add>, %19, %cst_11 [1] : vector<128x256xf32> to vector<128xf32>
    %21 = vector.shape_cast %20 : vector<128xf32> to vector<128x1xf32>
    %22 = arith.addf %16, %21 : vector<128x1xf32>
    %c0_12 = arith.constant 0 : index
    %c0_13 = arith.constant 0 : index
    %23 = vector.load %arg6[%c0_12, %c0_13] : memref<128x1xf32, #tpu.memory_space<vmem>>, vector<128x1xf32>
    tpu.vector_store %arg6[%c0_12, %c0_13], %22 {strides = array<i32>} : memref<128x1xf32, #tpu.memory_space<vmem>>, vector<128x1xf32>,
    %c0_14 = arith.constant 0 : index
    %c0_15 = arith.constant 0 : index
    %24 = vector.load %arg5[%c0_14, %c0_15] : memref<128x1xf32, #tpu.memory_space<vmem>>, vector<128x1xf32>
    tpu.vector_store %arg5[%c0_14, %c0_15], %12 {strides = array<i32>} : memref<128x1xf32, #tpu.memory_space<vmem>>, vector<128x1xf32>,
    return
  }
  func.func @transform_0(%arg0: i32, %arg1: i32) -> (i32, i32) {
    %c0_i32 = arith.constant 0 : i32
    %c0_i32_0 = arith.constant 0 : i32
    return %arg0, %c0_i32 : i32, i32
  }
  func.func @transform_1(%arg0: i32, %arg1: i32) -> (i32, i32) {
    %c0_i32 = arith.constant 0 : i32
    %c0_i32_0 = arith.constant 0 : i32
    return %c0_i32, %arg1 : i32, i32
  }
  func.func @transform_2(%arg0: i32, %arg1: i32) -> (i32, i32) {
    %c0_i32 = arith.constant 0 : i32
    %c0_i32_0 = arith.constant 0 : i32
    return %c0_i32, %arg1 : i32, i32
  }
  func.func @transform_3(%arg0: i32, %arg1: i32) -> (i32, i32) {
    %c0_i32 = arith.constant 0 : i32
    %c0_i32_0 = arith.constant 0 : i32
    return %arg0, %c0_i32 : i32, i32
  }
  func.func @transform_4(%arg0: i32, %arg1: i32) -> (i32, i32) {
    %c0_i32 = arith.constant 0 : i32
    %c0_i32_0 = arith.constant 0 : i32
    return %arg0, %c0_i32 : i32, i32
  }
}

module attributes {stable_mosaic.version = 11 : i64} {
  func.func @_softmax_kernel(%arg0: i32, %arg1: i32, %arg2: memref<128x128xbf16, #tpu.memory_space<vmem>>, %arg3: memref<128x256xbf16, #tpu.memory_space<vmem>>, %arg4: memref<1x256xf32, #tpu.memory_space<vmem>>, %arg5: memref<128x1xf32, #tpu.memory_space<vmem>>, %arg6: memref<128x1xf32, #tpu.memory_space<vmem>>, %arg7: memref<128x256xf32, #tpu.memory_space<vmem>>) attributes {dimension_semantics = [#tpu.dimension_semantics<parallel>, #tpu.dimension_semantics<parallel>], iteration_bounds = array<i64: 1, 1>, scalar_prefetch = 0 : i64, scratch_operands = 0 : i64, tpu.core_type = #tpu.core_type<tc>, window_params = [{transform_indices = @transform_0, window_bounds = array<i64: 128, 128>}, {transform_indices = @transform_1, window_bounds = array<i64: 128, 256>}, {transform_indices = @transform_2, window_bounds = array<i64: 1, 256>}, {transform_indices = @transform_3, window_bounds = array<i64: 128, 1>}, {transform_indices = @transform_4, window_bounds = array<i64: 128, 1>}, {transform_indices = @transform_5, window_bounds = array<i64: 128, 256>}]} {
    %c0 = arith.constant 0 : index
    %c0_0 = arith.constant 0 : index
    %0 = vector.load %arg2[%c0, %c0_0] : memref<128x128xbf16, #tpu.memory_space<vmem>>, vector<128x128xbf16>
    %c0_1 = arith.constant 0 : index
    %c0_2 = arith.constant 0 : index
    %1 = vector.load %arg3[%c0_1, %c0_2] : memref<128x256xbf16, #tpu.memory_space<vmem>>, vector<128x256xbf16>
    %cst = arith.constant dense<0.000000e+00> : vector<128x256xf32>
    %2 = tpu.matmul %0, %1, %cst {dimension_numbers = #tpu.dot_dimension_numbers<[1], [0], [0], [1], [0, 0, 1, 1], [], []>} : vector<128x128xbf16>, vector<128x256xbf16>, vector<128x256xf32> -> vector<128x256xf32>
    %c0_3 = arith.constant 0 : index
    %c0_4 = arith.constant 0 : index
    %3 = vector.load %arg4[%c0_3, %c0_4] : memref<1x256xf32, #tpu.memory_space<vmem>>, vector<1x256xf32>
    %4 = vector.broadcast %3 : vector<1x256xf32> to vector<128x256xf32>
    %5 = arith.addf %2, %4 : vector<128x256xf32>
    %c0_5 = arith.constant 0 : index
    %c0_6 = arith.constant 0 : index
    %6 = vector.load %arg6[%c0_5, %c0_6] : memref<128x1xf32, #tpu.memory_space<vmem>>, vector<128x1xf32>
    %7 = tpu.reciprocal %6 : vector<128x1xf32> -> vector<128x1xf32>
    %c0_7 = arith.constant 0 : index
    %c0_8 = arith.constant 0 : index
    %8 = vector.load %arg5[%c0_7, %c0_8] : memref<128x1xf32, #tpu.memory_space<vmem>>, vector<128x1xf32>
    %9 = vector.broadcast %8 : vector<128x1xf32> to vector<128x256xf32>
    %10 = arith.subf %5, %9 : vector<128x256xf32>
    %11 = math.exp %10 : vector<128x256xf32>
    %12 = vector.broadcast %7 : vector<128x1xf32> to vector<128x256xf32>
    %13 = arith.mulf %11, %12 : vector<128x256xf32>
    %c0_9 = arith.constant 0 : index
    %c0_10 = arith.constant 0 : index
    %14 = vector.load %arg7[%c0_9, %c0_10] : memref<128x256xf32, #tpu.memory_space<vmem>>, vector<128x256xf32>
    tpu.vector_store %arg7[%c0_9, %c0_10], %13 {strides = array<i32>} : memref<128x256xf32, #tpu.memory_space<vmem>>, vector<128x256xf32>,
    return
  }
  func.func @transform_0(%arg0: i32, %arg1: i32) -> (i32, i32) {
    %c0_i32 = arith.constant 0 : i32
    %c0_i32_0 = arith.constant 0 : i32
    return %arg0, %c0_i32 : i32, i32
  }
  func.func @transform_1(%arg0: i32, %arg1: i32) -> (i32, i32) {
    %c0_i32 = arith.constant 0 : i32
    %c0_i32_0 = arith.constant 0 : i32
    return %c0_i32, %arg1 : i32, i32
  }
  func.func @transform_2(%arg0: i32, %arg1: i32) -> (i32, i32) {
    %c0_i32 = arith.constant 0 : i32
    %c0_i32_0 = arith.constant 0 : i32
    return %c0_i32, %arg1 : i32, i32
  }
  func.func @transform_3(%arg0: i32, %arg1: i32) -> (i32, i32) {
    %c0_i32 = arith.constant 0 : i32
    %c0_i32_0 = arith.constant 0 : i32
    return %arg0, %c0_i32 : i32, i32
  }
  func.func @transform_4(%arg0: i32, %arg1: i32) -> (i32, i32) {
    %c0_i32 = arith.constant 0 : i32
    %c0_i32_0 = arith.constant 0 : i32
    return %arg0, %c0_i32 : i32, i32
  }
  func.func @transform_5(%arg0: i32, %arg1: i32) -> (i32, i32) {
    %c0_i32 = arith.constant 0 : i32
    return %arg0, %arg1 : i32, i32
  }
}

module attributes {stable_mosaic.version = 11 : i64} {
  func.func @_gru_ln_kernel(%arg0: i32, %arg1: memref<16x1xi32, #tpu.memory_space<vmem>>, %arg2: memref<128x64xbf16, #tpu.memory_space<vmem>>, %arg3: memref<16x128xbf16, #tpu.memory_space<vmem>>, %arg4: memref<16x128xf32, #tpu.memory_space<vmem>>, %arg5: memref<64x384xbf16, #tpu.memory_space<vmem>>, %arg6: memref<128x384xbf16, #tpu.memory_space<vmem>>, %arg7: memref<128x384xbf16, #tpu.memory_space<vmem>>, %arg8: memref<1x384xf32, #tpu.memory_space<vmem>>, %arg9: memref<1x384xf32, #tpu.memory_space<vmem>>, %arg10: memref<1x128xf32, #tpu.memory_space<vmem>>, %arg11: memref<1x128xf32, #tpu.memory_space<vmem>>, %arg12: memref<16x128xf32, #tpu.memory_space<vmem>>, %arg13: memref<128x128xbf16, #tpu.memory_space<vmem>>, %arg14: memref<128x384xf32, #tpu.memory_space<vmem>>) attributes {dimension_semantics = [#tpu.dimension_semantics<parallel>], iteration_bounds = array<i64: 1>, scalar_prefetch = 0 : i64, scratch_operands = 1 : i64, tpu.core_type = #tpu.core_type<tc>, window_params = [{transform_indices = @transform_0, window_bounds = array<i64: 16, 1>}, {transform_indices = @transform_1, window_bounds = array<i64: 128, 64>}, {transform_indices = @transform_2, window_bounds = array<i64: 16, 128>}, {transform_indices = @transform_3, window_bounds = array<i64: 16, 128>}, {pipeline_mode = #tpu.pipeline_mode<synchronous>, transform_indices = @transform_4, window_bounds = array<i64: 64, 384>}, {pipeline_mode = #tpu.pipeline_mode<synchronous>, transform_indices = @transform_5, window_bounds = array<i64: 128, 384>}, {pipeline_mode = #tpu.pipeline_mode<synchronous>, transform_indices = @transform_6, window_bounds = array<i64: 128, 384>}, {pipeline_mode = #tpu.pipeline_mode<synchronous>, transform_indices = @transform_7, window_bounds = array<i64: 1, 384>}, {pipeline_mode = #tpu.pipeline_mode<synchronous>, transform_indices = @transform_8, window_bounds = array<i64: 1, 384>}, {pipeline_mode = #tpu.pipeline_mode<synchronous>, transform_indices = @transform_9, window_bounds = array<i64: 1, 128>}, {pipeline_mode = #tpu.pipeline_mode<synchronous>, transform_indices = @transform_10, window_bounds = array<i64: 1, 128>}, {transform_indices = @transform_11, window_bounds = array<i64: 16, 128>}, {transform_indices = @transform_12, window_bounds = array<i64: 128, 128>}]} {
    %c0 = arith.constant 0 : index
    %c0_0 = arith.constant 0 : index
    %0 = vector.load %arg2[%c0, %c0_0] : memref<128x64xbf16, #tpu.memory_space<vmem>>, vector<128x64xbf16>
    %c0_1 = arith.constant 0 : index
    %c0_2 = arith.constant 0 : index
    %1 = vector.load %arg5[%c0_1, %c0_2] : memref<64x384xbf16, #tpu.memory_space<vmem>>, vector<64x384xbf16>
    %cst = arith.constant dense<0.000000e+00> : vector<128x384xf32>
    %2 = tpu.matmul %0, %1, %cst {dimension_numbers = #tpu.dot_dimension_numbers<[1], [0], [0], [1], [0, 0, 1, 1], [], []>} : vector<128x64xbf16>, vector<64x384xbf16>, vector<128x384xf32> -> vector<128x384xf32>
    %c0_3 = arith.constant 0 : index
    %c0_4 = arith.constant 0 : index
    %3 = vector.load %arg14[%c0_3, %c0_4] : memref<128x384xf32, #tpu.memory_space<vmem>>, vector<128x384xf32>
    tpu.vector_store %arg14[%c0_3, %c0_4], %2 {strides = array<i32>} : memref<128x384xf32, #tpu.memory_space<vmem>>, vector<128x384xf32>,
    %c0_5 = arith.constant 0 : index
    %c0_6 = arith.constant 0 : index
    %4 = vector.load %arg3[%c0_5, %c0_6] : memref<16x128xbf16, #tpu.memory_space<vmem>>, vector<16x128xbf16>
    %c0_7 = arith.constant 0 : index
    %c0_8 = arith.constant 0 : index
    %5 = vector.load %arg6[%c0_7, %c0_8] : memref<128x384xbf16, #tpu.memory_space<vmem>>, vector<128x384xbf16>
    %cst_9 = arith.constant dense<0.000000e+00> : vector<16x384xf32>
    %6 = tpu.matmul %4, %5, %cst_9 {dimension_numbers = #tpu.dot_dimension_numbers<[1], [0], [0], [1], [0, 0, 1, 1], [], []>} : vector<16x128xbf16>, vector<128x384xbf16>, vector<16x384xf32> -> vector<16x384xf32>
    %c0_10 = arith.constant 0 : index
    %c0_11 = arith.constant 0 : index
    %7 = vector.load %arg8[%c0_10, %c0_11] : memref<1x384xf32, #tpu.memory_space<vmem>>, vector<1x384xf32>
    %8 = vector.broadcast %7 : vector<1x384xf32> to vector<16x384xf32>
    %9 = arith.addf %6, %8 : vector<16x384xf32>
    %c0_12 = arith.constant 0 : index
    %c0_13 = arith.constant 0 : index
    %10 = vector.load %arg1[%c0_12, %c0_13] : memref<16x1xi32, #tpu.memory_space<vmem>>, vector<16x1xi32>
    %c0_14 = arith.constant 0 : index
    %c0_15 = arith.constant 0 : index
    %11 = vector.load %arg10[%c0_14, %c0_15] : memref<1x128xf32, #tpu.memory_space<vmem>>, vector<1x128xf32>
    %c0_16 = arith.constant 0 : index
    %c0_17 = arith.constant 0 : index
    %12 = vector.load %arg11[%c0_16, %c0_17] : memref<1x128xf32, #tpu.memory_space<vmem>>, vector<1x128xf32>
    %c0_18 = arith.constant 0 : index
    %c0_19 = arith.constant 0 : index
    %13 = vector.load %arg4[%c0_18, %c0_19] : memref<16x128xf32, #tpu.memory_space<vmem>>, vector<16x128xf32>
    %c0_i32 = arith.constant 0 : i32
    %c16_i32 = arith.constant 16 : i32
    %14 = arith.muli %c0_i32, %c16_i32 : i32
    %15 = tpu.assume_multiple %14, 16 : i32
    %16 = arith.index_cast %15 : i32 to index
    %c0_20 = arith.constant 0 : index
    %17 = vector.load %arg14[%16, %c0_20] : memref<128x384xf32, #tpu.memory_space<vmem>>, vector<16x384xf32>
    %18 = arith.addf %17, %9 : vector<16x384xf32>
    %19 = arith.truncf %13 : vector<16x128xf32> to vector<16x128xbf16>
    %c0_21 = arith.constant 0 : index
    %c0_22 = arith.constant 0 : index
    %20 = vector.load %arg7[%c0_21, %c0_22] : memref<128x384xbf16, #tpu.memory_space<vmem>>, vector<128x384xbf16>
    %cst_23 = arith.constant dense<0.000000e+00> : vector<16x384xf32>
    %21 = tpu.matmul %19, %20, %cst_23 {dimension_numbers = #tpu.dot_dimension_numbers<[1], [0], [0], [1], [0, 0, 1, 1], [], []>} : vector<16x128xbf16>, vector<128x384xbf16>, vector<16x384xf32> -> vector<16x384xf32>
    %c0_24 = arith.constant 0 : index
    %c0_25 = arith.constant 0 : index
    %22 = vector.load %arg9[%c0_24, %c0_25] : memref<1x384xf32, #tpu.memory_space<vmem>>, vector<1x384xf32>
    %23 = vector.broadcast %22 : vector<1x384xf32> to vector<16x384xf32>
    %24 = arith.addf %21, %23 : vector<16x384xf32>
    %25 = vector.extract_strided_slice %18 {offsets = [0, 0], sizes = [16, 128], strides = [1, 1]} : vector<16x384xf32> to vector<16x128xf32>
    %26 = vector.extract_strided_slice %24 {offsets = [0, 0], sizes = [16, 128], strides = [1, 1]} : vector<16x384xf32> to vector<16x128xf32>
    %27 = arith.addf %25, %26 : vector<16x128xf32>
    %28 = arith.negf %27 : vector<16x128xf32>
    %29 = math.exp %28 : vector<16x128xf32>
    %cst_26 = arith.constant 1.000000e+00 : f32
    %30 = vector.broadcast %cst_26 : f32 to vector<16x128xf32>
    %31 = arith.addf %30, %29 : vector<16x128xf32>
    %32 = arith.divf %30, %31 : vector<16x128xf32>
    %33 = vector.extract_strided_slice %18 {offsets = [0, 128], sizes = [16, 128], strides = [1, 1]} : vector<16x384xf32> to vector<16x128xf32>
    %34 = vector.extract_strided_slice %24 {offsets = [0, 128], sizes = [16, 128], strides = [1, 1]} : vector<16x384xf32> to vector<16x128xf32>
    %35 = arith.addf %33, %34 : vector<16x128xf32>
    %36 = arith.negf %35 : vector<16x128xf32>
    %37 = math.exp %36 : vector<16x128xf32>
    %cst_27 = arith.constant 1.000000e+00 : f32
    %38 = vector.broadcast %cst_27 : f32 to vector<16x128xf32>
    %39 = arith.addf %38, %37 : vector<16x128xf32>
    %40 = arith.divf %38, %39 : vector<16x128xf32>
    %41 = vector.extract_strided_slice %18 {offsets = [0, 256], sizes = [16, 128], strides = [1, 1]} : vector<16x384xf32> to vector<16x128xf32>
    %42 = vector.extract_strided_slice %24 {offsets = [0, 256], sizes = [16, 128], strides = [1, 1]} : vector<16x384xf32> to vector<16x128xf32>
    %43 = arith.mulf %32, %42 : vector<16x128xf32>
    %44 = arith.addf %41, %43 : vector<16x128xf32>
    %45 = math.tanh %44 : vector<16x128xf32>
    %cst_28 = arith.constant 1.000000e+00 : f32
    %46 = vector.broadcast %cst_28 : f32 to vector<16x128xf32>
    %47 = arith.subf %46, %40 : vector<16x128xf32>
    %48 = arith.mulf %47, %45 : vector<16x128xf32>
    %49 = arith.mulf %40, %13 : vector<16x128xf32>
    %50 = arith.addf %48, %49 : vector<16x128xf32>
    %51 = vector.broadcast %c0_i32 : i32 to vector<16x1xi32>
    %52 = arith.cmpi slt, %51, %10 : vector<16x1xi32>
    %cst_29 = arith.constant 0.000000e+00 : f32
    %53 = vector.shape_cast %52 : vector<16x1xi1> to vector<16x1xi1>
    %54 = vector.broadcast %53 : vector<16x1xi1> to vector<16x128xi1>
    %55 = vector.broadcast %cst_29 : f32 to vector<16x128xf32>
    %56 = arith.select %54, %50, %55 : vector<16x128xi1>, vector<16x128xf32>
    %cst_30 = arith.constant dense<0.000000e+00> : vector<16xf32>
    %57 = vector.multi_reduction <add>, %56, %cst_30 [1] : vector<16x128xf32> to vector<16xf32>
    %58 = vector.shape_cast %57 : vector<16xf32> to vector<16x1xf32>
    %cst_31 = arith.constant 1.280000e+02 : f32
    %59 = vector.broadcast %cst_31 : f32 to vector<16x1xf32>
    %60 = arith.divf %58, %59 : vector<16x1xf32>
    %61 = vector.broadcast %60 : vector<16x1xf32> to vector<16x128xf32>
    %62 = arith.subf %56, %61 : vector<16x128xf32>
    %63 = arith.mulf %62, %62 : vector<16x128xf32>
    %cst_32 = arith.constant dense<0.000000e+00> : vector<16xf32>
    %64 = vector.multi_reduction <add>, %63, %cst_32 [1] : vector<16x128xf32> to vector<16xf32>
    %65 = vector.shape_cast %64 : vector<16xf32> to vector<16x1xf32>
    %cst_33 = arith.constant 1.280000e+02 : f32
    %66 = vector.broadcast %cst_33 : f32 to vector<16x1xf32>
    %67 = arith.divf %65, %66 : vector<16x1xf32>
    %68 = vector.broadcast %60 : vector<16x1xf32> to vector<16x128xf32>
    %69 = arith.subf %56, %68 : vector<16x128xf32>
    %cst_34 = arith.constant 9.99999974E-6 : f32
    %70 = vector.broadcast %cst_34 : f32 to vector<16x1xf32>
    %71 = arith.addf %67, %70 : vector<16x1xf32>
    %72 = math.rsqrt %71 : vector<16x1xf32>
    %73 = vector.broadcast %72 : vector<16x1xf32> to vector<16x128xf32>
    %74 = arith.mulf %69, %73 : vector<16x128xf32>
    %75 = vector.broadcast %11 : vector<1x128xf32> to vector<16x128xf32>
    %76 = arith.mulf %74, %75 : vector<16x128xf32>
    %77 = vector.broadcast %12 : vector<1x128xf32> to vector<16x128xf32>
    %78 = arith.addf %76, %77 : vector<16x128xf32>
    %79 = arith.truncf %78 : vector<16x128xf32> to vector<16x128xbf16>
    %80 = arith.index_cast %15 : i32 to index
    %c0_35 = arith.constant 0 : index
    %81 = vector.load %arg13[%80, %c0_35] : memref<128x128xbf16, #tpu.memory_space<vmem>>, vector<16x128xbf16>
    tpu.vector_store %arg13[%80, %c0_35], %79 {strides = array<i32>} : memref<128x128xbf16, #tpu.memory_space<vmem>>, vector<16x128xbf16>,
    %82 = vector.shape_cast %52 : vector<16x1xi1> to vector<16x1xi1>
    %83 = vector.broadcast %82 : vector<16x1xi1> to vector<16x128xi1>
    %84 = arith.select %83, %50, %13 : vector<16x128xi1>, vector<16x128xf32>
    %c1_i32 = arith.constant 1 : i32
    %c16_i32_36 = arith.constant 16 : i32
    %85 = arith.muli %c1_i32, %c16_i32_36 : i32
    %86 = tpu.assume_multiple %85, 16 : i32
    %87 = arith.index_cast %86 : i32 to index
    %c0_37 = arith.constant 0 : index
    %88 = vector.load %arg14[%87, %c0_37] : memref<128x384xf32, #tpu.memory_space<vmem>>, vector<16x384xf32>
    %89 = arith.addf %88, %9 : vector<16x384xf32>
    %90 = arith.truncf %84 : vector<16x128xf32> to vector<16x128xbf16>
    %c0_38 = arith.constant 0 : index
    %c0_39 = arith.constant 0 : index
    %91 = vector.load %arg7[%c0_38, %c0_39] : memref<128x384xbf16, #tpu.memory_space<vmem>>, vector<128x384xbf16>
    %cst_40 = arith.constant dense<0.000000e+00> : vector<16x384xf32>
    %92 = tpu.matmul %90, %91, %cst_40 {dimension_numbers = #tpu.dot_dimension_numbers<[1], [0], [0], [1], [0, 0, 1, 1], [], []>} : vector<16x128xbf16>, vector<128x384xbf16>, vector<16x384xf32> -> vector<16x384xf32>
    %c0_41 = arith.constant 0 : index
    %c0_42 = arith.constant 0 : index
    %93 = vector.load %arg9[%c0_41, %c0_42] : memref<1x384xf32, #tpu.memory_space<vmem>>, vector<1x384xf32>
    %94 = vector.broadcast %93 : vector<1x384xf32> to vector<16x384xf32>
    %95 = arith.addf %92, %94 : vector<16x384xf32>
    %96 = vector.extract_strided_slice %89 {offsets = [0, 0], sizes = [16, 128], strides = [1, 1]} : vector<16x384xf32> to vector<16x128xf32>
    %97 = vector.extract_strided_slice %95 {offsets = [0, 0], sizes = [16, 128], strides = [1, 1]} : vector<16x384xf32> to vector<16x128xf32>
    %98 = arith.addf %96, %97 : vector<16x128xf32>
    %99 = arith.negf %98 : vector<16x128xf32>
    %100 = math.exp %99 : vector<16x128xf32>
    %cst_43 = arith.constant 1.000000e+00 : f32
    %101 = vector.broadcast %cst_43 : f32 to vector<16x128xf32>
    %102 = arith.addf %101, %100 : vector<16x128xf32>
    %103 = arith.divf %101, %102 : vector<16x128xf32>
    %104 = vector.extract_strided_slice %89 {offsets = [0, 128], sizes = [16, 128], strides = [1, 1]} : vector<16x384xf32> to vector<16x128xf32>
    %105 = vector.extract_strided_slice %95 {offsets = [0, 128], sizes = [16, 128], strides = [1, 1]} : vector<16x384xf32> to vector<16x128xf32>
    %106 = arith.addf %104, %105 : vector<16x128xf32>
    %107 = arith.negf %106 : vector<16x128xf32>
    %108 = math.exp %107 : vector<16x128xf32>
    %cst_44 = arith.constant 1.000000e+00 : f32
    %109 = vector.broadcast %cst_44 : f32 to vector<16x128xf32>
    %110 = arith.addf %109, %108 : vector<16x128xf32>
    %111 = arith.divf %109, %110 : vector<16x128xf32>
    %112 = vector.extract_strided_slice %89 {offsets = [0, 256], sizes = [16, 128], strides = [1, 1]} : vector<16x384xf32> to vector<16x128xf32>
    %113 = vector.extract_strided_slice %95 {offsets = [0, 256], sizes = [16, 128], strides = [1, 1]} : vector<16x384xf32> to vector<16x128xf32>
    %114 = arith.mulf %103, %113 : vector<16x128xf32>
    %115 = arith.addf %112, %114 : vector<16x128xf32>
    %116 = math.tanh %115 : vector<16x128xf32>
    %cst_45 = arith.constant 1.000000e+00 : f32
    %117 = vector.broadcast %cst_45 : f32 to vector<16x128xf32>
    %118 = arith.subf %117, %111 : vector<16x128xf32>
    %119 = arith.mulf %118, %116 : vector<16x128xf32>
    %120 = arith.mulf %111, %84 : vector<16x128xf32>
    %121 = arith.addf %119, %120 : vector<16x128xf32>
    %122 = vector.broadcast %c1_i32 : i32 to vector<16x1xi32>
    %123 = arith.cmpi slt, %122, %10 : vector<16x1xi32>
    %cst_46 = arith.constant 0.000000e+00 : f32
    %124 = vector.shape_cast %123 : vector<16x1xi1> to vector<16x1xi1>
    %125 = vector.broadcast %124 : vector<16x1xi1> to vector<16x128xi1>
    %126 = vector.broadcast %cst_46 : f32 to vector<16x128xf32>
    %127 = arith.select %125, %121, %126 : vector<16x128xi1>, vector<16x128xf32>
    %cst_47 = arith.constant dense<0.000000e+00> : vector<16xf32>
    %128 = vector.multi_reduction <add>, %127, %cst_47 [1] : vector<16x128xf32> to vector<16xf32>
    %129 = vector.shape_cast %128 : vector<16xf32> to vector<16x1xf32>
    %cst_48 = arith.constant 1.280000e+02 : f32
    %130 = vector.broadcast %cst_48 : f32 to vector<16x1xf32>
    %131 = arith.divf %129, %130 : vector<16x1xf32>
    %132 = vector.broadcast %131 : vector<16x1xf32> to vector<16x128xf32>
    %133 = arith.subf %127, %132 : vector<16x128xf32>
    %134 = arith.mulf %133, %133 : vector<16x128xf32>
    %cst_49 = arith.constant dense<0.000000e+00> : vector<16xf32>
    %135 = vector.multi_reduction <add>, %134, %cst_49 [1] : vector<16x128xf32> to vector<16xf32>
    %136 = vector.shape_cast %135 : vector<16xf32> to vector<16x1xf32>
    %cst_50 = arith.constant 1.280000e+02 : f32
    %137 = vector.broadcast %cst_50 : f32 to vector<16x1xf32>
    %138 = arith.divf %136, %137 : vector<16x1xf32>
    %139 = vector.broadcast %131 : vector<16x1xf32> to vector<16x128xf32>
    %140 = arith.subf %127, %139 : vector<16x128xf32>
    %cst_51 = arith.constant 9.99999974E-6 : f32
    %141 = vector.broadcast %cst_51 : f32 to vector<16x1xf32>
    %142 = arith.addf %138, %141 : vector<16x1xf32>
    %143 = math.rsqrt %142 : vector<16x1xf32>
    %144 = vector.broadcast %143 : vector<16x1xf32> to vector<16x128xf32>
    %145 = arith.mulf %140, %144 : vector<16x128xf32>
    %146 = vector.broadcast %11 : vector<1x128xf32> to vector<16x128xf32>
    %147 = arith.mulf %145, %146 : vector<16x128xf32>
    %148 = vector.broadcast %12 : vector<1x128xf32> to vector<16x128xf32>
    %149 = arith.addf %147, %148 : vector<16x128xf32>
    %150 = arith.truncf %149 : vector<16x128xf32> to vector<16x128xbf16>
    %151 = arith.index_cast %86 : i32 to index
    %c0_52 = arith.constant 0 : index
    %152 = vector.load %arg13[%151, %c0_52] : memref<128x128xbf16, #tpu.memory_space<vmem>>, vector<16x128xbf16>
    tpu.vector_store %arg13[%151, %c0_52], %150 {strides = array<i32>} : memref<128x128xbf16, #tpu.memory_space<vmem>>, vector<16x128xbf16>,
    %153 = vector.shape_cast %123 : vector<16x1xi1> to vector<16x1xi1>
    %154 = vector.broadcast %153 : vector<16x1xi1> to vector<16x128xi1>
    %155 = arith.select %154, %121, %84 : vector<16x128xi1>, vector<16x128xf32>
    %c2_i32 = arith.constant 2 : i32
    %c16_i32_53 = arith.constant 16 : i32
    %156 = arith.muli %c2_i32, %c16_i32_53 : i32
    %157 = tpu.assume_multiple %156, 16 : i32
    %158 = arith.index_cast %157 : i32 to index
    %c0_54 = arith.constant 0 : index
    %159 = vector.load %arg14[%158, %c0_54] : memref<128x384xf32, #tpu.memory_space<vmem>>, vector<16x384xf32>
    %160 = arith.addf %159, %9 : vector<16x384xf32>
    %161 = arith.truncf %155 : vector<16x128xf32> to vector<16x128xbf16>
    %c0_55 = arith.constant 0 : index
    %c0_56 = arith.constant 0 : index
    %162 = vector.load %arg7[%c0_55, %c0_56] : memref<128x384xbf16, #tpu.memory_space<vmem>>, vector<128x384xbf16>
    %cst_57 = arith.constant dense<0.000000e+00> : vector<16x384xf32>
    %163 = tpu.matmul %161, %162, %cst_57 {dimension_numbers = #tpu.dot_dimension_numbers<[1], [0], [0], [1], [0, 0, 1, 1], [], []>} : vector<16x128xbf16>, vector<128x384xbf16>, vector<16x384xf32> -> vector<16x384xf32>
    %c0_58 = arith.constant 0 : index
    %c0_59 = arith.constant 0 : index
    %164 = vector.load %arg9[%c0_58, %c0_59] : memref<1x384xf32, #tpu.memory_space<vmem>>, vector<1x384xf32>
    %165 = vector.broadcast %164 : vector<1x384xf32> to vector<16x384xf32>
    %166 = arith.addf %163, %165 : vector<16x384xf32>
    %167 = vector.extract_strided_slice %160 {offsets = [0, 0], sizes = [16, 128], strides = [1, 1]} : vector<16x384xf32> to vector<16x128xf32>
    %168 = vector.extract_strided_slice %166 {offsets = [0, 0], sizes = [16, 128], strides = [1, 1]} : vector<16x384xf32> to vector<16x128xf32>
    %169 = arith.addf %167, %168 : vector<16x128xf32>
    %170 = arith.negf %169 : vector<16x128xf32>
    %171 = math.exp %170 : vector<16x128xf32>
    %cst_60 = arith.constant 1.000000e+00 : f32
    %172 = vector.broadcast %cst_60 : f32 to vector<16x128xf32>
    %173 = arith.addf %172, %171 : vector<16x128xf32>
    %174 = arith.divf %172, %173 : vector<16x128xf32>
    %175 = vector.extract_strided_slice %160 {offsets = [0, 128], sizes = [16, 128], strides = [1, 1]} : vector<16x384xf32> to vector<16x128xf32>
    %176 = vector.extract_strided_slice %166 {offsets = [0, 128], sizes = [16, 128], strides = [1, 1]} : vector<16x384xf32> to vector<16x128xf32>
    %177 = arith.addf %175, %176 : vector<16x128xf32>
    %178 = arith.negf %177 : vector<16x128xf32>
    %179 = math.exp %178 : vector<16x128xf32>
    %cst_61 = arith.constant 1.000000e+00 : f32
    %180 = vector.broadcast %cst_61 : f32 to vector<16x128xf32>
    %181 = arith.addf %180, %179 : vector<16x128xf32>
    %182 = arith.divf %180, %181 : vector<16x128xf32>
    %183 = vector.extract_strided_slice %160 {offsets = [0, 256], sizes = [16, 128], strides = [1, 1]} : vector<16x384xf32> to vector<16x128xf32>
    %184 = vector.extract_strided_slice %166 {offsets = [0, 256], sizes = [16, 128], strides = [1, 1]} : vector<16x384xf32> to vector<16x128xf32>
    %185 = arith.mulf %174, %184 : vector<16x128xf32>
    %186 = arith.addf %183, %185 : vector<16x128xf32>
    %187 = math.tanh %186 : vector<16x128xf32>
    %cst_62 = arith.constant 1.000000e+00 : f32
    %188 = vector.broadcast %cst_62 : f32 to vector<16x128xf32>
    %189 = arith.subf %188, %182 : vector<16x128xf32>
    %190 = arith.mulf %189, %187 : vector<16x128xf32>
    %191 = arith.mulf %182, %155 : vector<16x128xf32>
    %192 = arith.addf %190, %191 : vector<16x128xf32>
    %193 = vector.broadcast %c2_i32 : i32 to vector<16x1xi32>
    %194 = arith.cmpi slt, %193, %10 : vector<16x1xi32>
    %cst_63 = arith.constant 0.000000e+00 : f32
    %195 = vector.shape_cast %194 : vector<16x1xi1> to vector<16x1xi1>
    %196 = vector.broadcast %195 : vector<16x1xi1> to vector<16x128xi1>
    %197 = vector.broadcast %cst_63 : f32 to vector<16x128xf32>
    %198 = arith.select %196, %192, %197 : vector<16x128xi1>, vector<16x128xf32>
    %cst_64 = arith.constant dense<0.000000e+00> : vector<16xf32>
    %199 = vector.multi_reduction <add>, %198, %cst_64 [1] : vector<16x128xf32> to vector<16xf32>
    %200 = vector.shape_cast %199 : vector<16xf32> to vector<16x1xf32>
    %cst_65 = arith.constant 1.280000e+02 : f32
    %201 = vector.broadcast %cst_65 : f32 to vector<16x1xf32>
    %202 = arith.divf %200, %201 : vector<16x1xf32>
    %203 = vector.broadcast %202 : vector<16x1xf32> to vector<16x128xf32>
    %204 = arith.subf %198, %203 : vector<16x128xf32>
    %205 = arith.mulf %204, %204 : vector<16x128xf32>
    %cst_66 = arith.constant dense<0.000000e+00> : vector<16xf32>
    %206 = vector.multi_reduction <add>, %205, %cst_66 [1] : vector<16x128xf32> to vector<16xf32>
    %207 = vector.shape_cast %206 : vector<16xf32> to vector<16x1xf32>
    %cst_67 = arith.constant 1.280000e+02 : f32
    %208 = vector.broadcast %cst_67 : f32 to vector<16x1xf32>
    %209 = arith.divf %207, %208 : vector<16x1xf32>
    %210 = vector.broadcast %202 : vector<16x1xf32> to vector<16x128xf32>
    %211 = arith.subf %198, %210 : vector<16x128xf32>
    %cst_68 = arith.constant 9.99999974E-6 : f32
    %212 = vector.broadcast %cst_68 : f32 to vector<16x1xf32>
    %213 = arith.addf %209, %212 : vector<16x1xf32>
    %214 = math.rsqrt %213 : vector<16x1xf32>
    %215 = vector.broadcast %214 : vector<16x1xf32> to vector<16x128xf32>
    %216 = arith.mulf %211, %215 : vector<16x128xf32>
    %217 = vector.broadcast %11 : vector<1x128xf32> to vector<16x128xf32>
    %218 = arith.mulf %216, %217 : vector<16x128xf32>
    %219 = vector.broadcast %12 : vector<1x128xf32> to vector<16x128xf32>
    %220 = arith.addf %218, %219 : vector<16x128xf32>
    %221 = arith.truncf %220 : vector<16x128xf32> to vector<16x128xbf16>
    %222 = arith.index_cast %157 : i32 to index
    %c0_69 = arith.constant 0 : index
    %223 = vector.load %arg13[%222, %c0_69] : memref<128x128xbf16, #tpu.memory_space<vmem>>, vector<16x128xbf16>
    tpu.vector_store %arg13[%222, %c0_69], %221 {strides = array<i32>} : memref<128x128xbf16, #tpu.memory_space<vmem>>, vector<16x128xbf16>,
    %224 = vector.shape_cast %194 : vector<16x1xi1> to vector<16x1xi1>
    %225 = vector.broadcast %224 : vector<16x1xi1> to vector<16x128xi1>
    %226 = arith.select %225, %192, %155 : vector<16x128xi1>, vector<16x128xf32>
    %c3_i32 = arith.constant 3 : i32
    %c16_i32_70 = arith.constant 16 : i32
    %227 = arith.muli %c3_i32, %c16_i32_70 : i32
    %228 = tpu.assume_multiple %227, 16 : i32
    %229 = arith.index_cast %228 : i32 to index
    %c0_71 = arith.constant 0 : index
    %230 = vector.load %arg14[%229, %c0_71] : memref<128x384xf32, #tpu.memory_space<vmem>>, vector<16x384xf32>
    %231 = arith.addf %230, %9 : vector<16x384xf32>
    %232 = arith.truncf %226 : vector<16x128xf32> to vector<16x128xbf16>
    %c0_72 = arith.constant 0 : index
    %c0_73 = arith.constant 0 : index
    %233 = vector.load %arg7[%c0_72, %c0_73] : memref<128x384xbf16, #tpu.memory_space<vmem>>, vector<128x384xbf16>
    %cst_74 = arith.constant dense<0.000000e+00> : vector<16x384xf32>
    %234 = tpu.matmul %232, %233, %cst_74 {dimension_numbers = #tpu.dot_dimension_numbers<[1], [0], [0], [1], [0, 0, 1, 1], [], []>} : vector<16x128xbf16>, vector<128x384xbf16>, vector<16x384xf32> -> vector<16x384xf32>
    %c0_75 = arith.constant 0 : index
    %c0_76 = arith.constant 0 : index
    %235 = vector.load %arg9[%c0_75, %c0_76] : memref<1x384xf32, #tpu.memory_space<vmem>>, vector<1x384xf32>
    %236 = vector.broadcast %235 : vector<1x384xf32> to vector<16x384xf32>
    %237 = arith.addf %234, %236 : vector<16x384xf32>
    %238 = vector.extract_strided_slice %231 {offsets = [0, 0], sizes = [16, 128], strides = [1, 1]} : vector<16x384xf32> to vector<16x128xf32>
    %239 = vector.extract_strided_slice %237 {offsets = [0, 0], sizes = [16, 128], strides = [1, 1]} : vector<16x384xf32> to vector<16x128xf32>
    %240 = arith.addf %238, %239 : vector<16x128xf32>
    %241 = arith.negf %240 : vector<16x128xf32>
    %242 = math.exp %241 : vector<16x128xf32>
    %cst_77 = arith.constant 1.000000e+00 : f32
    %243 = vector.broadcast %cst_77 : f32 to vector<16x128xf32>
    %244 = arith.addf %243, %242 : vector<16x128xf32>
    %245 = arith.divf %243, %244 : vector<16x128xf32>
    %246 = vector.extract_strided_slice %231 {offsets = [0, 128], sizes = [16, 128], strides = [1, 1]} : vector<16x384xf32> to vector<16x128xf32>
    %247 = vector.extract_strided_slice %237 {offsets = [0, 128], sizes = [16, 128], strides = [1, 1]} : vector<16x384xf32> to vector<16x128xf32>
    %248 = arith.addf %246, %247 : vector<16x128xf32>
    %249 = arith.negf %248 : vector<16x128xf32>
    %250 = math.exp %249 : vector<16x128xf32>
    %cst_78 = arith.constant 1.000000e+00 : f32
    %251 = vector.broadcast %cst_78 : f32 to vector<16x128xf32>
    %252 = arith.addf %251, %250 : vector<16x128xf32>
    %253 = arith.divf %251, %252 : vector<16x128xf32>
    %254 = vector.extract_strided_slice %231 {offsets = [0, 256], sizes = [16, 128], strides = [1, 1]} : vector<16x384xf32> to vector<16x128xf32>
    %255 = vector.extract_strided_slice %237 {offsets = [0, 256], sizes = [16, 128], strides = [1, 1]} : vector<16x384xf32> to vector<16x128xf32>
    %256 = arith.mulf %245, %255 : vector<16x128xf32>
    %257 = arith.addf %254, %256 : vector<16x128xf32>
    %258 = math.tanh %257 : vector<16x128xf32>
    %cst_79 = arith.constant 1.000000e+00 : f32
    %259 = vector.broadcast %cst_79 : f32 to vector<16x128xf32>
    %260 = arith.subf %259, %253 : vector<16x128xf32>
    %261 = arith.mulf %260, %258 : vector<16x128xf32>
    %262 = arith.mulf %253, %226 : vector<16x128xf32>
    %263 = arith.addf %261, %262 : vector<16x128xf32>
    %264 = vector.broadcast %c3_i32 : i32 to vector<16x1xi32>
    %265 = arith.cmpi slt, %264, %10 : vector<16x1xi32>
    %cst_80 = arith.constant 0.000000e+00 : f32
    %266 = vector.shape_cast %265 : vector<16x1xi1> to vector<16x1xi1>
    %267 = vector.broadcast %266 : vector<16x1xi1> to vector<16x128xi1>
    %268 = vector.broadcast %cst_80 : f32 to vector<16x128xf32>
    %269 = arith.select %267, %263, %268 : vector<16x128xi1>, vector<16x128xf32>
    %cst_81 = arith.constant dense<0.000000e+00> : vector<16xf32>
    %270 = vector.multi_reduction <add>, %269, %cst_81 [1] : vector<16x128xf32> to vector<16xf32>
    %271 = vector.shape_cast %270 : vector<16xf32> to vector<16x1xf32>
    %cst_82 = arith.constant 1.280000e+02 : f32
    %272 = vector.broadcast %cst_82 : f32 to vector<16x1xf32>
    %273 = arith.divf %271, %272 : vector<16x1xf32>
    %274 = vector.broadcast %273 : vector<16x1xf32> to vector<16x128xf32>
    %275 = arith.subf %269, %274 : vector<16x128xf32>
    %276 = arith.mulf %275, %275 : vector<16x128xf32>
    %cst_83 = arith.constant dense<0.000000e+00> : vector<16xf32>
    %277 = vector.multi_reduction <add>, %276, %cst_83 [1] : vector<16x128xf32> to vector<16xf32>
    %278 = vector.shape_cast %277 : vector<16xf32> to vector<16x1xf32>
    %cst_84 = arith.constant 1.280000e+02 : f32
    %279 = vector.broadcast %cst_84 : f32 to vector<16x1xf32>
    %280 = arith.divf %278, %279 : vector<16x1xf32>
    %281 = vector.broadcast %273 : vector<16x1xf32> to vector<16x128xf32>
    %282 = arith.subf %269, %281 : vector<16x128xf32>
    %cst_85 = arith.constant 9.99999974E-6 : f32
    %283 = vector.broadcast %cst_85 : f32 to vector<16x1xf32>
    %284 = arith.addf %280, %283 : vector<16x1xf32>
    %285 = math.rsqrt %284 : vector<16x1xf32>
    %286 = vector.broadcast %285 : vector<16x1xf32> to vector<16x128xf32>
    %287 = arith.mulf %282, %286 : vector<16x128xf32>
    %288 = vector.broadcast %11 : vector<1x128xf32> to vector<16x128xf32>
    %289 = arith.mulf %287, %288 : vector<16x128xf32>
    %290 = vector.broadcast %12 : vector<1x128xf32> to vector<16x128xf32>
    %291 = arith.addf %289, %290 : vector<16x128xf32>
    %292 = arith.truncf %291 : vector<16x128xf32> to vector<16x128xbf16>
    %293 = arith.index_cast %228 : i32 to index
    %c0_86 = arith.constant 0 : index
    %294 = vector.load %arg13[%293, %c0_86] : memref<128x128xbf16, #tpu.memory_space<vmem>>, vector<16x128xbf16>
    tpu.vector_store %arg13[%293, %c0_86], %292 {strides = array<i32>} : memref<128x128xbf16, #tpu.memory_space<vmem>>, vector<16x128xbf16>,
    %295 = vector.shape_cast %265 : vector<16x1xi1> to vector<16x1xi1>
    %296 = vector.broadcast %295 : vector<16x1xi1> to vector<16x128xi1>
    %297 = arith.select %296, %263, %226 : vector<16x128xi1>, vector<16x128xf32>
    %c4_i32 = arith.constant 4 : i32
    %c16_i32_87 = arith.constant 16 : i32
    %298 = arith.muli %c4_i32, %c16_i32_87 : i32
    %299 = tpu.assume_multiple %298, 16 : i32
    %300 = arith.index_cast %299 : i32 to index
    %c0_88 = arith.constant 0 : index
    %301 = vector.load %arg14[%300, %c0_88] : memref<128x384xf32, #tpu.memory_space<vmem>>, vector<16x384xf32>
    %302 = arith.addf %301, %9 : vector<16x384xf32>
    %303 = arith.truncf %297 : vector<16x128xf32> to vector<16x128xbf16>
    %c0_89 = arith.constant 0 : index
    %c0_90 = arith.constant 0 : index
    %304 = vector.load %arg7[%c0_89, %c0_90] : memref<128x384xbf16, #tpu.memory_space<vmem>>, vector<128x384xbf16>
    %cst_91 = arith.constant dense<0.000000e+00> : vector<16x384xf32>
    %305 = tpu.matmul %303, %304, %cst_91 {dimension_numbers = #tpu.dot_dimension_numbers<[1], [0], [0], [1], [0, 0, 1, 1], [], []>} : vector<16x128xbf16>, vector<128x384xbf16>, vector<16x384xf32> -> vector<16x384xf32>
    %c0_92 = arith.constant 0 : index
    %c0_93 = arith.constant 0 : index
    %306 = vector.load %arg9[%c0_92, %c0_93] : memref<1x384xf32, #tpu.memory_space<vmem>>, vector<1x384xf32>
    %307 = vector.broadcast %306 : vector<1x384xf32> to vector<16x384xf32>
    %308 = arith.addf %305, %307 : vector<16x384xf32>
    %309 = vector.extract_strided_slice %302 {offsets = [0, 0], sizes = [16, 128], strides = [1, 1]} : vector<16x384xf32> to vector<16x128xf32>
    %310 = vector.extract_strided_slice %308 {offsets = [0, 0], sizes = [16, 128], strides = [1, 1]} : vector<16x384xf32> to vector<16x128xf32>
    %311 = arith.addf %309, %310 : vector<16x128xf32>
    %312 = arith.negf %311 : vector<16x128xf32>
    %313 = math.exp %312 : vector<16x128xf32>
    %cst_94 = arith.constant 1.000000e+00 : f32
    %314 = vector.broadcast %cst_94 : f32 to vector<16x128xf32>
    %315 = arith.addf %314, %313 : vector<16x128xf32>
    %316 = arith.divf %314, %315 : vector<16x128xf32>
    %317 = vector.extract_strided_slice %302 {offsets = [0, 128], sizes = [16, 128], strides = [1, 1]} : vector<16x384xf32> to vector<16x128xf32>
    %318 = vector.extract_strided_slice %308 {offsets = [0, 128], sizes = [16, 128], strides = [1, 1]} : vector<16x384xf32> to vector<16x128xf32>
    %319 = arith.addf %317, %318 : vector<16x128xf32>
    %320 = arith.negf %319 : vector<16x128xf32>
    %321 = math.exp %320 : vector<16x128xf32>
    %cst_95 = arith.constant 1.000000e+00 : f32
    %322 = vector.broadcast %cst_95 : f32 to vector<16x128xf32>
    %323 = arith.addf %322, %321 : vector<16x128xf32>
    %324 = arith.divf %322, %323 : vector<16x128xf32>
    %325 = vector.extract_strided_slice %302 {offsets = [0, 256], sizes = [16, 128], strides = [1, 1]} : vector<16x384xf32> to vector<16x128xf32>
    %326 = vector.extract_strided_slice %308 {offsets = [0, 256], sizes = [16, 128], strides = [1, 1]} : vector<16x384xf32> to vector<16x128xf32>
    %327 = arith.mulf %316, %326 : vector<16x128xf32>
    %328 = arith.addf %325, %327 : vector<16x128xf32>
    %329 = math.tanh %328 : vector<16x128xf32>
    %cst_96 = arith.constant 1.000000e+00 : f32
    %330 = vector.broadcast %cst_96 : f32 to vector<16x128xf32>
    %331 = arith.subf %330, %324 : vector<16x128xf32>
    %332 = arith.mulf %331, %329 : vector<16x128xf32>
    %333 = arith.mulf %324, %297 : vector<16x128xf32>
    %334 = arith.addf %332, %333 : vector<16x128xf32>
    %335 = vector.broadcast %c4_i32 : i32 to vector<16x1xi32>
    %336 = arith.cmpi slt, %335, %10 : vector<16x1xi32>
    %cst_97 = arith.constant 0.000000e+00 : f32
    %337 = vector.shape_cast %336 : vector<16x1xi1> to vector<16x1xi1>
    %338 = vector.broadcast %337 : vector<16x1xi1> to vector<16x128xi1>
    %339 = vector.broadcast %cst_97 : f32 to vector<16x128xf32>
    %340 = arith.select %338, %334, %339 : vector<16x128xi1>, vector<16x128xf32>
    %cst_98 = arith.constant dense<0.000000e+00> : vector<16xf32>
    %341 = vector.multi_reduction <add>, %340, %cst_98 [1] : vector<16x128xf32> to vector<16xf32>
    %342 = vector.shape_cast %341 : vector<16xf32> to vector<16x1xf32>
    %cst_99 = arith.constant 1.280000e+02 : f32
    %343 = vector.broadcast %cst_99 : f32 to vector<16x1xf32>
    %344 = arith.divf %342, %343 : vector<16x1xf32>
    %345 = vector.broadcast %344 : vector<16x1xf32> to vector<16x128xf32>
    %346 = arith.subf %340, %345 : vector<16x128xf32>
    %347 = arith.mulf %346, %346 : vector<16x128xf32>
    %cst_100 = arith.constant dense<0.000000e+00> : vector<16xf32>
    %348 = vector.multi_reduction <add>, %347, %cst_100 [1] : vector<16x128xf32> to vector<16xf32>
    %349 = vector.shape_cast %348 : vector<16xf32> to vector<16x1xf32>
    %cst_101 = arith.constant 1.280000e+02 : f32
    %350 = vector.broadcast %cst_101 : f32 to vector<16x1xf32>
    %351 = arith.divf %349, %350 : vector<16x1xf32>
    %352 = vector.broadcast %344 : vector<16x1xf32> to vector<16x128xf32>
    %353 = arith.subf %340, %352 : vector<16x128xf32>
    %cst_102 = arith.constant 9.99999974E-6 : f32
    %354 = vector.broadcast %cst_102 : f32 to vector<16x1xf32>
    %355 = arith.addf %351, %354 : vector<16x1xf32>
    %356 = math.rsqrt %355 : vector<16x1xf32>
    %357 = vector.broadcast %356 : vector<16x1xf32> to vector<16x128xf32>
    %358 = arith.mulf %353, %357 : vector<16x128xf32>
    %359 = vector.broadcast %11 : vector<1x128xf32> to vector<16x128xf32>
    %360 = arith.mulf %358, %359 : vector<16x128xf32>
    %361 = vector.broadcast %12 : vector<1x128xf32> to vector<16x128xf32>
    %362 = arith.addf %360, %361 : vector<16x128xf32>
    %363 = arith.truncf %362 : vector<16x128xf32> to vector<16x128xbf16>
    %364 = arith.index_cast %299 : i32 to index
    %c0_103 = arith.constant 0 : index
    %365 = vector.load %arg13[%364, %c0_103] : memref<128x128xbf16, #tpu.memory_space<vmem>>, vector<16x128xbf16>
    tpu.vector_store %arg13[%364, %c0_103], %363 {strides = array<i32>} : memref<128x128xbf16, #tpu.memory_space<vmem>>, vector<16x128xbf16>,
    %366 = vector.shape_cast %336 : vector<16x1xi1> to vector<16x1xi1>
    %367 = vector.broadcast %366 : vector<16x1xi1> to vector<16x128xi1>
    %368 = arith.select %367, %334, %297 : vector<16x128xi1>, vector<16x128xf32>
    %c5_i32 = arith.constant 5 : i32
    %c16_i32_104 = arith.constant 16 : i32
    %369 = arith.muli %c5_i32, %c16_i32_104 : i32
    %370 = tpu.assume_multiple %369, 16 : i32
    %371 = arith.index_cast %370 : i32 to index
    %c0_105 = arith.constant 0 : index
    %372 = vector.load %arg14[%371, %c0_105] : memref<128x384xf32, #tpu.memory_space<vmem>>, vector<16x384xf32>
    %373 = arith.addf %372, %9 : vector<16x384xf32>
    %374 = arith.truncf %368 : vector<16x128xf32> to vector<16x128xbf16>
    %c0_106 = arith.constant 0 : index
    %c0_107 = arith.constant 0 : index
    %375 = vector.load %arg7[%c0_106, %c0_107] : memref<128x384xbf16, #tpu.memory_space<vmem>>, vector<128x384xbf16>
    %cst_108 = arith.constant dense<0.000000e+00> : vector<16x384xf32>
    %376 = tpu.matmul %374, %375, %cst_108 {dimension_numbers = #tpu.dot_dimension_numbers<[1], [0], [0], [1], [0, 0, 1, 1], [], []>} : vector<16x128xbf16>, vector<128x384xbf16>, vector<16x384xf32> -> vector<16x384xf32>
    %c0_109 = arith.constant 0 : index
    %c0_110 = arith.constant 0 : index
    %377 = vector.load %arg9[%c0_109, %c0_110] : memref<1x384xf32, #tpu.memory_space<vmem>>, vector<1x384xf32>
    %378 = vector.broadcast %377 : vector<1x384xf32> to vector<16x384xf32>
    %379 = arith.addf %376, %378 : vector<16x384xf32>
    %380 = vector.extract_strided_slice %373 {offsets = [0, 0], sizes = [16, 128], strides = [1, 1]} : vector<16x384xf32> to vector<16x128xf32>
    %381 = vector.extract_strided_slice %379 {offsets = [0, 0], sizes = [16, 128], strides = [1, 1]} : vector<16x384xf32> to vector<16x128xf32>
    %382 = arith.addf %380, %381 : vector<16x128xf32>
    %383 = arith.negf %382 : vector<16x128xf32>
    %384 = math.exp %383 : vector<16x128xf32>
    %cst_111 = arith.constant 1.000000e+00 : f32
    %385 = vector.broadcast %cst_111 : f32 to vector<16x128xf32>
    %386 = arith.addf %385, %384 : vector<16x128xf32>
    %387 = arith.divf %385, %386 : vector<16x128xf32>
    %388 = vector.extract_strided_slice %373 {offsets = [0, 128], sizes = [16, 128], strides = [1, 1]} : vector<16x384xf32> to vector<16x128xf32>
    %389 = vector.extract_strided_slice %379 {offsets = [0, 128], sizes = [16, 128], strides = [1, 1]} : vector<16x384xf32> to vector<16x128xf32>
    %390 = arith.addf %388, %389 : vector<16x128xf32>
    %391 = arith.negf %390 : vector<16x128xf32>
    %392 = math.exp %391 : vector<16x128xf32>
    %cst_112 = arith.constant 1.000000e+00 : f32
    %393 = vector.broadcast %cst_112 : f32 to vector<16x128xf32>
    %394 = arith.addf %393, %392 : vector<16x128xf32>
    %395 = arith.divf %393, %394 : vector<16x128xf32>
    %396 = vector.extract_strided_slice %373 {offsets = [0, 256], sizes = [16, 128], strides = [1, 1]} : vector<16x384xf32> to vector<16x128xf32>
    %397 = vector.extract_strided_slice %379 {offsets = [0, 256], sizes = [16, 128], strides = [1, 1]} : vector<16x384xf32> to vector<16x128xf32>
    %398 = arith.mulf %387, %397 : vector<16x128xf32>
    %399 = arith.addf %396, %398 : vector<16x128xf32>
    %400 = math.tanh %399 : vector<16x128xf32>
    %cst_113 = arith.constant 1.000000e+00 : f32
    %401 = vector.broadcast %cst_113 : f32 to vector<16x128xf32>
    %402 = arith.subf %401, %395 : vector<16x128xf32>
    %403 = arith.mulf %402, %400 : vector<16x128xf32>
    %404 = arith.mulf %395, %368 : vector<16x128xf32>
    %405 = arith.addf %403, %404 : vector<16x128xf32>
    %406 = vector.broadcast %c5_i32 : i32 to vector<16x1xi32>
    %407 = arith.cmpi slt, %406, %10 : vector<16x1xi32>
    %cst_114 = arith.constant 0.000000e+00 : f32
    %408 = vector.shape_cast %407 : vector<16x1xi1> to vector<16x1xi1>
    %409 = vector.broadcast %408 : vector<16x1xi1> to vector<16x128xi1>
    %410 = vector.broadcast %cst_114 : f32 to vector<16x128xf32>
    %411 = arith.select %409, %405, %410 : vector<16x128xi1>, vector<16x128xf32>
    %cst_115 = arith.constant dense<0.000000e+00> : vector<16xf32>
    %412 = vector.multi_reduction <add>, %411, %cst_115 [1] : vector<16x128xf32> to vector<16xf32>
    %413 = vector.shape_cast %412 : vector<16xf32> to vector<16x1xf32>
    %cst_116 = arith.constant 1.280000e+02 : f32
    %414 = vector.broadcast %cst_116 : f32 to vector<16x1xf32>
    %415 = arith.divf %413, %414 : vector<16x1xf32>
    %416 = vector.broadcast %415 : vector<16x1xf32> to vector<16x128xf32>
    %417 = arith.subf %411, %416 : vector<16x128xf32>
    %418 = arith.mulf %417, %417 : vector<16x128xf32>
    %cst_117 = arith.constant dense<0.000000e+00> : vector<16xf32>
    %419 = vector.multi_reduction <add>, %418, %cst_117 [1] : vector<16x128xf32> to vector<16xf32>
    %420 = vector.shape_cast %419 : vector<16xf32> to vector<16x1xf32>
    %cst_118 = arith.constant 1.280000e+02 : f32
    %421 = vector.broadcast %cst_118 : f32 to vector<16x1xf32>
    %422 = arith.divf %420, %421 : vector<16x1xf32>
    %423 = vector.broadcast %415 : vector<16x1xf32> to vector<16x128xf32>
    %424 = arith.subf %411, %423 : vector<16x128xf32>
    %cst_119 = arith.constant 9.99999974E-6 : f32
    %425 = vector.broadcast %cst_119 : f32 to vector<16x1xf32>
    %426 = arith.addf %422, %425 : vector<16x1xf32>
    %427 = math.rsqrt %426 : vector<16x1xf32>
    %428 = vector.broadcast %427 : vector<16x1xf32> to vector<16x128xf32>
    %429 = arith.mulf %424, %428 : vector<16x128xf32>
    %430 = vector.broadcast %11 : vector<1x128xf32> to vector<16x128xf32>
    %431 = arith.mulf %429, %430 : vector<16x128xf32>
    %432 = vector.broadcast %12 : vector<1x128xf32> to vector<16x128xf32>
    %433 = arith.addf %431, %432 : vector<16x128xf32>
    %434 = arith.truncf %433 : vector<16x128xf32> to vector<16x128xbf16>
    %435 = arith.index_cast %370 : i32 to index
    %c0_120 = arith.constant 0 : index
    %436 = vector.load %arg13[%435, %c0_120] : memref<128x128xbf16, #tpu.memory_space<vmem>>, vector<16x128xbf16>
    tpu.vector_store %arg13[%435, %c0_120], %434 {strides = array<i32>} : memref<128x128xbf16, #tpu.memory_space<vmem>>, vector<16x128xbf16>,
    %437 = vector.shape_cast %407 : vector<16x1xi1> to vector<16x1xi1>
    %438 = vector.broadcast %437 : vector<16x1xi1> to vector<16x128xi1>
    %439 = arith.select %438, %405, %368 : vector<16x128xi1>, vector<16x128xf32>
    %c6_i32 = arith.constant 6 : i32
    %c16_i32_121 = arith.constant 16 : i32
    %440 = arith.muli %c6_i32, %c16_i32_121 : i32
    %441 = tpu.assume_multiple %440, 16 : i32
    %442 = arith.index_cast %441 : i32 to index
    %c0_122 = arith.constant 0 : index
    %443 = vector.load %arg14[%442, %c0_122] : memref<128x384xf32, #tpu.memory_space<vmem>>, vector<16x384xf32>
    %444 = arith.addf %443, %9 : vector<16x384xf32>
    %445 = arith.truncf %439 : vector<16x128xf32> to vector<16x128xbf16>
    %c0_123 = arith.constant 0 : index
    %c0_124 = arith.constant 0 : index
    %446 = vector.load %arg7[%c0_123, %c0_124] : memref<128x384xbf16, #tpu.memory_space<vmem>>, vector<128x384xbf16>
    %cst_125 = arith.constant dense<0.000000e+00> : vector<16x384xf32>
    %447 = tpu.matmul %445, %446, %cst_125 {dimension_numbers = #tpu.dot_dimension_numbers<[1], [0], [0], [1], [0, 0, 1, 1], [], []>} : vector<16x128xbf16>, vector<128x384xbf16>, vector<16x384xf32> -> vector<16x384xf32>
    %c0_126 = arith.constant 0 : index
    %c0_127 = arith.constant 0 : index
    %448 = vector.load %arg9[%c0_126, %c0_127] : memref<1x384xf32, #tpu.memory_space<vmem>>, vector<1x384xf32>
    %449 = vector.broadcast %448 : vector<1x384xf32> to vector<16x384xf32>
    %450 = arith.addf %447, %449 : vector<16x384xf32>
    %451 = vector.extract_strided_slice %444 {offsets = [0, 0], sizes = [16, 128], strides = [1, 1]} : vector<16x384xf32> to vector<16x128xf32>
    %452 = vector.extract_strided_slice %450 {offsets = [0, 0], sizes = [16, 128], strides = [1, 1]} : vector<16x384xf32> to vector<16x128xf32>
    %453 = arith.addf %451, %452 : vector<16x128xf32>
    %454 = arith.negf %453 : vector<16x128xf32>
    %455 = math.exp %454 : vector<16x128xf32>
    %cst_128 = arith.constant 1.000000e+00 : f32
    %456 = vector.broadcast %cst_128 : f32 to vector<16x128xf32>
    %457 = arith.addf %456, %455 : vector<16x128xf32>
    %458 = arith.divf %456, %457 : vector<16x128xf32>
    %459 = vector.extract_strided_slice %444 {offsets = [0, 128], sizes = [16, 128], strides = [1, 1]} : vector<16x384xf32> to vector<16x128xf32>
    %460 = vector.extract_strided_slice %450 {offsets = [0, 128], sizes = [16, 128], strides = [1, 1]} : vector<16x384xf32> to vector<16x128xf32>
    %461 = arith.addf %459, %460 : vector<16x128xf32>
    %462 = arith.negf %461 : vector<16x128xf32>
    %463 = math.exp %462 : vector<16x128xf32>
    %cst_129 = arith.constant 1.000000e+00 : f32
    %464 = vector.broadcast %cst_129 : f32 to vector<16x128xf32>
    %465 = arith.addf %464, %463 : vector<16x128xf32>
    %466 = arith.divf %464, %465 : vector<16x128xf32>
    %467 = vector.extract_strided_slice %444 {offsets = [0, 256], sizes = [16, 128], strides = [1, 1]} : vector<16x384xf32> to vector<16x128xf32>
    %468 = vector.extract_strided_slice %450 {offsets = [0, 256], sizes = [16, 128], strides = [1, 1]} : vector<16x384xf32> to vector<16x128xf32>
    %469 = arith.mulf %458, %468 : vector<16x128xf32>
    %470 = arith.addf %467, %469 : vector<16x128xf32>
    %471 = math.tanh %470 : vector<16x128xf32>
    %cst_130 = arith.constant 1.000000e+00 : f32
    %472 = vector.broadcast %cst_130 : f32 to vector<16x128xf32>
    %473 = arith.subf %472, %466 : vector<16x128xf32>
    %474 = arith.mulf %473, %471 : vector<16x128xf32>
    %475 = arith.mulf %466, %439 : vector<16x128xf32>
    %476 = arith.addf %474, %475 : vector<16x128xf32>
    %477 = vector.broadcast %c6_i32 : i32 to vector<16x1xi32>
    %478 = arith.cmpi slt, %477, %10 : vector<16x1xi32>
    %cst_131 = arith.constant 0.000000e+00 : f32
    %479 = vector.shape_cast %478 : vector<16x1xi1> to vector<16x1xi1>
    %480 = vector.broadcast %479 : vector<16x1xi1> to vector<16x128xi1>
    %481 = vector.broadcast %cst_131 : f32 to vector<16x128xf32>
    %482 = arith.select %480, %476, %481 : vector<16x128xi1>, vector<16x128xf32>
    %cst_132 = arith.constant dense<0.000000e+00> : vector<16xf32>
    %483 = vector.multi_reduction <add>, %482, %cst_132 [1] : vector<16x128xf32> to vector<16xf32>
    %484 = vector.shape_cast %483 : vector<16xf32> to vector<16x1xf32>
    %cst_133 = arith.constant 1.280000e+02 : f32
    %485 = vector.broadcast %cst_133 : f32 to vector<16x1xf32>
    %486 = arith.divf %484, %485 : vector<16x1xf32>
    %487 = vector.broadcast %486 : vector<16x1xf32> to vector<16x128xf32>
    %488 = arith.subf %482, %487 : vector<16x128xf32>
    %489 = arith.mulf %488, %488 : vector<16x128xf32>
    %cst_134 = arith.constant dense<0.000000e+00> : vector<16xf32>
    %490 = vector.multi_reduction <add>, %489, %cst_134 [1] : vector<16x128xf32> to vector<16xf32>
    %491 = vector.shape_cast %490 : vector<16xf32> to vector<16x1xf32>
    %cst_135 = arith.constant 1.280000e+02 : f32
    %492 = vector.broadcast %cst_135 : f32 to vector<16x1xf32>
    %493 = arith.divf %491, %492 : vector<16x1xf32>
    %494 = vector.broadcast %486 : vector<16x1xf32> to vector<16x128xf32>
    %495 = arith.subf %482, %494 : vector<16x128xf32>
    %cst_136 = arith.constant 9.99999974E-6 : f32
    %496 = vector.broadcast %cst_136 : f32 to vector<16x1xf32>
    %497 = arith.addf %493, %496 : vector<16x1xf32>
    %498 = math.rsqrt %497 : vector<16x1xf32>
    %499 = vector.broadcast %498 : vector<16x1xf32> to vector<16x128xf32>
    %500 = arith.mulf %495, %499 : vector<16x128xf32>
    %501 = vector.broadcast %11 : vector<1x128xf32> to vector<16x128xf32>
    %502 = arith.mulf %500, %501 : vector<16x128xf32>
    %503 = vector.broadcast %12 : vector<1x128xf32> to vector<16x128xf32>
    %504 = arith.addf %502, %503 : vector<16x128xf32>
    %505 = arith.truncf %504 : vector<16x128xf32> to vector<16x128xbf16>
    %506 = arith.index_cast %441 : i32 to index
    %c0_137 = arith.constant 0 : index
    %507 = vector.load %arg13[%506, %c0_137] : memref<128x128xbf16, #tpu.memory_space<vmem>>, vector<16x128xbf16>
    tpu.vector_store %arg13[%506, %c0_137], %505 {strides = array<i32>} : memref<128x128xbf16, #tpu.memory_space<vmem>>, vector<16x128xbf16>,
    %508 = vector.shape_cast %478 : vector<16x1xi1> to vector<16x1xi1>
    %509 = vector.broadcast %508 : vector<16x1xi1> to vector<16x128xi1>
    %510 = arith.select %509, %476, %439 : vector<16x128xi1>, vector<16x128xf32>
    %c7_i32 = arith.constant 7 : i32
    %c16_i32_138 = arith.constant 16 : i32
    %511 = arith.muli %c7_i32, %c16_i32_138 : i32
    %512 = tpu.assume_multiple %511, 16 : i32
    %513 = arith.index_cast %512 : i32 to index
    %c0_139 = arith.constant 0 : index
    %514 = vector.load %arg14[%513, %c0_139] : memref<128x384xf32, #tpu.memory_space<vmem>>, vector<16x384xf32>
    %515 = arith.addf %514, %9 : vector<16x384xf32>
    %516 = arith.truncf %510 : vector<16x128xf32> to vector<16x128xbf16>
    %c0_140 = arith.constant 0 : index
    %c0_141 = arith.constant 0 : index
    %517 = vector.load %arg7[%c0_140, %c0_141] : memref<128x384xbf16, #tpu.memory_space<vmem>>, vector<128x384xbf16>
    %cst_142 = arith.constant dense<0.000000e+00> : vector<16x384xf32>
    %518 = tpu.matmul %516, %517, %cst_142 {dimension_numbers = #tpu.dot_dimension_numbers<[1], [0], [0], [1], [0, 0, 1, 1], [], []>} : vector<16x128xbf16>, vector<128x384xbf16>, vector<16x384xf32> -> vector<16x384xf32>
    %c0_143 = arith.constant 0 : index
    %c0_144 = arith.constant 0 : index
    %519 = vector.load %arg9[%c0_143, %c0_144] : memref<1x384xf32, #tpu.memory_space<vmem>>, vector<1x384xf32>
    %520 = vector.broadcast %519 : vector<1x384xf32> to vector<16x384xf32>
    %521 = arith.addf %518, %520 : vector<16x384xf32>
    %522 = vector.extract_strided_slice %515 {offsets = [0, 0], sizes = [16, 128], strides = [1, 1]} : vector<16x384xf32> to vector<16x128xf32>
    %523 = vector.extract_strided_slice %521 {offsets = [0, 0], sizes = [16, 128], strides = [1, 1]} : vector<16x384xf32> to vector<16x128xf32>
    %524 = arith.addf %522, %523 : vector<16x128xf32>
    %525 = arith.negf %524 : vector<16x128xf32>
    %526 = math.exp %525 : vector<16x128xf32>
    %cst_145 = arith.constant 1.000000e+00 : f32
    %527 = vector.broadcast %cst_145 : f32 to vector<16x128xf32>
    %528 = arith.addf %527, %526 : vector<16x128xf32>
    %529 = arith.divf %527, %528 : vector<16x128xf32>
    %530 = vector.extract_strided_slice %515 {offsets = [0, 128], sizes = [16, 128], strides = [1, 1]} : vector<16x384xf32> to vector<16x128xf32>
    %531 = vector.extract_strided_slice %521 {offsets = [0, 128], sizes = [16, 128], strides = [1, 1]} : vector<16x384xf32> to vector<16x128xf32>
    %532 = arith.addf %530, %531 : vector<16x128xf32>
    %533 = arith.negf %532 : vector<16x128xf32>
    %534 = math.exp %533 : vector<16x128xf32>
    %cst_146 = arith.constant 1.000000e+00 : f32
    %535 = vector.broadcast %cst_146 : f32 to vector<16x128xf32>
    %536 = arith.addf %535, %534 : vector<16x128xf32>
    %537 = arith.divf %535, %536 : vector<16x128xf32>
    %538 = vector.extract_strided_slice %515 {offsets = [0, 256], sizes = [16, 128], strides = [1, 1]} : vector<16x384xf32> to vector<16x128xf32>
    %539 = vector.extract_strided_slice %521 {offsets = [0, 256], sizes = [16, 128], strides = [1, 1]} : vector<16x384xf32> to vector<16x128xf32>
    %540 = arith.mulf %529, %539 : vector<16x128xf32>
    %541 = arith.addf %538, %540 : vector<16x128xf32>
    %542 = math.tanh %541 : vector<16x128xf32>
    %cst_147 = arith.constant 1.000000e+00 : f32
    %543 = vector.broadcast %cst_147 : f32 to vector<16x128xf32>
    %544 = arith.subf %543, %537 : vector<16x128xf32>
    %545 = arith.mulf %544, %542 : vector<16x128xf32>
    %546 = arith.mulf %537, %510 : vector<16x128xf32>
    %547 = arith.addf %545, %546 : vector<16x128xf32>
    %548 = vector.broadcast %c7_i32 : i32 to vector<16x1xi32>
    %549 = arith.cmpi slt, %548, %10 : vector<16x1xi32>
    %cst_148 = arith.constant 0.000000e+00 : f32
    %550 = vector.shape_cast %549 : vector<16x1xi1> to vector<16x1xi1>
    %551 = vector.broadcast %550 : vector<16x1xi1> to vector<16x128xi1>
    %552 = vector.broadcast %cst_148 : f32 to vector<16x128xf32>
    %553 = arith.select %551, %547, %552 : vector<16x128xi1>, vector<16x128xf32>
    %cst_149 = arith.constant dense<0.000000e+00> : vector<16xf32>
    %554 = vector.multi_reduction <add>, %553, %cst_149 [1] : vector<16x128xf32> to vector<16xf32>
    %555 = vector.shape_cast %554 : vector<16xf32> to vector<16x1xf32>
    %cst_150 = arith.constant 1.280000e+02 : f32
    %556 = vector.broadcast %cst_150 : f32 to vector<16x1xf32>
    %557 = arith.divf %555, %556 : vector<16x1xf32>
    %558 = vector.broadcast %557 : vector<16x1xf32> to vector<16x128xf32>
    %559 = arith.subf %553, %558 : vector<16x128xf32>
    %560 = arith.mulf %559, %559 : vector<16x128xf32>
    %cst_151 = arith.constant dense<0.000000e+00> : vector<16xf32>
    %561 = vector.multi_reduction <add>, %560, %cst_151 [1] : vector<16x128xf32> to vector<16xf32>
    %562 = vector.shape_cast %561 : vector<16xf32> to vector<16x1xf32>
    %cst_152 = arith.constant 1.280000e+02 : f32
    %563 = vector.broadcast %cst_152 : f32 to vector<16x1xf32>
    %564 = arith.divf %562, %563 : vector<16x1xf32>
    %565 = vector.broadcast %557 : vector<16x1xf32> to vector<16x128xf32>
    %566 = arith.subf %553, %565 : vector<16x128xf32>
    %cst_153 = arith.constant 9.99999974E-6 : f32
    %567 = vector.broadcast %cst_153 : f32 to vector<16x1xf32>
    %568 = arith.addf %564, %567 : vector<16x1xf32>
    %569 = math.rsqrt %568 : vector<16x1xf32>
    %570 = vector.broadcast %569 : vector<16x1xf32> to vector<16x128xf32>
    %571 = arith.mulf %566, %570 : vector<16x128xf32>
    %572 = vector.broadcast %11 : vector<1x128xf32> to vector<16x128xf32>
    %573 = arith.mulf %571, %572 : vector<16x128xf32>
    %574 = vector.broadcast %12 : vector<1x128xf32> to vector<16x128xf32>
    %575 = arith.addf %573, %574 : vector<16x128xf32>
    %576 = arith.truncf %575 : vector<16x128xf32> to vector<16x128xbf16>
    %577 = arith.index_cast %512 : i32 to index
    %c0_154 = arith.constant 0 : index
    %578 = vector.load %arg13[%577, %c0_154] : memref<128x128xbf16, #tpu.memory_space<vmem>>, vector<16x128xbf16>
    tpu.vector_store %arg13[%577, %c0_154], %576 {strides = array<i32>} : memref<128x128xbf16, #tpu.memory_space<vmem>>, vector<16x128xbf16>,
    %579 = vector.shape_cast %549 : vector<16x1xi1> to vector<16x1xi1>
    %580 = vector.broadcast %579 : vector<16x1xi1> to vector<16x128xi1>
    %581 = arith.select %580, %547, %510 : vector<16x128xi1>, vector<16x128xf32>
    %c8_i32 = arith.constant 8 : i32
    %c0_155 = arith.constant 0 : index
    %c0_156 = arith.constant 0 : index
    %582 = vector.load %arg12[%c0_155, %c0_156] : memref<16x128xf32, #tpu.memory_space<vmem>>, vector<16x128xf32>
    tpu.vector_store %arg12[%c0_155, %c0_156], %581 {strides = array<i32>} : memref<16x128xf32, #tpu.memory_space<vmem>>, vector<16x128xf32>,
    return
  }
  func.func @transform_0(%arg0: i32) -> (i32, i32) {
    %c0_i32 = arith.constant 0 : i32
    %c0_i32_0 = arith.constant 0 : i32
    return %arg0, %c0_i32 : i32, i32
  }
  func.func @transform_1(%arg0: i32) -> (i32, i32) {
    %c0_i32 = arith.constant 0 : i32
    %c0_i32_0 = arith.constant 0 : i32
    return %arg0, %c0_i32 : i32, i32
  }
  func.func @transform_2(%arg0: i32) -> (i32, i32) {
    %c0_i32 = arith.constant 0 : i32
    %c0_i32_0 = arith.constant 0 : i32
    return %arg0, %c0_i32 : i32, i32
  }
  func.func @transform_3(%arg0: i32) -> (i32, i32) {
    %c0_i32 = arith.constant 0 : i32
    %c0_i32_0 = arith.constant 0 : i32
    return %arg0, %c0_i32 : i32, i32
  }
  func.func @transform_4(%arg0: i32) -> (i32, i32) {
    %c0_i32 = arith.constant 0 : i32
    %c0_i32_0 = arith.constant 0 : i32
    %c0_i32_1 = arith.constant 0 : i32
    return %c0_i32, %c0_i32_0 : i32, i32
  }
  func.func @transform_5(%arg0: i32) -> (i32, i32) {
    %c0_i32 = arith.constant 0 : i32
    %c0_i32_0 = arith.constant 0 : i32
    %c0_i32_1 = arith.constant 0 : i32
    return %c0_i32, %c0_i32_0 : i32, i32
  }
  func.func @transform_6(%arg0: i32) -> (i32, i32) {
    %c0_i32 = arith.constant 0 : i32
    %c0_i32_0 = arith.constant 0 : i32
    %c0_i32_1 = arith.constant 0 : i32
    return %c0_i32, %c0_i32_0 : i32, i32
  }
  func.func @transform_7(%arg0: i32) -> (i32, i32) {
    %c0_i32 = arith.constant 0 : i32
    %c0_i32_0 = arith.constant 0 : i32
    %c0_i32_1 = arith.constant 0 : i32
    return %c0_i32, %c0_i32_0 : i32, i32
  }
  func.func @transform_8(%arg0: i32) -> (i32, i32) {
    %c0_i32 = arith.constant 0 : i32
    %c0_i32_0 = arith.constant 0 : i32
    %c0_i32_1 = arith.constant 0 : i32
    return %c0_i32, %c0_i32_0 : i32, i32
  }
  func.func @transform_9(%arg0: i32) -> (i32, i32) {
    %c0_i32 = arith.constant 0 : i32
    %c0_i32_0 = arith.constant 0 : i32
    %c0_i32_1 = arith.constant 0 : i32
    return %c0_i32, %c0_i32_0 : i32, i32
  }
  func.func @transform_10(%arg0: i32) -> (i32, i32) {
    %c0_i32 = arith.constant 0 : i32
    %c0_i32_0 = arith.constant 0 : i32
    %c0_i32_1 = arith.constant 0 : i32
    return %c0_i32, %c0_i32_0 : i32, i32
  }
  func.func @transform_11(%arg0: i32) -> (i32, i32) {
    %c0_i32 = arith.constant 0 : i32
    %c0_i32_0 = arith.constant 0 : i32
    return %arg0, %c0_i32 : i32, i32
  }
  func.func @transform_12(%arg0: i32) -> (i32, i32) {
    %c0_i32 = arith.constant 0 : i32
    %c0_i32_0 = arith.constant 0 : i32
    return %arg0, %c0_i32 : i32, i32
  }
}

</mosaic_0001>

<bundles_post_ra>
// kernel: decoder_forward.5
= control target key start
LH: loop header
LB: loop body
LE: loop exit
PB: predicated region body
PF: predicated region fallthrough
CT: control target
= control target key end

     0   :  { %v849_v1 = vmov 0   ;;  %s1281_s1 = inlined_call_operand.vmem [shape: bf16[128,256], index: 1, kind: input, shape index: {}]   ;;  %s1282_s3 = inlined_call_operand.vmem [shape: f32[128,1], index: 3, kind: input, shape index: {}]   ;;  %s1283_s0 = inlined_call_operand.vmem [shape: bf16[128,128], index: 0, kind: input, shape index: {}]   ;;  %s1284_s4 = inlined_call_operand.vmem [shape: f32[128,1], index: 4, kind: input, shape index: {}]   ;;  %s1285_s2 = inlined_call_operand.vmem [shape: f32[1,256], index: 2, kind: input, shape index: {}]   ;;  %s1286_s5 = inlined_call_operand.vmem [shape: f32[128,256], index: 5, kind: output, shape index: {}]  }
   0x1   :  { %v721_v0 = vld [vmem:[%s1281_s1 + $0x74] ss:$8 sps:$4 sm:$0xff]   ;;  %720 = vset.pattern.permute.xlu1 %v849_v1  ;;  %719 = vset.pattern.permute.xlu0 %v849_v1  ;;  %v723_v2 = vld [vmem:[%s1281_s1 + $0x70] ss:$8 sps:$4 sm:$0xff]   ;;  %v724_v3 = vld [vmem:[%s1281_s1 + $0x64] ss:$8 sps:$4 sm:$0xff]  }
   0x2   :  { %225 = vmatprep.mubr.bf16.mxu0 %v849_v1  ;;  %265 = vmatprep.mubr.bf16.mxu1 %v849_v1  ;;  %v726_v4 = vld [vmem:[%s1281_s1 + $0x60] ss:$8 sps:$4 sm:$0xff]   ;;  %v727_v5 = vld [vmem:[%s1281_s1 + $0x54] ss:$8 sps:$4 sm:$0xff]   ;;  %v729_v6 = vld [vmem:[%s1281_s1 + $0x50] ss:$8 sps:$4 sm:$0xff]  }
   0x3   :  { %193 = vmatprep.subr.bf16.mxu0 %v721_v0  ;;  %702 = vmatprep.subr.bf16.mxu1 %v721_v0  ;;  %v730_v7 = vld [vmem:[%s1281_s1 + $0x44] ss:$8 sps:$4 sm:$0xff]   ;;  %v732_v8 = vld [vmem:[%s1281_s1 + $0x40] ss:$8 sps:$4 sm:$0xff]   ;;  %v340_v9 = vld [vmem:[%s1282_s3 + $0x10] sm:$0xff] }
   0x4   :  { %194 = vmatpush1.bf16.msra.mxu0 %v723_v2  ;;  %710 = vmatpush1.bf16.msra.mxu1 %v723_v2  ;;  %v338_v10 = vld [vmem:[%s1282_s3] sm:$0xff]  ;;  %v733_v11 = vld [vmem:[%s1281_s1 + $0x34] ss:$8 sps:$4 sm:$0xff]   ;;  %v339_v13 = vld [vmem:[%s1282_s3 + $0x8] sm:$0xff] }
   0x5   :  { %195 = vmatprep.subr.bf16.mxu0 %v724_v3  ;;  %703 = vmatprep.subr.bf16.mxu1 %v724_v3  ;;  %v341_v12 = vld [vmem:[%s1282_s3 + $0x18] sm:$0xff]  ;;  %v736_v15 = vld [vmem:[%s1281_s1 + $0x24] ss:$8 sps:$4 sm:$0xff]   ;;  %v738_v18 = vld [vmem:[%s1281_s1 + $0x20] ss:$8 sps:$4 sm:$0xff]  }
   0x6   :  { %366 = vperm.xlu1 %720, %v340_v9   ;;  %356 = vperm.xlu0 %719, %v338_v10   ;;  %v735_v14 = vld [vmem:[%s1281_s1 + $0x30] ss:$8 sps:$4 sm:$0xff]   ;;  %v343_v16 = vld [vmem:[%s1282_s3 + $0x28] sm:$0xff]  ;;  %v342_v17 = vld [vmem:[%s1282_s3 + $0x20] sm:$0xff] }
   0x7   :  { %v739_v19 = vld [vmem:[%s1281_s1 + $0x14] ss:$8 sps:$4 sm:$0xff]   ;;  %v741_v22 = vld [vmem:[%s1281_s1 + $0x10] ss:$8 sps:$4 sm:$0xff]   ;;  %v742_v23 = vld [vmem:[%s1281_s1 + $0x4] ss:$8 sps:$4 sm:$0xff]  }
   0x8   :  { %196 = vmatpush1.bf16.msra.mxu0 %v726_v4  ;;  %711 = vmatpush1.bf16.msra.mxu1 %v726_v4  ;;  %v345_v20 = vld [vmem:[%s1282_s3 + $0x38] sm:$0xff]  ;;  %v344_v21 = vld [vmem:[%s1282_s3 + $0x30] sm:$0xff]  ;;  %v307_v24 = vld [vmem:[%s1284_s4 + $0x8] sm:$0xff] }
   0x9   :  { %197 = vmatprep.subr.bf16.mxu0 %v727_v5  ;;  %704 = vmatprep.subr.bf16.mxu1 %v727_v5  ;;  %v347_v25 = vld [vmem:[%s1282_s3 + $0x48] sm:$0xff]  ;;  %v346_v26 = vld [vmem:[%s1282_s3 + $0x40] sm:$0xff]  ;;  %753 = vrcp.f32 %v307_v24  ;;  %v309_v31 = vld [vmem:[%s1284_s4 + $0x18] sm:$0xff] }
   0xa   :  { %371 = vperm.xlu1 %720, %v341_v12   ;;  %361 = vperm.xlu0 %719, %v339_v13   ;;  %v306_v27 = vld [vmem:[%s1284_s4] sm:$0xff]  ;;  %v349_v32 = vld [vmem:[%s1282_s3 + $0x58] sm:$0xff]  ;;  %v348_v33 = vld [vmem:[%s1282_s3 + $0x50] sm:$0xff] }
   0xb   :  { %v744_v28 = vld [vmem:[%s1281_s1] ss:$8 sps:$4 sm:$0xff]   ;;  %755 = vrcp.f32 %v306_v27  ;;  %v308_v34 = vld [vmem:[%s1284_s4 + $0x10] sm:$0xff]  ;;  %v313_v41 = vld [vmem:[%s1284_s4 + $0x38] sm:$0xff] }
   0xc   :  { %198 = vmatpush1.bf16.msra.mxu0 %v729_v6  ;;  %712 = vmatpush1.bf16.msra.mxu1 %v729_v6  ;;  %v745_v29 = vld [vmem:[%s1283_s0] sm:$0xff]   ;;  %757 = vrcp.f32 %v309_v31  ;;  %v311_v35 = vld [vmem:[%s1284_s4 + $0x28] sm:$0xff]  ;;  %v353_v42 = vld [vmem:[%s1282_s3 + $0x78] sm:$0xff] }
   0xd   :  { %199 = vmatprep.subr.bf16.mxu0 %v730_v7  ;;  %705 = vmatprep.subr.bf16.mxu1 %v730_v7  ;;  %v746_v30 = vld [vmem:[%s1283_s0 + $0x20] sm:$0xff]   ;;  %759 = vrcp.f32 %v308_v34  ;;  %v351_v36 = vld [vmem:[%s1282_s3 + $0x68] sm:$0xff]  ;;  %v352_v43 = vld [vmem:[%s1282_s3 + $0x70] sm:$0xff] }
   0xe   :  { %381 = vperm.xlu1 %720, %v343_v16   ;;  %376 = vperm.xlu0 %719, %v342_v17   ;;  %v350_v37 = vld [vmem:[%s1282_s3 + $0x60] sm:$0xff]  ;;  %761 = vrcp.f32 %v311_v35  ;;  %v747_v39 = vld [vmem:[%s1283_s0 + $0x8] sm:$0xff]   ;;  %v312_v44 = vld [vmem:[%s1284_s4 + $0x30] sm:$0xff] }
   0xf   :  { %v310_v38 = vld [vmem:[%s1284_s4 + $0x20] sm:$0xff]  ;;  %v748_v40 = vld [vmem:[%s1283_s0 + $0x28] sm:$0xff]   ;;  %v317_v50 = vld [vmem:[%s1284_s4 + $0x58] sm:$0xff] }
  0x10   :  { %200 = vmatpush1.bf16.msra.mxu0 %v732_v8  ;;  %713 = vmatpush1.bf16.msra.mxu1 %v732_v8  ;;  %763 = vrcp.f32 %v310_v38  ;;  %v315_v46 = vld [vmem:[%s1284_s4 + $0x48] sm:$0xff]  ;;  %v314_v48 = vld [vmem:[%s1284_s4 + $0x40] sm:$0xff]  ;;  %v749_v52 = vld [vmem:[%s1283_s0 + $0x10] sm:$0xff]  }
  0x11   :  { %201 = vmatprep.subr.bf16.mxu0 %v733_v11  ;;  %706 = vmatprep.subr.bf16.mxu1 %v733_v11  ;;  %765 = vrcp.f32 %v313_v41  ;;  %v750_v53 = vld [vmem:[%s1283_s0 + $0x30] sm:$0xff]   ;;  %v319_v56 = vld [vmem:[%s1284_s4 + $0x68] sm:$0xff]  ;;  %v318_v58 = vld [vmem:[%s1284_s4 + $0x60] sm:$0xff] }
  0x12   :  { %391 = vperm.xlu1 %720, %v345_v20   ;;  %386 = vperm.xlu0 %719, %v344_v21   ;;  %767 = vrcp.f32 %v312_v44  ;;  %v316_v54 = vld [vmem:[%s1284_s4 + $0x50] sm:$0xff]  ;;  %v321_v60 = vld [vmem:[%s1284_s4 + $0x78] sm:$0xff]  ;;  %v53_v27 = vld [vmem:[%s1285_s2] sm:$0x3] }
  0x13   :  { %769 = vrcp.f32 %v315_v46  ;;  %v751_v62 = vld [vmem:[%s1283_s0 + $0x18] sm:$0xff]   ;;  %v320_v0 = vld [vmem:[%s1284_s4 + $0x70] sm:$0xff] }
  0x14   :  { %202 = vmatpush1.bf16.msra.mxu0 %v735_v14  ;;  %714 = vmatpush1.bf16.msra.mxu1 %v735_v14  ;;  %771 = vrcp.f32 %v314_v48  ;;  %v752_v63 = vld [vmem:[%s1283_s0 + $0x38] sm:$0xff]  }
  0x15   :  { %203 = vmatprep.subr.bf16.mxu0 %v736_v15  ;;  %707 = vmatprep.subr.bf16.mxu1 %v736_v15  ;;  %773 = vrcp.f32 %v317_v50 }
  0x16   :  { %401 = vperm.xlu1 %720, %v347_v25   ;;  %396 = vperm.xlu0 %719, %v346_v26   ;;  %v754_v45 = vpop.eup %753  ;;  %775 = vrcp.f32 %v316_v54 }
  0x17   :  { %777 = vrcp.f32 %v319_v56 }
  0x18   :  { %204 = vmatpush1.bf16.msra.mxu0 %v738_v18  ;;  %715 = vmatpush1.bf16.msra.mxu1 %v738_v18  ;;  %v756_v47 = vpop.eup %755  ;;  %779 = vrcp.f32 %v318_v58 }
  0x19   :  { %205 = vmatprep.subr.bf16.mxu0 %v739_v19  ;;  %708 = vmatprep.subr.bf16.mxu1 %v739_v19  ;;  %v758_v49 = vpop.eup %757  ;;  %781 = vrcp.f32 %v321_v60 }
  0x1a   :  { %411 = vperm.xlu1 %720, %v349_v32   ;;  %406 = vperm.xlu0 %719, %v348_v33   ;;  %v760_v51 = vpop.eup %759  ;;  %783 = vrcp.f32 %v320_v0 }
  0x1b   :  { %v762_v55 = vpop.eup %761 }
  0x1c   :  { %206 = vmatpush1.bf16.msra.mxu0 %v741_v22  ;;  %716 = vmatpush1.bf16.msra.mxu1 %v741_v22  ;;  %v55_v22 = vlaneseq }
  0x1d   :  { %207 = vmatprep.subr.bf16.mxu0 %v742_v23  ;;  %709 = vmatprep.subr.bf16.mxu1 %v742_v23  ;;  %v764_v57 = vpop.eup %763 }
  0x1e   :  { %421 = vperm.xlu1 %720, %v351_v36   ;;  %416 = vperm.xlu0 %719, %v350_v37   ;;  %v766_v59 = vpop.eup %765  ;;  %v56_v24 = vshrl.u32 %v55_v22, 7 }
  0x1f   :  { %v768_v61 = vpop.eup %767 }
  0x20   :  { %208 = vmatpush1.bf16.msra.mxu0 %v744_v28  ;;  %717 = vmatpush1.bf16.msra.mxu1 %v744_v28  ;;  %v57_v26 = vsub.s32 0, %v56_v24 }
  0x22   :  { %431 = vperm.xlu1 %720, %v353_v42   ;;  %426 = vperm.xlu0 %719, %v352_v43   ;;  %v1091_v31 = vrot.slane %v53_v27, %v57_v26 }
  0x23   :  { %226 = vmatmul.mubr.bf16.vlgmr.msra.gmra.mxu0 %v745_v29  ;;  %266 = vmatmul.mubr.bf16.vlgmr.msra.gmra.mxu1 %v746_v30  ;;  %v61_v29 = vsub.s32 1, %v56_v24 }
  0x24   :  { %235 = vmatprep.mubr.bf16.mxu0 %v849_v1  ;;  %275 = vmatprep.mubr.bf16.mxu1 %v849_v1 }
  0x25   :  { %v1093_v32 = vrot.slane %v53_v27, %v61_v29 }
  0x26   :  { %537 = vperm.xlu1 %720, %v754_v45   ;;  %532 = vperm.xlu0 %719, %v756_v47  }
  0x2a   :  { %547 = vperm.xlu1 %720, %v758_v49   ;;  %542 = vperm.xlu0 %719, %v760_v51  }
  0x2b   :  { %236 = vmatmul.mubr.bf16.gmra.mxu0 %v747_v39  ;;  %276 = vmatmul.mubr.bf16.gmra.mxu1 %v748_v40 }
  0x2c   :  { %245 = vmatprep.mubr.bf16.mxu0 %v849_v1  ;;  %285 = vmatprep.mubr.bf16.mxu1 %v849_v1 }
  0x2e   :  { %557 = vperm.xlu1 %720, %v762_v55   ;;  %552 = vperm.xlu0 %719, %v764_v57  }
  0x32   :  { %567 = vperm.xlu1 %720, %v766_v59   ;;  %562 = vperm.xlu0 %719, %v768_v61  }
  0x33   :  { %246 = vmatmul.mubr.bf16.gmra.mxu0 %v749_v52  ;;  %286 = vmatmul.mubr.bf16.gmra.mxu1 %v750_v53 }
  0x34   :  { %255 = vmatprep.mubr.bf16.mxu0 %v849_v1  ;;  %295 = vmatprep.mubr.bf16.mxu1 %v849_v1  ;;  %v770_v1 = vpop.eup %769 }
  0x35   :  { %v772_v2 = vpop.eup %771 }
  0x36   :  { %v774_v3 = vpop.eup %773  ;;  %577 = vperm.xlu1 %720, %v770_v1   ;;  %572 = vperm.xlu0 %719, %v772_v2  }
  0x37   :  { %v776_v4 = vpop.eup %775 }
  0x38   :  { %v778_v5 = vpop.eup %777 }
  0x39   :  { %v780_v6 = vpop.eup %779 }
  0x3a   :  { %587 = vperm.xlu1 %720, %v774_v3   ;;  %582 = vperm.xlu0 %719, %v776_v4   ;;  %v782_v7 = vpop.eup %781 }
  0x3b   :  { %256 = vmatmul.mubr.bf16.gmra.mxu0 %v751_v62  ;;  %296 = vmatmul.mubr.bf16.gmra.mxu1 %v752_v63  ;;  %v784_v8 = vpop.eup %783 }
  0x3e   :  { %597 = vperm.xlu1 %720, %v778_v5   ;;  %592 = vperm.xlu0 %719, %v780_v6  }
  0x42   :  { %607 = vperm.xlu1 %720, %v782_v7   ;;  %602 = vperm.xlu0 %719, %v784_v8  }
  0x81   :  { %v357_v9 = vpop.permute.xlu0 %356  ;;  %v1058_v10 = vpop.permute.xlu1 %366 }
  0x85   :  { %v1060_v11 = vpop.permute.xlu0 %361  ;;  %v1062_v12 = vpop.permute.xlu1 %371 }
  0x89   :  { %v1064_v13 = vpop.permute.xlu0 %376  ;;  %v1066_v14 = vpop.permute.xlu1 %381 }
  0x8d   :  { %v1068_v15 = vpop.permute.xlu0 %386  ;;  %v1070_v16 = vpop.permute.xlu1 %391 }
  0x91   :  { %v397_v17 = vpop.permute.xlu0 %396  ;;  %v1072_v18 = vpop.permute.xlu1 %401 }
  0x95   :  { %v1074_v19 = vpop.permute.xlu0 %406  ;;  %v1076_v20 = vpop.permute.xlu1 %411 }
  0x99   :  { %v1078_v21 = vpop.permute.xlu0 %416  ;;  %v1080_v23 = vpop.permute.xlu1 %421 }
  0x9d   :  { %v1082_v25 = vpop.permute.xlu0 %426  ;;  %v1087_v28 = vpop.permute.xlu1 %431 }
  0xa1   :  { %v1089_v30 = vpop.permute.xlu0 %532  ;;  %v1095_v35 = vpop.permute.xlu1 %537 }
  0xa5   :  { %v1099_v40 = vpop.permute.xlu0 %542  ;;  %v1105_v55 = vpop.permute.xlu1 %547 }
  0xa9   :  { %v1111_v0 = vpop.permute.xlu0 %552 }
  0xe3   :  { %v227_v33 = vpop.f32.mrf.mxu0  ;;  %v267_v34 = vpop.f32.mrf.mxu1 }
  0xe4   :  { %v228_v36 = vadd.f32 %v227_v33, %v1091_v31  ;;  %v268_v37 = vadd.f32 %v267_v34, %v1091_v31  ;;  %v1121_v33 = vpop.permute.xlu1 %557 }
  0xe5   :  { %v229_v38 = vpop.f32.mrf.mxu0  ;;  %v269_v39 = vpop.f32.mrf.mxu1 }
  0xe6   :  { %v434_v41 = vsub.f32 %v228_v36, %v357_v9  ;;  %v450_v42 = vsub.f32 %v268_v37, %v397_v17  ;;  %v230_v43 = vadd.f32 %v229_v38, %v1093_v32  ;;  %v270_v44 = vadd.f32 %v269_v39, %v1093_v32 }
  0xe7   :  { %v231_v45 = vpop.f32.mrf.mxu0  ;;  %v271_v46 = vpop.f32.mrf.mxu1 }
  0xe8   :  { %v466_v47 = vmul.f32 1.442695, %v434_v41  ;;  %v498_v48 = vmul.f32 1.442695, %v450_v42  ;;  %v435_v49 = vsub.f32 %v230_v43, %v357_v9  ;;  %v451_v50 = vsub.f32 %v270_v44, %v397_v17  ;;  %v1127_v43 = vpop.permute.xlu0 %562 }
  0xe9   :  { %v232_v51 = vadd.f32 %v231_v45, %v1091_v31  ;;  %v272_v52 = vadd.f32 %v271_v46, %v1091_v31  ;;  %v233_v53 = vpop.f32.mrf.mxu0  ;;  %v273_v54 = vpop.f32.mrf.mxu1 }
  0xea   :  { %785 = vpow2.f32 %v466_v47  ;;  %v468_v56 = vmul.f32 1.442695, %v435_v49  ;;  %v500_v57 = vmul.f32 1.442695, %v451_v50  ;;  %v234_v58 = vadd.f32 %v233_v53, %v1093_v32 }
  0xeb   :  { %787 = vpow2.f32 %v498_v48  ;;  %v436_v59 = vsub.f32 %v232_v51, %v1060_v11  ;;  %v452_v60 = vsub.f32 %v272_v52, %v1072_v18  ;;  %v274_v61 = vadd.f32 %v273_v54, %v1093_v32  ;;  %v237_v62 = vpop.f32.mrf.mxu0  ;;  %v277_v63 = vpop.f32.mrf.mxu1 }
  0xec   :  { %789 = vpow2.f32 %v468_v56  ;;  %v437_v1 = vsub.f32 %v234_v58, %v1060_v11  ;;  %v238_v2 = vadd.f32 %v237_v62, %v1091_v31  ;;  %v278_v3 = vadd.f32 %v277_v63, %v1091_v31 }
  0xed   :  { %791 = vpow2.f32 %v500_v57  ;;  %v470_v4 = vmul.f32 1.442695, %v436_v59  ;;  %v502_v5 = vmul.f32 1.442695, %v452_v60  ;;  %v453_v6 = vsub.f32 %v274_v61, %v1072_v18  ;;  %v239_v7 = vpop.f32.mrf.mxu0  ;;  %v279_v8 = vpop.f32.mrf.mxu1 }
  0xee   :  { %v472_v9 = vmul.f32 1.442695, %v437_v1  ;;  %v438_v17 = vsub.f32 %v238_v2, %v1058_v10  ;;  %v454_v22 = vsub.f32 %v278_v3, %v1074_v19  ;;  %v240_v24 = vadd.f32 %v239_v7, %v1093_v32  ;;  %v1137_v59 = vpop.permute.xlu1 %567 }
  0xef   :  { %793 = vpow2.f32 %v470_v4  ;;  %v504_v11 = vmul.f32 1.442695, %v453_v6  ;;  %v280_v26 = vadd.f32 %v279_v8, %v1093_v32  ;;  %v241_v27 = vpop.f32.mrf.mxu0  ;;  %v281_v29 = vpop.f32.mrf.mxu1 }
  0xf0   :  { %795 = vpow2.f32 %v502_v5  ;;  %v474_v34 = vmul.f32 1.442695, %v438_v17  ;;  %v506_v18 = vmul.f32 1.442695, %v454_v22  ;;  %v439_v36 = vsub.f32 %v240_v24, %v1058_v10  ;;  %v573_v5 = vpop.permute.xlu0 %572 }
  0xf1   :  { %797 = vpow2.f32 %v472_v9  ;;  %v455_v37 = vsub.f32 %v280_v26, %v1074_v19  ;;  %v242_v38 = vadd.f32 %v241_v27, %v1091_v31  ;;  %v282_v39 = vadd.f32 %v281_v29, %v1091_v31  ;;  %v243_v41 = vpop.f32.mrf.mxu0  ;;  %v283_v42 = vpop.f32.mrf.mxu1 }
  0xf2   :  { %799 = vpow2.f32 %v504_v11  ;;  %v476_v44 = vmul.f32 1.442695, %v439_v36  ;;  %v244_v45 = vadd.f32 %v243_v41, %v1093_v32  ;;  %v284_v46 = vadd.f32 %v283_v42, %v1093_v32  ;;  %v578_v42 = vpop.permute.xlu1 %577 }
  0xf3   :  { %801 = vpow2.f32 %v474_v34  ;;  %v508_v47 = vmul.f32 1.442695, %v455_v37  ;;  %v440_v10 = vsub.f32 %v242_v38, %v1062_v12  ;;  %v456_v19 = vsub.f32 %v282_v39, %v1076_v20  ;;  %v247_v48 = vpop.f32.mrf.mxu0  ;;  %v287_v49 = vpop.f32.mrf.mxu1 }
  0xf4   :  { %803 = vpow2.f32 %v506_v18  ;;  %v441_v50 = vsub.f32 %v244_v45, %v1062_v12  ;;  %v457_v51 = vsub.f32 %v284_v46, %v1076_v20  ;;  %v248_v52 = vadd.f32 %v247_v48, %v1091_v31 }
  0xf5   :  { %805 = vpow2.f32 %v476_v44  ;;  %v478_v53 = vmul.f32 1.442695, %v440_v10  ;;  %v510_v54 = vmul.f32 1.442695, %v456_v19  ;;  %v288_v56 = vadd.f32 %v287_v49, %v1091_v31  ;;  %v249_v57 = vpop.f32.mrf.mxu0  ;;  %v289_v58 = vpop.f32.mrf.mxu1 }
  0xf6   :  { %807 = vpow2.f32 %v508_v47  ;;  %v480_v60 = vmul.f32 1.442695, %v441_v50  ;;  %v512_v61 = vmul.f32 1.442695, %v457_v51  ;;  %v442_v62 = vsub.f32 %v248_v52, %v1064_v13 }
  0xf7   :  { %v786_v63 = vpop.eup %785  ;;  %809 = vpow2.f32 %v478_v53  ;;  %v458_v12 = vsub.f32 %v288_v56, %v1078_v21  ;;  %v250_v20 = vadd.f32 %v249_v57, %v1093_v32  ;;  %v290_v1 = vadd.f32 %v289_v58, %v1093_v32  ;;  %v251_v2 = vpop.f32.mrf.mxu0 }
  0xf8   :  { %v291_v3 = vpop.f32.mrf.mxu1  ;;  %v788_v4 = vpop.eup %787  ;;  %v610_v6 = vmul.f32 %v786_v63, %v1089_v30  ;;  %811 = vpow2.f32 %v510_v54  ;;  %v482_v7 = vmul.f32 1.442695, %v442_v62  ;;  %v252_v8 = vadd.f32 %v251_v2, %v1091_v31 }
  0xf9   :  { %v790_v9 = vpop.eup %789  ;;  %v626_v17 = vmul.f32 %v788_v4, %v573_v5  ;;  %813 = vpow2.f32 %v480_v60  ;;  %v514_v22 = vmul.f32 1.442695, %v458_v12  ;;  %v443_v24 = vsub.f32 %v250_v20, %v1064_v13  ;;  %v253_v11 = vpop.f32.mrf.mxu0 }
  0xfa   :  { %v293_v26 = vpop.f32.mrf.mxu1  ;;  %v792_v27 = vpop.eup %791  ;;  %642 = vst [vmem:[%s1286_s5] sm:$0xff] %v610_v6  ;;  %v611_v29 = vmul.f32 %v790_v9, %v1089_v30  ;;  %815 = vpow2.f32 %v512_v61  ;;  %v459_v34 = vsub.f32 %v290_v1, %v1078_v21  ;;  %v444_v18 = vsub.f32 %v252_v8, %v1066_v14 }
  0xfb   :  { %658 = vst [vmem:[%s1286_s5 + $0x80] sm:$0xff] %v626_v17  ;;  %v627_v36 = vmul.f32 %v792_v27, %v573_v5  ;;  %817 = vpow2.f32 %v482_v7  ;;  %v484_v13 = vmul.f32 1.442695, %v443_v24  ;;  %v292_v37 = vadd.f32 %v291_v3, %v1091_v31  ;;  %v257_v38 = vpop.f32.mrf.mxu0  ;;  %v583_v20 = vpop.permute.xlu0 %582 }
  0xfc   :  { %v297_v39 = vpop.f32.mrf.mxu1  ;;  %v794_v41 = vpop.eup %793  ;;  %643 = vst [vmem:[%s1286_s5 + $0x8] sm:$0xff] %v611_v29  ;;  %819 = vpow2.f32 %v514_v22  ;;  %v516_v21 = vmul.f32 1.442695, %v459_v34  ;;  %v486_v30 = vmul.f32 1.442695, %v444_v18  ;;  %v254_v44 = vadd.f32 %v253_v11, %v1093_v32 }
  0xfd   :  { %v796_v45 = vpop.eup %795  ;;  %659 = vst [vmem:[%s1286_s5 + $0x88] sm:$0xff] %v627_v36  ;;  %v612_v46 = vmul.f32 %v794_v41, %v1095_v35  ;;  %821 = vpow2.f32 %v484_v13  ;;  %v460_v47 = vsub.f32 %v292_v37, %v1080_v23  ;;  %v294_v10 = vadd.f32 %v293_v26, %v1093_v32  ;;  %v259_v19 = vpop.f32.mrf.mxu0 }
  0xfe   :  { %v299_v48 = vpop.f32.mrf.mxu1  ;;  %v798_v49 = vpop.eup %797  ;;  %v628_v50 = vmul.f32 %v796_v45, %v578_v42  ;;  %823 = vpow2.f32 %v516_v21  ;;  %v445_v51 = vsub.f32 %v254_v44, %v1066_v14  ;;  %v258_v52 = vadd.f32 %v257_v38, %v1091_v31 }
  0xff   :  { %v800_v53 = vpop.eup %799  ;;  %644 = vst [vmem:[%s1286_s5 + $0x10] sm:$0xff] %v612_v46  ;;  %v613_v54 = vmul.f32 %v798_v49, %v1095_v35  ;;  %825 = vpow2.f32 %v486_v30  ;;  %v518_v56 = vmul.f32 1.442695, %v460_v47  ;;  %v461_v57 = vsub.f32 %v294_v10, %v1080_v23  ;;  %v261_v58 = vpop.f32.mrf.mxu0 }
 0x100   :  { %v802_v60 = vpop.eup %801  ;;  %660 = vst [vmem:[%s1286_s5 + $0x90] sm:$0xff] %v628_v50  ;;  %v629_v14 = vmul.f32 %v800_v53, %v578_v42  ;;  %v488_v61 = vmul.f32 1.442695, %v445_v51  ;;  %v446_v62 = vsub.f32 %v258_v52, %v1068_v15  ;;  %v298_v63 = vadd.f32 %v297_v39, %v1091_v31  ;;  %v301_v2 = vpop.f32.mrf.mxu1 }
 0x101   :  { %v804_v12 = vpop.eup %803  ;;  %645 = vst [vmem:[%s1286_s5 + $0x18] sm:$0xff] %v613_v54  ;;  %v614_v23 = vmul.f32 %v802_v60, %v1099_v40  ;;  %827 = vpow2.f32 %v518_v56  ;;  %v520_v35 = vmul.f32 1.442695, %v461_v57  ;;  %v260_v1 = vadd.f32 %v259_v19, %v1093_v32  ;;  %v263_v22 = vpop.f32.mrf.mxu0 }
 0x102   :  { %v806_v3 = vpop.eup %805  ;;  %661 = vst [vmem:[%s1286_s5 + $0x98] sm:$0xff] %v629_v14  ;;  %v630_v4 = vmul.f32 %v804_v12, %v583_v20  ;;  %829 = vpow2.f32 %v488_v61  ;;  %v490_v5 = vmul.f32 1.442695, %v446_v62  ;;  %v462_v6 = vsub.f32 %v298_v63, %v1082_v25  ;;  %v588_v34 = vpop.permute.xlu1 %587 }
 0x103   :  { %v808_v7 = vpop.eup %807  ;;  %646 = vst [vmem:[%s1286_s5 + $0x20] sm:$0xff] %v614_v23  ;;  %v615_v8 = vmul.f32 %v806_v3, %v1099_v40  ;;  %831 = vpow2.f32 %v520_v35  ;;  %v447_v9 = vsub.f32 %v260_v1, %v1068_v15  ;;  %v300_v17 = vadd.f32 %v299_v48, %v1093_v32  ;;  %v303_v13 = vpop.f32.mrf.mxu1 }
 0x104   :  { %v810_v24 = vpop.eup %809  ;;  %662 = vst [vmem:[%s1286_s5 + $0xa0] sm:$0xff] %v630_v4  ;;  %v631_v11 = vmul.f32 %v808_v7, %v583_v20  ;;  %833 = vpow2.f32 %v490_v5  ;;  %v522_v26 = vmul.f32 1.442695, %v462_v6  ;;  %v262_v27 = vadd.f32 %v261_v58, %v1091_v31  ;;  %v593_v19 = vpop.permute.xlu0 %592 }
 0x105   :  { %v812_v29 = vpop.eup %811  ;;  %647 = vst [vmem:[%s1286_s5 + $0x28] sm:$0xff] %v615_v8  ;;  %v616_v15 = vmul.f32 %v810_v24, %v1105_v55  ;;  %v492_v40 = vmul.f32 1.442695, %v447_v9  ;;  %v463_v18 = vsub.f32 %v300_v17, %v1082_v25  ;;  %v302_v36 = vadd.f32 %v301_v2, %v1091_v31 }
 0x106   :  { %v814_v37 = vpop.eup %813  ;;  %663 = vst [vmem:[%s1286_s5 + $0xa8] sm:$0xff] %v631_v11  ;;  %v632_v38 = vmul.f32 %v812_v29, %v588_v34  ;;  %835 = vpow2.f32 %v522_v26  ;;  %v448_v39 = vsub.f32 %v262_v27, %v1070_v16  ;;  %v264_v41 = vadd.f32 %v263_v22, %v1093_v32  ;;  %v598_v58 = vpop.permute.xlu1 %597 }
 0x107   :  { %v816_v42 = vpop.eup %815  ;;  %648 = vst [vmem:[%s1286_s5 + $0x30] sm:$0xff] %v616_v15  ;;  %v617_v25 = vmul.f32 %v814_v37, %v1105_v55  ;;  %837 = vpow2.f32 %v492_v40  ;;  %v524_v31 = vmul.f32 1.442695, %v463_v18  ;;  %v464_v21 = vsub.f32 %v302_v36, %v1087_v28 }
 0x108   :  { %v818_v30 = vpop.eup %817  ;;  %664 = vst [vmem:[%s1286_s5 + $0xb0] sm:$0xff] %v632_v38  ;;  %v633_v44 = vmul.f32 %v816_v42, %v588_v34  ;;  %v494_v45 = vmul.f32 1.442695, %v448_v39  ;;  %v449_v46 = vsub.f32 %v264_v41, %v1070_v16  ;;  %v304_v47 = vadd.f32 %v303_v13, %v1093_v32  ;;  %v603_v23 = vpop.permute.xlu0 %602 }
 0x109   :  { %v820_v10 = vpop.eup %819  ;;  %649 = vst [vmem:[%s1286_s5 + $0x38] sm:$0xff] %v617_v25  ;;  %v618_v55 = vmul.f32 %v818_v30, %v1111_v0  ;;  %839 = vpow2.f32 %v524_v31  ;;  %v526_v48 = vmul.f32 1.442695, %v464_v21 }
 0x10a   :  { %v822_v49 = vpop.eup %821  ;;  %665 = vst [vmem:[%s1286_s5 + $0xb8] sm:$0xff] %v633_v44  ;;  %v634_v50 = vmul.f32 %v820_v10, %v593_v19  ;;  %841 = vpow2.f32 %v494_v45  ;;  %v496_v16 = vmul.f32 1.442695, %v449_v46  ;;  %v465_v32 = vsub.f32 %v304_v47, %v1087_v28  ;;  %v608_v6 = vpop.permute.xlu1 %607 }
 0x10b   :  { %v824_v51 = vpop.eup %823  ;;  %650 = vst [vmem:[%s1286_s5 + $0x40] sm:$0xff] %v618_v55  ;;  %v619_v52 = vmul.f32 %v822_v49, %v1111_v0  ;;  %843 = vpow2.f32 %v526_v48 }
 0x10c   :  { %v826_v53 = vpop.eup %825  ;;  %666 = vst [vmem:[%s1286_s5 + $0xc0] sm:$0xff] %v634_v50  ;;  %v635_v54 = vmul.f32 %v824_v51, %v593_v19  ;;  %845 = vpow2.f32 %v496_v16  ;;  %v528_v56 = vmul.f32 1.442695, %v465_v32 }
 0x10d   :  { %651 = vst [vmem:[%s1286_s5 + $0x48] sm:$0xff] %v619_v52  ;;  %v620_v28 = vmul.f32 %v826_v53, %v1121_v33 }
 0x10e   :  { %v828_v57 = vpop.eup %827  ;;  %667 = vst [vmem:[%s1286_s5 + $0xc8] sm:$0xff] %v635_v54  ;;  %847 = vpow2.f32 %v528_v56 }
 0x10f   :  { %v830_v0 = vpop.eup %829  ;;  %652 = vst [vmem:[%s1286_s5 + $0x50] sm:$0xff] %v620_v28  ;;  %v636_v60 = vmul.f32 %v828_v57, %v598_v58 }
 0x110   :  { %v832_v14 = vpop.eup %831  ;;  %v621_v61 = vmul.f32 %v830_v0, %v1121_v33 }
 0x111   :  { %v834_v62 = vpop.eup %833  ;;  %668 = vst [vmem:[%s1286_s5 + $0xd0] sm:$0xff] %v636_v60  ;;  %v637_v63 = vmul.f32 %v832_v14, %v598_v58 }
 0x112   :  { %653 = vst [vmem:[%s1286_s5 + $0x58] sm:$0xff] %v621_v61  ;;  %v622_v12 = vmul.f32 %v834_v62, %v1127_v43 }
 0x113   :  { %v836_v20 = vpop.eup %835  ;;  %669 = vst [vmem:[%s1286_s5 + $0xd8] sm:$0xff] %v637_v63 }
 0x114   :  { %v838_v35 = vpop.eup %837  ;;  %654 = vst [vmem:[%s1286_s5 + $0x60] sm:$0xff] %v622_v12  ;;  %v638_v33 = vmul.f32 %v836_v20, %v603_v23 }
 0x115   :  { %v623_v1 = vmul.f32 %v838_v35, %v1127_v43 }
 0x116   :  { %v840_v2 = vpop.eup %839  ;;  %670 = vst [vmem:[%s1286_s5 + $0xe0] sm:$0xff] %v638_v33 }
 0x117   :  { %v842_v3 = vpop.eup %841  ;;  %655 = vst [vmem:[%s1286_s5 + $0x68] sm:$0xff] %v623_v1  ;;  %v639_v4 = vmul.f32 %v840_v2, %v603_v23 }
 0x118   :  { %v844_v5 = vpop.eup %843  ;;  %v624_v7 = vmul.f32 %v842_v3, %v1137_v59 }
 0x119   :  { %v846_v8 = vpop.eup %845  ;;  %671 = vst [vmem:[%s1286_s5 + $0xe8] sm:$0xff] %v639_v4  ;;  %v640_v43 = vmul.f32 %v844_v5, %v608_v6 }
 0x11a   :  { %656 = vst [vmem:[%s1286_s5 + $0x70] sm:$0xff] %v624_v7  ;;  %v625_v9 = vmul.f32 %v846_v8, %v1137_v59 }
 0x11b   :  { %v848_v17 = vpop.eup %847  ;;  %672 = vst [vmem:[%s1286_s5 + $0xf0] sm:$0xff] %v640_v43 }
 0x11c   :  { %657 = vst [vmem:[%s1286_s5 + $0x78] sm:$0xff] %v625_v9  ;;  %v641_v22 = vmul.f32 %v848_v17, %v608_v6 }
 0x11e   :  { %673 = vst [vmem:[%s1286_s5 + $0xf8] sm:$0xff] %v641_v22 }

// kernel: decoder_forward.4
= control target key start
LH: loop header
LB: loop body
LE: loop exit
PB: predicated region body
PF: predicated region fallthrough
CT: control target
= control target key end

     0   :  { %v953_v1 = vmov 0   ;;  %vm21_vm0 = vcmask 7168   ;;  %v954_v25 = vmov -inf   ;;  %v88_v26 = vlaneseq  ;;  %s1774_s1 = inlined_call_operand.vmem [shape: bf16[128,256], index: 1, kind: input, shape index: {}]   ;;  %s1775_s0 = inlined_call_operand.vmem [shape: bf16[128,128], index: 0, kind: input, shape index: {}]   ;;  %s1776_s3 = inlined_call_operand.vmem [shape: f32[128,1], index: 3, kind: output, shape index: {0}]   ;;  %s1777_s2 = inlined_call_operand.vmem [shape: f32[1,256], index: 2, kind: input, shape index: {}]   ;;  %s1778_s4 = inlined_call_operand.vmem [shape: f32[128,1], index: 4, kind: output, shape index: {1}]  }
   0x1   :  { %v825_v0 = vld [vmem:[%s1774_s1 + $0x74] ss:$8 sps:$4 sm:$0xff]   ;;  %258 = vmatprep.mubr.bf16.mxu0 %v953_v1  ;;  %298 = vmatprep.mubr.bf16.mxu1 %v953_v1  ;;  %v827_v2 = vld [vmem:[%s1774_s1 + $0x70] ss:$8 sps:$4 sm:$0xff]   ;;  %v828_v3 = vld [vmem:[%s1774_s1 + $0x64] ss:$8 sps:$4 sm:$0xff]  }
   0x2   :  { %823 = vset.pattern.permute.xlu0 %v953_v1  ;;  %824 = vset.pattern.permute.xlu1 %v953_v1  ;;  %v830_v4 = vld [vmem:[%s1774_s1 + $0x60] ss:$8 sps:$4 sm:$0xff]   ;;  %v831_v5 = vld [vmem:[%s1774_s1 + $0x54] ss:$8 sps:$4 sm:$0xff]   ;;  %v833_v6 = vld [vmem:[%s1774_s1 + $0x50] ss:$8 sps:$4 sm:$0xff]  }
   0x3   :  { %226 = vmatprep.subr.bf16.mxu0 %v825_v0  ;;  %804 = vmatprep.subr.bf16.mxu1 %v825_v0  ;;  %v834_v7 = vld [vmem:[%s1774_s1 + $0x44] ss:$8 sps:$4 sm:$0xff]   ;;  %v836_v8 = vld [vmem:[%s1774_s1 + $0x40] ss:$8 sps:$4 sm:$0xff]   ;;  %v837_v9 = vld [vmem:[%s1774_s1 + $0x34] ss:$8 sps:$4 sm:$0xff]  }
   0x4   :  { %227 = vmatpush1.bf16.msra.mxu0 %v827_v2  ;;  %812 = vmatpush1.bf16.msra.mxu1 %v827_v2  ;;  %v839_v10 = vld [vmem:[%s1774_s1 + $0x30] ss:$8 sps:$4 sm:$0xff]   ;;  %v840_v11 = vld [vmem:[%s1774_s1 + $0x24] ss:$8 sps:$4 sm:$0xff]   ;;  %v842_v12 = vld [vmem:[%s1774_s1 + $0x20] ss:$8 sps:$4 sm:$0xff]  }
   0x5   :  { %228 = vmatprep.subr.bf16.mxu0 %v828_v3  ;;  %805 = vmatprep.subr.bf16.mxu1 %v828_v3  ;;  %v843_v13 = vld [vmem:[%s1774_s1 + $0x14] ss:$8 sps:$4 sm:$0xff]   ;;  %v845_v14 = vld [vmem:[%s1774_s1 + $0x10] ss:$8 sps:$4 sm:$0xff]   ;;  %v846_v15 = vld [vmem:[%s1774_s1 + $0x4] ss:$8 sps:$4 sm:$0xff]  }
   0x6   :  { %v848_v16 = vld [vmem:[%s1774_s1] ss:$8 sps:$4 sm:$0xff]   ;;  %v853_v21 = vld [vmem:[%s1775_s0 + $0x10] sm:$0xff]   ;;  %v855_v23 = vld [vmem:[%s1775_s0 + $0x18] sm:$0xff]   ;;  %22 = vst.msk [vmem:[%s1776_s3] sm:$0xff] %vm21_vm0, %v954_v25  ;;  %v89_v27 = vshrl.u32 %v88_v26, 7 }
   0x7   :  { %v849_v17 = vld [vmem:[%s1775_s0] sm:$0xff]   ;;  %v851_v19 = vld [vmem:[%s1775_s0 + $0x8] sm:$0xff]   ;;  %v854_v22 = vld [vmem:[%s1775_s0 + $0x30] sm:$0xff]   ;;  %23 = vst.msk [vmem:[%s1776_s3 + $0x8] sm:$0xff] %vm21_vm0, %v954_v25 }
   0x8   :  { %229 = vmatpush1.bf16.msra.mxu0 %v830_v4  ;;  %813 = vmatpush1.bf16.msra.mxu1 %v830_v4  ;;  %v850_v18 = vld [vmem:[%s1775_s0 + $0x20] sm:$0xff]   ;;  %v852_v20 = vld [vmem:[%s1775_s0 + $0x28] sm:$0xff]   ;;  %v856_v24 = vld [vmem:[%s1775_s0 + $0x38] sm:$0xff]   ;;  %24 = vst.msk [vmem:[%s1776_s3 + $0x10] sm:$0xff] %vm21_vm0, %v954_v25  ;;  %v90_v28 = vsub.s32 0, %v89_v27  ;;  %v94_v29 = vsub.s32 1, %v89_v27 }
   0x9   :  { %230 = vmatprep.subr.bf16.mxu0 %v831_v5  ;;  %806 = vmatprep.subr.bf16.mxu1 %v831_v5  ;;  %25 = vst.msk [vmem:[%s1776_s3 + $0x18] sm:$0xff] %vm21_vm0, %v954_v25  ;;  %26 = vst.msk [vmem:[%s1776_s3 + $0x20] sm:$0xff] %vm21_vm0, %v954_v25  ;;  %v86_v30 = vld [vmem:[%s1777_s2] sm:$0x3] }
   0xa   :  { %27 = vst.msk [vmem:[%s1776_s3 + $0x28] sm:$0xff] %vm21_vm0, %v954_v25  ;;  %28 = vst.msk [vmem:[%s1776_s3 + $0x30] sm:$0xff] %vm21_vm0, %v954_v25  ;;  %v1130_v31 = vrot.slane %v86_v30, %v90_v28  ;;  %v1132_v32 = vrot.slane %v86_v30, %v94_v29 }
   0xb   :  { %29 = vst.msk [vmem:[%s1776_s3 + $0x38] sm:$0xff] %vm21_vm0, %v954_v25  ;;  %30 = vst.msk [vmem:[%s1776_s3 + $0x40] sm:$0xff] %vm21_vm0, %v954_v25 }
   0xc   :  { %231 = vmatpush1.bf16.msra.mxu0 %v833_v6  ;;  %814 = vmatpush1.bf16.msra.mxu1 %v833_v6  ;;  %31 = vst.msk [vmem:[%s1776_s3 + $0x48] sm:$0xff] %vm21_vm0, %v954_v25  ;;  %32 = vst.msk [vmem:[%s1776_s3 + $0x50] sm:$0xff] %vm21_vm0, %v954_v25 }
   0xd   :  { %232 = vmatprep.subr.bf16.mxu0 %v834_v7  ;;  %807 = vmatprep.subr.bf16.mxu1 %v834_v7  ;;  %33 = vst.msk [vmem:[%s1776_s3 + $0x58] sm:$0xff] %vm21_vm0, %v954_v25  ;;  %34 = vst.msk [vmem:[%s1776_s3 + $0x60] sm:$0xff] %vm21_vm0, %v954_v25 }
   0xe   :  { %35 = vst.msk [vmem:[%s1776_s3 + $0x68] sm:$0xff] %vm21_vm0, %v954_v25  ;;  %36 = vst.msk [vmem:[%s1776_s3 + $0x70] sm:$0xff] %vm21_vm0, %v954_v25 }
   0xf   :  { %37 = vst.msk [vmem:[%s1776_s3 + $0x78] sm:$0xff] %vm21_vm0, %v954_v25 }
  0x10   :  { %233 = vmatpush1.bf16.msra.mxu0 %v836_v8  ;;  %815 = vmatpush1.bf16.msra.mxu1 %v836_v8 }
  0x11   :  { %234 = vmatprep.subr.bf16.mxu0 %v837_v9  ;;  %808 = vmatprep.subr.bf16.mxu1 %v837_v9 }
  0x14   :  { %235 = vmatpush1.bf16.msra.mxu0 %v839_v10  ;;  %816 = vmatpush1.bf16.msra.mxu1 %v839_v10 }
  0x15   :  { %236 = vmatprep.subr.bf16.mxu0 %v840_v11  ;;  %809 = vmatprep.subr.bf16.mxu1 %v840_v11 }
  0x18   :  { %237 = vmatpush1.bf16.msra.mxu0 %v842_v12  ;;  %817 = vmatpush1.bf16.msra.mxu1 %v842_v12 }
  0x19   :  { %238 = vmatprep.subr.bf16.mxu0 %v843_v13  ;;  %810 = vmatprep.subr.bf16.mxu1 %v843_v13 }
  0x1c   :  { %239 = vmatpush1.bf16.msra.mxu0 %v845_v14  ;;  %818 = vmatpush1.bf16.msra.mxu1 %v845_v14 }
  0x1d   :  { %240 = vmatprep.subr.bf16.mxu0 %v846_v15  ;;  %811 = vmatprep.subr.bf16.mxu1 %v846_v15 }
  0x20   :  { %241 = vmatpush1.bf16.msra.mxu0 %v848_v16  ;;  %819 = vmatpush1.bf16.msra.mxu1 %v848_v16 }
  0x23   :  { %259 = vmatmul.mubr.bf16.vlgmr.msra.gmra.mxu0 %v849_v17  ;;  %299 = vmatmul.mubr.bf16.vlgmr.msra.gmra.mxu1 %v850_v18 }
  0x24   :  { %268 = vmatprep.mubr.bf16.mxu0 %v953_v1  ;;  %308 = vmatprep.mubr.bf16.mxu1 %v953_v1 }
  0x2b   :  { %269 = vmatmul.mubr.bf16.gmra.mxu0 %v851_v19  ;;  %309 = vmatmul.mubr.bf16.gmra.mxu1 %v852_v20 }
  0x2c   :  { %278 = vmatprep.mubr.bf16.mxu0 %v953_v1  ;;  %318 = vmatprep.mubr.bf16.mxu1 %v953_v1 }
  0x33   :  { %279 = vmatmul.mubr.bf16.gmra.mxu0 %v853_v21  ;;  %319 = vmatmul.mubr.bf16.gmra.mxu1 %v854_v22 }
  0x34   :  { %288 = vmatprep.mubr.bf16.mxu0 %v953_v1  ;;  %328 = vmatprep.mubr.bf16.mxu1 %v953_v1 }
  0x3b   :  { %289 = vmatmul.mubr.bf16.gmra.mxu0 %v855_v23  ;;  %329 = vmatmul.mubr.bf16.gmra.mxu1 %v856_v24 }
  0xe3   :  { %v260_v33 = vpop.f32.mrf.mxu0  ;;  %v300_v34 = vpop.f32.mrf.mxu1 }
  0xe4   :  { %v1135_v37 = vadd.f32 %v260_v33, %v1130_v31  ;;  %v1141_v41 = vadd.f32 %v300_v34, %v1130_v31 }
  0xe5   :  { %v262_v35 = vpop.f32.mrf.mxu0  ;;  %v302_v36 = vpop.f32.mrf.mxu1 }
  0xe6   :  { %v1138_v38 = vadd.f32 %v262_v35, %v1132_v32  ;;  %v1144_v42 = vadd.f32 %v302_v36, %v1132_v32 }
  0xe7   :  { %v264_v39 = vpop.f32.mrf.mxu0  ;;  %v304_v40 = vpop.f32.mrf.mxu1 }
  0xe8   :  { %v355_v43 = vmax.f32 %v1135_v37, %v1138_v38  ;;  %v1149_v46 = vadd.f32 %v304_v40, %v1130_v31  ;;  %v379_v53 = vmax.f32 %v1141_v41, %v1144_v42  ;;  %v1165_v54 = vadd.f32 %v264_v39, %v1130_v31 }
  0xe9   :  { %v266_v44 = vpop.f32.mrf.mxu0  ;;  %v306_v45 = vpop.f32.mrf.mxu1 }
  0xea   :  { %v1152_v47 = vadd.f32 %v306_v45, %v1132_v32  ;;  %356 = vmax.xlane.f32.xlu0 %v355_v43  ;;  %v1155_v50 = vadd.f32 %v266_v44, %v1132_v32 }
  0xeb   :  { %v270_v48 = vpop.f32.mrf.mxu0  ;;  %v310_v49 = vpop.f32.mrf.mxu1 }
  0xec   :  { %v1158_v51 = vadd.f32 %v270_v48, %v1130_v31  ;;  %v382_v52 = vmax.f32 %v1149_v46, %v1152_v47  ;;  %v1171_v58 = vadd.f32 %v310_v49, %v1130_v31  ;;  %v358_v63 = vmax.f32 %v1165_v54, %v1155_v50 }
  0xed   :  { %v272_v55 = vpop.f32.mrf.mxu0  ;;  %v312_v56 = vpop.f32.mrf.mxu1 }
  0xee   :  { %v1168_v57 = vadd.f32 %v272_v55, %v1132_v32  ;;  %383 = vmax.xlane.f32.xlu1 %v382_v52  ;;  %380 = vmax.xlane.f32.xlu0 %v379_v53  ;;  %v1174_v59 = vadd.f32 %v312_v56, %v1132_v32 }
  0xef   :  { %v274_v60 = vpop.f32.mrf.mxu0  ;;  %v314_v61 = vpop.f32.mrf.mxu1 }
  0xf0   :  { %v361_v62 = vmax.f32 %v1158_v51, %v1168_v57  ;;  %v1181_v2 = vadd.f32 %v274_v60, %v1130_v31  ;;  %v385_v4 = vmax.f32 %v1171_v58, %v1174_v59  ;;  %v1189_v7 = vadd.f32 %v314_v61, %v1130_v31 }
  0xf1   :  { %v276_v0 = vpop.f32.mrf.mxu0  ;;  %v316_v1 = vpop.f32.mrf.mxu1  ;;  %v955_v61 = vmov 0.0  }
  0xf2   :  { %v1184_v3 = vadd.f32 %v276_v0, %v1132_v32  ;;  %362 = vmax.xlane.f32.xlu1 %v361_v62  ;;  %359 = vmax.xlane.f32.xlu0 %v358_v63  ;;  %v1195_v9 = vadd.f32 %v316_v1, %v1132_v32  ;;  %38 = vst.msk [vmem:[%s1778_s4] sm:$0xff] %vm21_vm0, %v955_v61  ;;  %39 = vst.msk [vmem:[%s1778_s4 + $0x8] sm:$0xff] %vm21_vm0, %v955_v61  ;;  %v1329_v62 = vld [vmem:[%s1776_s3] sm:$0xff]  ;;  %v1337_v1 = vld [vmem:[%s1776_s3 + $0x48] sm:$0xff] }
  0xf3   :  { %v280_v5 = vpop.f32.mrf.mxu0  ;;  %v320_v6 = vpop.f32.mrf.mxu1  ;;  %40 = vst.msk [vmem:[%s1778_s4 + $0x10] sm:$0xff] %vm21_vm0, %v955_v61  ;;  %41 = vst.msk [vmem:[%s1778_s4 + $0x18] sm:$0xff] %vm21_vm0, %v955_v61 }
  0xf4   :  { %v1192_v8 = vadd.f32 %v280_v5, %v1130_v31  ;;  %v364_v10 = vmax.f32 %v1181_v2, %v1184_v3  ;;  %v1203_v14 = vadd.f32 %v320_v6, %v1130_v31  ;;  %v388_v19 = vmax.f32 %v1189_v7, %v1195_v9  ;;  %42 = vst.msk [vmem:[%s1778_s4 + $0x20] sm:$0xff] %vm21_vm0, %v955_v61 }
  0xf5   :  { %v282_v11 = vpop.f32.mrf.mxu0  ;;  %v322_v12 = vpop.f32.mrf.mxu1  ;;  %43 = vst.msk [vmem:[%s1778_s4 + $0x28] sm:$0xff] %vm21_vm0, %v955_v61  ;;  %44 = vst.msk [vmem:[%s1778_s4 + $0x30] sm:$0xff] %vm21_vm0, %v955_v61 }
  0xf6   :  { %v1200_v13 = vadd.f32 %v282_v11, %v1132_v32  ;;  %365 = vmax.xlane.f32.xlu1 %v364_v10  ;;  %386 = vmax.xlane.f32.xlu0 %v385_v4  ;;  %v1206_v15 = vadd.f32 %v322_v12, %v1132_v32  ;;  %45 = vst.msk [vmem:[%s1778_s4 + $0x38] sm:$0xff] %vm21_vm0, %v955_v61  ;;  %46 = vst.msk [vmem:[%s1778_s4 + $0x40] sm:$0xff] %vm21_vm0, %v955_v61  ;;  %v1342_v4 = vld [vmem:[%s1776_s3 + $0x40] sm:$0xff] }
  0xf7   :  { %v284_v16 = vpop.f32.mrf.mxu0  ;;  %v324_v17 = vpop.f32.mrf.mxu1  ;;  %47 = vst.msk [vmem:[%s1778_s4 + $0x48] sm:$0xff] %vm21_vm0, %v955_v61  ;;  %48 = vst.msk [vmem:[%s1778_s4 + $0x50] sm:$0xff] %vm21_vm0, %v955_v61 }
  0xf8   :  { %v1209_v18 = vadd.f32 %v284_v16, %v1130_v31  ;;  %v367_v20 = vmax.f32 %v1192_v8, %v1200_v13  ;;  %v1216_v22 = vadd.f32 %v324_v17, %v1130_v31  ;;  %v391_v26 = vmax.f32 %v1203_v14, %v1206_v15  ;;  %49 = vst.msk [vmem:[%s1778_s4 + $0x58] sm:$0xff] %vm21_vm0, %v955_v61  ;;  %v1361_v16 = vld [vmem:[%s1776_s3 + $0x10] sm:$0xff]  ;;  %v1366_v17 = vld [vmem:[%s1776_s3 + $0x8] sm:$0xff] }
  0xf9   :  { %v286_v21 = vpop.f32.mrf.mxu0  ;;  %v326_v23 = vpop.f32.mrf.mxu1  ;;  %50 = vst.msk [vmem:[%s1778_s4 + $0x60] sm:$0xff] %vm21_vm0, %v955_v61  ;;  %51 = vst.msk [vmem:[%s1778_s4 + $0x68] sm:$0xff] %vm21_vm0, %v955_v61 }
  0xfa   :  { %v1219_v24 = vadd.f32 %v286_v21, %v1132_v32  ;;  %389 = vmax.xlane.f32.xlu1 %v388_v19  ;;  %v1222_v25 = vadd.f32 %v326_v23, %v1132_v32  ;;  %368 = vmax.xlane.f32.xlu0 %v367_v20  ;;  %52 = vst.msk [vmem:[%s1778_s4 + $0x70] sm:$0xff] %vm21_vm0, %v955_v61  ;;  %53 = vst.msk [vmem:[%s1778_s4 + $0x78] sm:$0xff] %vm21_vm0, %v955_v61  ;;  %v1518_v19 = vld [vmem:[%s1776_s3 + $0x38] sm:$0xff] }
  0xfb   :  { %v290_v27 = vpop.f32.mrf.mxu0  ;;  %v330_v28 = vpop.f32.mrf.mxu1  ;;  %1803 = vst [vmem:[#allocation11_spill] sm:$0xff] %v1518_v19 }
  0xfc   :  { %v1227_v29 = vadd.f32 %v290_v27, %v1130_v31  ;;  %v370_v30 = vmax.f32 %v1209_v18, %v1219_v24  ;;  %v1232_v34 = vadd.f32 %v330_v28, %v1130_v31  ;;  %v394_v40 = vmax.f32 %v1216_v22, %v1222_v25  ;;  %v1393_v28 = vld [vmem:[%s1776_s3 + $0x18] sm:$0xff] }
  0xfd   :  { %v292_v33 = vpop.f32.mrf.mxu0  ;;  %v332_v35 = vpop.f32.mrf.mxu1 }
  0xfe   :  { %v1235_v36 = vadd.f32 %v292_v33, %v1132_v32  ;;  %371 = vmax.xlane.f32.xlu1 %v370_v30  ;;  %v1238_v39 = vadd.f32 %v332_v35, %v1132_v32  ;;  %392 = vmax.xlane.f32.xlu0 %v391_v26  ;;  %v1398_v30 = vld [vmem:[%s1776_s3 + $0x50] sm:$0xff] }
  0xff   :  { %v294_v43 = vpop.f32.mrf.mxu0  ;;  %v334_v44 = vpop.f32.mrf.mxu1 }
 0x100   :  { %v1243_v45 = vadd.f32 %v294_v43, %v1130_v31  ;;  %v373_v48 = vmax.f32 %v1227_v29, %v1235_v36  ;;  %v1248_v52 = vadd.f32 %v334_v44, %v1130_v31  ;;  %v397_v60 = vmax.f32 %v1232_v34, %v1238_v39 }
 0x101   :  { %v296_v49 = vpop.f32.mrf.mxu0  ;;  %v336_v53 = vpop.f32.mrf.mxu1 }
 0x102   :  { %v1251_v55 = vadd.f32 %v296_v49, %v1132_v32  ;;  %395 = vmax.xlane.f32.xlu1 %v394_v40  ;;  %v1254_v56 = vadd.f32 %v336_v53, %v1132_v32  ;;  %374 = vmax.xlane.f32.xlu0 %v373_v48  ;;  %v1424_v49 = vld [vmem:[%s1776_s3 + $0x58] sm:$0xff]  ;;  %v1429_v53 = vld [vmem:[%s1776_s3 + $0x20] sm:$0xff] }
 0x104   :  { %v376_v31 = vmax.f32 %v1243_v45, %v1251_v55  ;;  %v400_v32 = vmax.f32 %v1248_v52, %v1254_v56 }
 0x106   :  { %377 = vmax.xlane.f32.xlu1 %v376_v31  ;;  %398 = vmax.xlane.f32.xlu0 %v397_v60  ;;  %v1487_v60 = vld [vmem:[%s1776_s3 + $0x68] sm:$0xff] }
 0x107   :  { %1799 = vst [vmem:[#allocation7_spill] sm:$0xff] %v1487_v60 }
 0x10a   :  { %401 = vmax.xlane.f32.xlu1 %v400_v32 }
 0x173   :  { %v357_v63 = vpop.xlane.xlu0 %356 }
 0x174   :  { %v1332_v0 = vmax.f32 %v1329_v62, %v357_v63 }
 0x176   :  { %756 = vst.msk [vmem:[%s1776_s3] sm:$0xff] %vm21_vm0, %v1332_v0  ;;  %501 = vperm.xlu0 %823, %v1332_v0  }
 0x177   :  { %v384_v6 = vpop.xlane.xlu1 %383  ;;  %v381_v10 = vpop.xlane.xlu0 %380 }
 0x178   :  { %v1353_v11 = vmax.f32 %v1337_v1, %v384_v6  ;;  %v1356_v12 = vmax.f32 %v1342_v4, %v381_v10  ;;  %v1455_v10 = vld [vmem:[%s1776_s3 + $0x28] sm:$0xff] }
 0x179   :  { %1795 = vst [vmem:[#allocation3_spill] sm:$0xff] %v1455_v10 }
 0x17a   :  { %765 = vst.msk [vmem:[%s1776_s3 + $0x48] sm:$0xff] %vm21_vm0, %v1353_v11  ;;  %764 = vst.msk [vmem:[%s1776_s3 + $0x40] sm:$0xff] %vm21_vm0, %v1356_v12  ;;  %546 = vperm.xlu0 %823, %v1353_v11   ;;  %541 = vperm.xlu1 %824, %v1356_v12  }
 0x17b   :  { %v363_v21 = vpop.xlane.xlu1 %362  ;;  %v360_v23 = vpop.xlane.xlu0 %359 }
 0x17c   :  { %v1385_v26 = vmax.f32 %v1361_v16, %v363_v21  ;;  %v1388_v27 = vmax.f32 %v1366_v17, %v360_v23  ;;  %v1460_v21 = vld [vmem:[%s1776_s3 + $0x60] sm:$0xff] }
 0x17d   :  { %1796 = vst [vmem:[#allocation4_spill] sm:$0xff] %v1460_v21 }
 0x17e   :  { %758 = vst.msk [vmem:[%s1776_s3 + $0x10] sm:$0xff] %vm21_vm0, %v1385_v26  ;;  %757 = vst.msk [vmem:[%s1776_s3 + $0x8] sm:$0xff] %vm21_vm0, %v1388_v27  ;;  %506 = vperm.xlu1 %824, %v1388_v27  }
 0x17f   :  { %v366_v40 = vpop.xlane.xlu1 %365  ;;  %v387_v43 = vpop.xlane.xlu0 %386 }
 0x180   :  { %v1416_v44 = vmax.f32 %v1393_v28, %v366_v40  ;;  %v1419_v48 = vmax.f32 %v1398_v30, %v387_v43  ;;  %v1492_v40 = vld [vmem:[%s1776_s3 + $0x30] sm:$0xff] }
 0x181   :  { %1800 = vst [vmem:[#allocation8_spill] sm:$0xff] %v1492_v40 }
 0x182   :  { %759 = vst.msk [vmem:[%s1776_s3 + $0x18] sm:$0xff] %vm21_vm0, %v1416_v44  ;;  %766 = vst.msk [vmem:[%s1776_s3 + $0x50] sm:$0xff] %vm21_vm0, %v1419_v48  ;;  %511 = vperm.xlu1 %824, %v1385_v26  }
 0x183   :  { %v390_v31 = vpop.xlane.xlu1 %389  ;;  %v369_v32 = vpop.xlane.xlu0 %368 }
 0x184   :  { %v1447_v63 = vmax.f32 %v1424_v49, %v390_v31  ;;  %v1450_v6 = vmax.f32 %v1429_v53, %v369_v32 }
 0x186   :  { %1794 = vst [vmem:[#allocation2_spill] sm:$0xff] %v1450_v6  ;;  %767 = vst.msk [vmem:[%s1776_s3 + $0x58] sm:$0xff] %vm21_vm0, %v1447_v63  ;;  %556 = vperm.xlu0 %823, %v1447_v63   ;;  %551 = vperm.xlu1 %824, %v1419_v48  }
 0x187   :  { %760 = vst.msk [vmem:[%s1776_s3 + $0x20] sm:$0xff] %vm21_vm0, %v1450_v6  ;;  %v372_v43 = vpop.xlane.xlu1 %371  ;;  %v393_v31 = vpop.xlane.xlu0 %392 }
 0x188   :  { %v1479_v32 = vmax.f32 %v1455_v10, %v372_v43  ;;  %v1482_v23 = vmax.f32 %v1460_v21, %v393_v31  ;;  %v1523_v43 = vld [vmem:[%s1776_s3 + $0x70] sm:$0xff] }
 0x189   :  { %1804 = vst [vmem:[#allocation12_spill] sm:$0xff] %v1523_v43 }
 0x18a   :  { %1797 = vst [vmem:[#allocation5_spill] sm:$0xff] %v1479_v32  ;;  %1798 = vst [vmem:[#allocation6_spill] sm:$0xff] %v1482_v23  ;;  %516 = vperm.xlu1 %824, %v1416_v44  }
 0x18b   :  { %761 = vst.msk [vmem:[%s1776_s3 + $0x28] sm:$0xff] %vm21_vm0, %v1479_v32  ;;  %768 = vst.msk [vmem:[%s1776_s3 + $0x60] sm:$0xff] %vm21_vm0, %v1482_v23  ;;  %v396_v31 = vpop.xlane.xlu1 %395  ;;  %v375_v33 = vpop.xlane.xlu0 %374 }
 0x18c   :  { %v1510_v61 = vmax.f32 %v1487_v60, %v396_v31  ;;  %v1513_v35 = vmax.f32 %v1492_v40, %v375_v33 }
 0x18e   :  { %1801 = vst [vmem:[#allocation9_spill] sm:$0xff] %v1510_v61  ;;  %1802 = vst [vmem:[#allocation10_spill] sm:$0xff] %v1513_v35  ;;  %566 = vperm.xlu0 %823, %v1510_v61   ;;  %521 = vperm.xlu1 %824, %v1450_v6  }
 0x18f   :  { %769 = vst.msk [vmem:[%s1776_s3 + $0x68] sm:$0xff] %vm21_vm0, %v1510_v61  ;;  %762 = vst.msk [vmem:[%s1776_s3 + $0x30] sm:$0xff] %vm21_vm0, %v1513_v35  ;;  %v378_v31 = vpop.xlane.xlu1 %377  ;;  %v399_v20 = vpop.xlane.xlu0 %398  ;;  %v1550_v61 = vld [vmem:[%s1776_s3 + $0x78] sm:$0xff] }
 0x190   :  { %v1542_v5 = vmax.f32 %v1518_v19, %v378_v31  ;;  %v1545_v60 = vmax.f32 %v1523_v43, %v399_v20  ;;  %1807 = vst [vmem:[#allocation15_spill] sm:$0xff] %v1550_v61 }
 0x192   :  { %1805 = vst [vmem:[#allocation13_spill] sm:$0xff] %v1542_v5  ;;  %1806 = vst [vmem:[#allocation14_spill] sm:$0xff] %v1545_v60  ;;  %561 = vperm.xlu1 %824, %v1482_v23  }
 0x193   :  { %763 = vst.msk [vmem:[%s1776_s3 + $0x38] sm:$0xff] %vm21_vm0, %v1542_v5  ;;  %770 = vst.msk [vmem:[%s1776_s3 + $0x70] sm:$0xff] %vm21_vm0, %v1545_v60  ;;  %v402_v31 = vpop.xlane.xlu1 %401 }
 0x194   :  { %v1568_v33 = vmax.f32 %v1550_v61, %v402_v31 }
 0x196   :  { %1808 = vst [vmem:[#allocation16_spill] sm:$0xff] %v1568_v33  ;;  %771 = vst.msk [vmem:[%s1776_s3 + $0x78] sm:$0xff] %vm21_vm0, %v1568_v33  ;;  %576 = vperm.xlu0 %823, %v1568_v33   ;;  %526 = vperm.xlu1 %824, %v1479_v32  }
 0x19a   :  { %531 = vperm.xlu1 %824, %v1513_v35  }
 0x19e   :  { %536 = vperm.xlu1 %824, %v1542_v5  }
 0x1a2   :  { %571 = vperm.xlu1 %824, %v1545_v60  }
 0x1f1   :  { %v502_v31 = vpop.permute.xlu0 %501 }
 0x1f2   :  { %v579_v20 = vsub.f32 %v1135_v37, %v502_v31  ;;  %v580_v19 = vsub.f32 %v1138_v38, %v502_v31 }
 0x1f4   :  { %v611_v61 = vmul.f32 1.442695, %v579_v20  ;;  %v613_v43 = vmul.f32 1.442695, %v580_v19 }
 0x1f5   :  { %v542_v40 = vpop.permute.xlu1 %541  ;;  %v547_v10 = vpop.permute.xlu0 %546 }
 0x1f6   :  { %857 = vpow2.f32 %v611_v61  ;;  %v595_v33 = vsub.f32 %v1141_v41, %v542_v40  ;;  %v596_v32 = vsub.f32 %v1144_v42, %v542_v40  ;;  %v597_v35 = vsub.f32 %v1149_v46, %v547_v10 }
 0x1f7   :  { %859 = vpow2.f32 %v613_v43  ;;  %v598_v5 = vsub.f32 %v1152_v47, %v547_v10 }
 0x1f8   :  { %v643_v60 = vmul.f32 1.442695, %v595_v33  ;;  %v645_v23 = vmul.f32 1.442695, %v596_v32  ;;  %v647_v21 = vmul.f32 1.442695, %v597_v35 }
 0x1f9   :  { %v649_v37 = vmul.f32 1.442695, %v598_v5  ;;  %v507_v6 = vpop.permute.xlu1 %506 }
 0x1fa   :  { %861 = vpow2.f32 %v643_v60  ;;  %v581_v38 = vsub.f32 %v1165_v54, %v507_v6  ;;  %v582_v19 = vsub.f32 %v1155_v50, %v507_v6 }
 0x1fb   :  { %863 = vpow2.f32 %v645_v23 }
 0x1fc   :  { %865 = vpow2.f32 %v647_v21  ;;  %v615_v41 = vmul.f32 1.442695, %v581_v38  ;;  %v617_v61 = vmul.f32 1.442695, %v582_v19 }
 0x1fd   :  { %867 = vpow2.f32 %v649_v37  ;;  %v512_v42 = vpop.permute.xlu1 %511 }
 0x1fe   :  { %869 = vpow2.f32 %v615_v41  ;;  %v583_v46 = vsub.f32 %v1158_v51, %v512_v42  ;;  %v584_v47 = vsub.f32 %v1168_v57, %v512_v42 }
 0x1ff   :  { %871 = vpow2.f32 %v617_v61 }
 0x200   :  { %v619_v35 = vmul.f32 1.442695, %v583_v46  ;;  %v621_v5 = vmul.f32 1.442695, %v584_v47 }
 0x201   :  { %v552_v10 = vpop.permute.xlu1 %551  ;;  %v557_v60 = vpop.permute.xlu0 %556 }
 0x202   :  { %873 = vpow2.f32 %v619_v35  ;;  %v599_v54 = vsub.f32 %v1171_v58, %v552_v10  ;;  %v600_v50 = vsub.f32 %v1174_v59, %v552_v10  ;;  %v601_v32 = vsub.f32 %v1189_v7, %v557_v60 }
 0x203   :  { %v858_v6 = vpop.eup %857  ;;  %875 = vpow2.f32 %v621_v5  ;;  %v602_v51 = vsub.f32 %v1195_v9, %v557_v60 }
 0x204   :  { %v860_v21 = vpop.eup %859  ;;  %v651_v23 = vmul.f32 1.442695, %v599_v54  ;;  %v653_v40 = vmul.f32 1.442695, %v600_v50  ;;  %v655_v59 = vmul.f32 1.442695, %v601_v32 }
 0x205   :  { %v517_v57 = vpop.permute.xlu1 %516  ;;  %v675_v43 = vadd.f32 %v860_v21, %v858_v6  ;;  %v657_v41 = vmul.f32 1.442695, %v602_v51 }
 0x206   :  { %877 = vpow2.f32 %v651_v23  ;;  %v585_v33 = vsub.f32 %v1181_v2, %v517_v57  ;;  %v586_v20 = vsub.f32 %v1184_v3, %v517_v57 }
 0x207   :  { %v862_v31 = vpop.eup %861  ;;  %879 = vpow2.f32 %v653_v40  ;;  %676 = vadd.xlane.f32.xlu1 %v675_v43 }
 0x208   :  { %v864_v58 = vpop.eup %863  ;;  %v623_v37 = vmul.f32 1.442695, %v585_v33  ;;  %v625_v38 = vmul.f32 1.442695, %v586_v20 }
 0x209   :  { %v866_v19 = vpop.eup %865  ;;  %v522_v61 = vpop.permute.xlu1 %521  ;;  %v699_v7 = vadd.f32 %v864_v58, %v862_v31 }
 0x20a   :  { %v868_v42 = vpop.eup %867  ;;  %881 = vpow2.f32 %v623_v37  ;;  %v587_v9 = vsub.f32 %v1192_v8, %v522_v61  ;;  %v588_v46 = vsub.f32 %v1200_v13, %v522_v61  ;;  %v567_v10 = vpop.permute.xlu0 %566 }
 0x20b   :  { %v870_v2 = vpop.eup %869  ;;  %883 = vpow2.f32 %v625_v38  ;;  %700 = vadd.xlane.f32.xlu0 %v699_v7  ;;  %v702_v3 = vadd.f32 %v868_v42, %v866_v19  ;;  %v605_v21 = vsub.f32 %v1216_v22, %v567_v10  ;;  %v606_v32 = vsub.f32 %v1222_v25, %v567_v10 }
 0x20c   :  { %v872_v47 = vpop.eup %871  ;;  %885 = vpow2.f32 %v655_v59  ;;  %v627_v35 = vmul.f32 1.442695, %v587_v9  ;;  %v629_v5 = vmul.f32 1.442695, %v588_v46 }
 0x20d   :  { %887 = vpow2.f32 %v657_v41  ;;  %703 = vadd.xlane.f32.xlu1 %v702_v3  ;;  %v562_v60 = vpop.permute.xlu1 %561  ;;  %v678_v54 = vadd.f32 %v872_v47, %v870_v2  ;;  %v663_v20 = vmul.f32 1.442695, %v605_v21  ;;  %v665_v59 = vmul.f32 1.442695, %v606_v32 }
 0x20e   :  { %889 = vpow2.f32 %v627_v35  ;;  %v603_v50 = vsub.f32 %v1203_v14, %v562_v60  ;;  %v604_v8 = vsub.f32 %v1206_v15, %v562_v60 }
 0x20f   :  { %v874_v6 = vpop.eup %873  ;;  %891 = vpow2.f32 %v629_v5  ;;  %679 = vadd.xlane.f32.xlu0 %v678_v54 }
 0x210   :  { %v876_v13 = vpop.eup %875  ;;  %v659_v23 = vmul.f32 1.442695, %v603_v50  ;;  %v661_v40 = vmul.f32 1.442695, %v604_v8 }
 0x211   :  { %v527_v51 = vpop.permute.xlu1 %526  ;;  %v681_v57 = vadd.f32 %v876_v13, %v874_v6  ;;  %v577_v22 = vpop.permute.xlu0 %576 }
 0x212   :  { %893 = vpow2.f32 %v659_v23  ;;  %v589_v43 = vsub.f32 %v1209_v18, %v527_v51  ;;  %v590_v33 = vsub.f32 %v1219_v24, %v527_v51  ;;  %v609_v24 = vsub.f32 %v1248_v52, %v577_v22 }
 0x213   :  { %v878_v14 = vpop.eup %877  ;;  %895 = vpow2.f32 %v661_v40  ;;  %682 = vadd.xlane.f32.xlu0 %v681_v57  ;;  %v610_v9 = vsub.f32 %v1254_v56, %v577_v22 }
 0x214   :  { %v880_v15 = vpop.eup %879  ;;  %v631_v31 = vmul.f32 1.442695, %v589_v43  ;;  %v633_v58 = vmul.f32 1.442695, %v590_v33  ;;  %v671_v5 = vmul.f32 1.442695, %v609_v24 }
 0x215   :  { %v532_v37 = vpop.permute.xlu1 %531  ;;  %v705_v38 = vadd.f32 %v880_v15, %v878_v14  ;;  %v673_v60 = vmul.f32 1.442695, %v610_v9 }
 0x216   :  { %897 = vpow2.f32 %v631_v31  ;;  %v591_v25 = vsub.f32 %v1227_v29, %v532_v37  ;;  %v592_v19 = vsub.f32 %v1235_v36, %v532_v37 }
 0x217   :  { %v882_v41 = vpop.eup %881  ;;  %899 = vpow2.f32 %v633_v58  ;;  %706 = vadd.xlane.f32.xlu0 %v705_v38 }
 0x218   :  { %v884_v18 = vpop.eup %883  ;;  %901 = vpow2.f32 %v663_v20  ;;  %v635_v61 = vmul.f32 1.442695, %v591_v25  ;;  %v637_v7 = vmul.f32 1.442695, %v592_v19  ;;  %v1809_v19 = vsub.f32 %v1329_v62, %v1332_v0 }
 0x219   :  { %v886_v42 = vpop.eup %885  ;;  %903 = vpow2.f32 %v665_v59  ;;  %v537_v46 = vpop.permute.xlu1 %536  ;;  %v684_v2 = vadd.f32 %v884_v18, %v882_v41  ;;  %v1810_v18 = vsub.f32 %v1342_v4, %v1356_v12  ;;  %v1814_v0 = vsub.f32 %v1398_v30, %v1419_v48 }
 0x21a   :  { %v888_v3 = vpop.eup %887  ;;  %905 = vpow2.f32 %v635_v61  ;;  %v593_v29 = vsub.f32 %v1243_v45, %v537_v46  ;;  %v594_v36 = vsub.f32 %v1251_v55, %v537_v46  ;;  %v451_v41 = vmul.f32 1.442695, %v1809_v19 }
 0x21b   :  { %v890_v47 = vpop.eup %889  ;;  %907 = vpow2.f32 %v637_v7  ;;  %685 = vadd.xlane.f32.xlu1 %v684_v2  ;;  %v708_v8 = vadd.f32 %v888_v3, %v886_v42  ;;  %v467_v24 = vmul.f32 1.442695, %v1810_v18  ;;  %v1811_v61 = vsub.f32 %v1337_v1, %v1353_v11  ;;  %v419_v1 = vld [vmem:[%s1778_s4] sm:$0xff] }
 0x21c   :  { %v892_v35 = vpop.eup %891  ;;  %v639_v52 = vmul.f32 1.442695, %v593_v29  ;;  %v641_v10 = vmul.f32 1.442695, %v594_v36  ;;  %v1812_v42 = vsub.f32 %v1366_v17, %v1388_v27  ;;  %v1813_v46 = vsub.f32 %v1361_v16, %v1385_v26  ;;  %v427_v26 = vld [vmem:[%s1778_s4 + $0x40] sm:$0xff]  ;;  %v428_v36 = vld [vmem:[%s1778_s4 + $0x48] sm:$0xff] }
 0x21d   :  { %v572_v54 = vpop.permute.xlu1 %571  ;;  %v687_v50 = vadd.f32 %v892_v35, %v890_v47  ;;  %v469_v7 = vmul.f32 1.442695, %v1811_v61  ;;  %v471_v4 = vmul.f32 1.442695, %v1814_v0  ;;  %v1815_v11 = vsub.f32 %v1393_v28, %v1416_v44  ;;  %v1817_v28 = vld [vmem:[#allocation2_spill] sm:$0xff]  ;;  %v1831_v61 = vld [vmem:[#allocation11_spill] sm:$0xff] }
 0x21e   :  { %909 = vpow2.f32 %v639_v52  ;;  %v607_v56 = vsub.f32 %v1232_v34, %v572_v54  ;;  %v608_v6 = vsub.f32 %v1238_v39, %v572_v54  ;;  %v453_v9 = vmul.f32 1.442695, %v1812_v42  ;;  %v1819_v54 = vld [vmem:[#allocation4_spill] sm:$0xff] }
 0x21f   :  { %v894_v13 = vpop.eup %893  ;;  %911 = vpow2.f32 %v641_v10  ;;  %688 = vadd.xlane.f32.xlu0 %v687_v50  ;;  %709 = vadd.xlane.f32.xlu1 %v708_v8  ;;  %v455_v62 = vmul.f32 1.442695, %v1813_v46  ;;  %v457_v17 = vmul.f32 1.442695, %v1815_v11  ;;  %v1816_v48 = vsub.f32 %v1424_v49, %v1447_v63  ;;  %v420_v49 = vld [vmem:[%s1778_s4 + $0x8] sm:$0xff]  ;;  %v1834_v11 = vld [vmem:[#allocation12_spill] sm:$0xff] }
 0x220   :  { %v896_v45 = vpop.eup %895  ;;  %913 = vpow2.f32 %v671_v5  ;;  %v667_v55 = vmul.f32 1.442695, %v607_v56  ;;  %v669_v21 = vmul.f32 1.442695, %v608_v6  ;;  %v1818_v44 = vsub.f32 %v1429_v53, %v1817_v28  ;;  %v1820_v53 = vld [vmem:[#allocation6_spill] sm:$0xff] }
 0x221   :  { %915 = vpow2.f32 %v673_v60  ;;  %v711_v23 = vadd.f32 %v896_v45, %v894_v13  ;;  %v473_v29 = vmul.f32 1.442695, %v1816_v48  ;;  %v1821_v50 = vsub.f32 %v1819_v54, %v1820_v53 }
 0x222   :  { %917 = vpow2.f32 %v667_v55  ;;  %v459_v47 = vmul.f32 1.442695, %v1818_v44  ;;  %v421_v55 = vld [vmem:[%s1778_s4 + $0x10] sm:$0xff] }
 0x223   :  { %v898_v40 = vpop.eup %897  ;;  %919 = vpow2.f32 %v669_v21  ;;  %712 = vadd.xlane.f32.xlu0 %v711_v23  ;;  %v475_v8 = vmul.f32 1.442695, %v1821_v50  ;;  %v1822_v23 = vld [vmem:[#allocation3_spill] sm:$0xff] }
 0x224   :  { %v900_v32 = vpop.eup %899  ;;  %921 = vpow2.f32 %v451_v41  ;;  %v422_v41 = vld [vmem:[%s1778_s4 + $0x18] sm:$0xff] }
 0x225   :  { %v902_v51 = vpop.eup %901  ;;  %v690_v57 = vadd.f32 %v900_v32, %v898_v40  ;;  %923 = vpow2.f32 %v467_v24  ;;  %v1823_v40 = vld [vmem:[#allocation5_spill] sm:$0xff] }
 0x226   :  { %v904_v34 = vpop.eup %903  ;;  %925 = vpow2.f32 %v469_v7  ;;  %v1824_v32 = vsub.f32 %v1822_v23, %v1823_v40  ;;  %v1832_v7 = vld [vmem:[#allocation13_spill] sm:$0xff] }
 0x227   :  { %v906_v43 = vpop.eup %905  ;;  %691 = vadd.xlane.f32.xlu1 %v690_v57  ;;  %v714_v14 = vadd.f32 %v904_v34, %v902_v51  ;;  %927 = vpow2.f32 %v453_v9  ;;  %v1833_v42 = vsub.f32 %v1831_v61, %v1832_v7 }
 0x228   :  { %v908_v39 = vpop.eup %907  ;;  %929 = vpow2.f32 %v455_v62  ;;  %v461_v51 = vmul.f32 1.442695, %v1824_v32  ;;  %v426_v32 = vld [vmem:[%s1778_s4 + $0x38] sm:$0xff] }
 0x229   :  { %v693_v33 = vadd.f32 %v908_v39, %v906_v43  ;;  %931 = vpow2.f32 %v471_v4  ;;  %v429_v39 = vld [vmem:[%s1778_s4 + $0x50] sm:$0xff]  ;;  %v465_v9 = vmul.f32 1.442695, %v1833_v42  ;;  %v430_v4 = vld [vmem:[%s1778_s4 + $0x58] sm:$0xff] }
 0x22a   :  { %933 = vpow2.f32 %v457_v17  ;;  %v1835_v17 = vld [vmem:[#allocation14_spill] sm:$0xff] }
 0x22b   :  { %v910_v15 = vpop.eup %909  ;;  %694 = vadd.xlane.f32.xlu0 %v693_v33  ;;  %715 = vadd.xlane.f32.xlu1 %v714_v14  ;;  %935 = vpow2.f32 %v473_v29  ;;  %v1825_v14 = vld [vmem:[#allocation7_spill] sm:$0xff] }
 0x22c   :  { %v912_v20 = vpop.eup %911  ;;  %937 = vpow2.f32 %v459_v47  ;;  %v431_v47 = vld [vmem:[%s1778_s4 + $0x60] sm:$0xff] }
 0x22d   :  { %v914_v31 = vpop.eup %913  ;;  %v696_v58 = vadd.f32 %v912_v20, %v910_v15  ;;  %939 = vpow2.f32 %v475_v8  ;;  %v1826_v15 = vld [vmem:[#allocation9_spill] sm:$0xff] }
 0x22e   :  { %v916_v59 = vpop.eup %915  ;;  %v1827_v20 = vsub.f32 %v1825_v14, %v1826_v15  ;;  %941 = vpow2.f32 %v461_v51  ;;  %v434_v14 = vld [vmem:[%s1778_s4 + $0x78] sm:$0xff]  ;;  %v433_v15 = vld [vmem:[%s1778_s4 + $0x70] sm:$0xff] }
 0x22f   :  { %v918_v22 = vpop.eup %917  ;;  %697 = vadd.xlane.f32.xlu1 %v696_v58  ;;  %v720_v25 = vadd.f32 %v916_v59, %v914_v31  ;;  %v1828_v58 = vld [vmem:[#allocation8_spill] sm:$0xff]  ;;  %v1829_v59 = vld [vmem:[#allocation10_spill] sm:$0xff] }
 0x230   :  { %v920_v37 = vpop.eup %919  ;;  %v477_v31 = vmul.f32 1.442695, %v1827_v20 }
 0x231   :  { %v717_v38 = vadd.f32 %v920_v37, %v918_v22  ;;  %v922_v12 = vpop.eup %921  ;;  %v1830_v22 = vsub.f32 %v1828_v58, %v1829_v59 }
 0x232   :  { %v483_v27 = vmul.f32 %v922_v12, %v419_v1  ;;  %v924_v2 = vpop.eup %923  ;;  %943 = vpow2.f32 %v477_v31  ;;  %v423_v12 = vld [vmem:[%s1778_s4 + $0x20] sm:$0xff] }
 0x233   :  { %718 = vadd.xlane.f32.xlu0 %v717_v38  ;;  %721 = vadd.xlane.f32.xlu1 %v720_v25  ;;  %v926_v30 = vpop.eup %925  ;;  %v491_v35 = vmul.f32 %v924_v2, %v427_v26  ;;  %v463_v37 = vmul.f32 1.442695, %v1830_v22  ;;  %v1838_v26 = vld [vmem:[#allocation16_spill] sm:$0xff] }
 0x234   :  { %v928_v5 = vpop.eup %927  ;;  %v492_v63 = vmul.f32 %v926_v30, %v428_v36 }
 0x235   :  { %v484_v6 = vmul.f32 %v928_v5, %v420_v49  ;;  %v930_v13 = vpop.eup %929  ;;  %945 = vpow2.f32 %v463_v37 }
 0x236   :  { %v485_v57 = vmul.f32 %v930_v13, %v421_v55  ;;  %v932_v34 = vpop.eup %931  ;;  %947 = vpow2.f32 %v465_v9 }
 0x237   :  { %v493_v38 = vmul.f32 %v932_v34, %v429_v39  ;;  %v934_v25 = vpop.eup %933 }
 0x238   :  { %v936_v24 = vpop.eup %935  ;;  %v486_v46 = vmul.f32 %v934_v25, %v422_v41 }
 0x239   :  { %v938_v62 = vpop.eup %937  ;;  %v494_v48 = vmul.f32 %v936_v24, %v430_v4 }
 0x23a   :  { %v487_v29 = vmul.f32 %v938_v62, %v423_v12  ;;  %v940_v36 = vpop.eup %939 }
 0x23b   :  { %v942_v49 = vpop.eup %941 }
 0x23f   :  { %v944_v54 = vpop.eup %943 }
 0x242   :  { %v946_v50 = vpop.eup %945 }
 0x290   :  { %v677_v16 = vpop.xlane.xlu1 %676 }
 0x291   :  { %v723_v3 = vadd.f32 %v677_v16, %v483_v27  ;;  %v1836_v27 = vsub.f32 %v1834_v11, %v1835_v17  ;;  %v1837_v16 = vld [vmem:[#allocation15_spill] sm:$0xff] }
 0x293   :  { %740 = vst.msk [vmem:[%s1778_s4] sm:$0xff] %vm21_vm0, %v723_v3  ;;  %v479_v2 = vmul.f32 1.442695, %v1836_v27  ;;  %v1839_v3 = vsub.f32 %v1837_v16, %v1838_v26 }
 0x294   :  { %v701_v52 = vpop.xlane.xlu0 %700 }
 0x295   :  { %v731_v10 = vadd.f32 %v701_v52, %v491_v35  ;;  %v481_v30 = vmul.f32 1.442695, %v1839_v3  ;;  %949 = vpow2.f32 %v479_v2  ;;  %v495_v52 = vmul.f32 %v940_v36, %v431_v47 }
 0x296   :  { %v704_v60 = vpop.xlane.xlu1 %703 }
 0x297   :  { %v732_v56 = vadd.f32 %v704_v60, %v492_v63  ;;  %748 = vst.msk [vmem:[%s1778_s4 + $0x40] sm:$0xff] %vm21_vm0, %v731_v10  ;;  %951 = vpow2.f32 %v481_v30  ;;  %v424_v10 = vld [vmem:[%s1778_s4 + $0x28] sm:$0xff] }
 0x298   :  { %v680_v45 = vpop.xlane.xlu0 %679  ;;  %v488_v53 = vmul.f32 %v942_v49, %v424_v10 }
 0x299   :  { %749 = vst.msk [vmem:[%s1778_s4 + $0x48] sm:$0xff] %vm21_vm0, %v732_v56  ;;  %v724_v21 = vadd.f32 %v680_v45, %v484_v6  ;;  %v432_v56 = vld [vmem:[%s1778_s4 + $0x68] sm:$0xff]  ;;  %v425_v6 = vld [vmem:[%s1778_s4 + $0x30] sm:$0xff] }
 0x29a   :  { %v496_v45 = vmul.f32 %v944_v54, %v432_v56  ;;  %v489_v55 = vmul.f32 %v946_v50, %v425_v6 }
 0x29b   :  { %741 = vst.msk [vmem:[%s1778_s4 + $0x8] sm:$0xff] %vm21_vm0, %v724_v21  ;;  %v948_v21 = vpop.eup %947 }
 0x29c   :  { %v683_v43 = vpop.xlane.xlu0 %682 }
 0x29d   :  { %v725_v33 = vadd.f32 %v683_v43, %v485_v57  ;;  %v490_v43 = vmul.f32 %v948_v21, %v426_v32 }
 0x29f   :  { %742 = vst.msk [vmem:[%s1778_s4 + $0x10] sm:$0xff] %vm21_vm0, %v725_v33 }
 0x2a0   :  { %v707_v19 = vpop.xlane.xlu0 %706 }
 0x2a1   :  { %v733_v18 = vadd.f32 %v707_v19, %v493_v38 }
 0x2a2   :  { %v950_v34 = vpop.eup %949 }
 0x2a3   :  { %750 = vst.msk [vmem:[%s1778_s4 + $0x50] sm:$0xff] %vm21_vm0, %v733_v18  ;;  %v497_v58 = vmul.f32 %v950_v34, %v433_v15 }
 0x2a4   :  { %v686_v0 = vpop.xlane.xlu1 %685  ;;  %v952_v39 = vpop.eup %951 }
 0x2a5   :  { %v726_v1 = vadd.f32 %v686_v0, %v486_v46  ;;  %v498_v31 = vmul.f32 %v952_v39, %v434_v14 }
 0x2a7   :  { %743 = vst.msk [vmem:[%s1778_s4 + $0x18] sm:$0xff] %vm21_vm0, %v726_v1 }
 0x2a8   :  { %v710_v28 = vpop.xlane.xlu1 %709  ;;  %v689_v44 = vpop.xlane.xlu0 %688 }
 0x2a9   :  { %v734_v35 = vadd.f32 %v710_v28, %v494_v48  ;;  %v727_v5 = vadd.f32 %v689_v44, %v487_v29 }
 0x2ab   :  { %751 = vst.msk [vmem:[%s1778_s4 + $0x58] sm:$0xff] %vm21_vm0, %v734_v35  ;;  %744 = vst.msk [vmem:[%s1778_s4 + $0x20] sm:$0xff] %vm21_vm0, %v727_v5 }
 0x2ac   :  { %v713_v63 = vpop.xlane.xlu0 %712 }
 0x2ad   :  { %v735_v60 = vadd.f32 %v713_v63, %v495_v52 }
 0x2af   :  { %752 = vst.msk [vmem:[%s1778_s4 + $0x60] sm:$0xff] %vm21_vm0, %v735_v60 }
 0x2b0   :  { %v692_v8 = vpop.xlane.xlu1 %691 }
 0x2b1   :  { %v728_v13 = vadd.f32 %v692_v8, %v488_v53 }
 0x2b3   :  { %745 = vst.msk [vmem:[%s1778_s4 + $0x28] sm:$0xff] %vm21_vm0, %v728_v13 }
 0x2b4   :  { %v716_v23 = vpop.xlane.xlu1 %715  ;;  %v695_v40 = vpop.xlane.xlu0 %694 }
 0x2b5   :  { %v736_v51 = vadd.f32 %v716_v23, %v496_v45  ;;  %v729_v57 = vadd.f32 %v695_v40, %v489_v55 }
 0x2b7   :  { %753 = vst.msk [vmem:[%s1778_s4 + $0x68] sm:$0xff] %vm21_vm0, %v736_v51  ;;  %746 = vst.msk [vmem:[%s1778_s4 + $0x30] sm:$0xff] %vm21_vm0, %v729_v57 }
 0x2b8   :  { %v698_v33 = vpop.xlane.xlu1 %697 }
 0x2b9   :  { %v730_v20 = vadd.f32 %v698_v33, %v490_v43 }
 0x2bb   :  { %747 = vst.msk [vmem:[%s1778_s4 + $0x38] sm:$0xff] %vm21_vm0, %v730_v20 }
 0x2bc   :  { %v722_v59 = vpop.xlane.xlu1 %721  ;;  %v719_v22 = vpop.xlane.xlu0 %718 }
 0x2bd   :  { %v738_v37 = vadd.f32 %v722_v59, %v498_v31  ;;  %v737_v38 = vadd.f32 %v719_v22, %v497_v58 }
 0x2bf   :  { %755 = vst.msk [vmem:[%s1778_s4 + $0x78] sm:$0xff] %vm21_vm0, %v738_v37  ;;  %754 = vst.msk [vmem:[%s1778_s4 + $0x70] sm:$0xff] %vm21_vm0, %v737_v38 }

// kernel: decoder_forward.3
= control target key start
LH: loop header
LB: loop body
LE: loop exit
PB: predicated region body
PF: predicated region fallthrough
CT: control target
= control target key end

     0   :  { %v6354_v1 = vmov 0   ;;  %vm177_vm0 = vcmask 523264   ;;  %v6352_v13 = vmov 0.0   ;;  %vm4819_vm4 = vmmov 0   ;;  %s6339_s4 = inlined_call_operand.vmem [shape: bf16[64,384], index: 4, kind: input, shape index: {}]   ;;  %s6340_s1 = inlined_call_operand.vmem [shape: bf16[128,64], index: 1, kind: input, shape index: {}]   ;;  %s6341_s5 = inlined_call_operand.vmem [shape: bf16[128,384], index: 5, kind: input, shape index: {}]   ;;  %s6342_s2 = inlined_call_operand.vmem [shape: bf16[16,128], index: 2, kind: input, shape index: {}]   ;;  %s6343_s6 = inlined_call_operand.vmem [shape: bf16[128,384], index: 6, kind: input, shape index: {}]   ;;  %s6344_s0 = inlined_call_operand.vmem [shape: s32[16,1], index: 0, kind: input, shape index: {}]   ;;  %s6345_s3 = inlined_call_operand.vmem [shape: f32[16,128], index: 3, kind: input, shape index: {}]   ;;  %s6346_s7 = inlined_call_operand.vmem [shape: f32[1,384], index: 7, kind: input, shape index: {}]   ;;  %s6347_s8 = inlined_call_operand.vmem [shape: f32[1,384], index: 8, kind: input, shape index: {}]   ;;  %s6348_s9 = inlined_call_operand.vmem [shape: f32[1,128], index: 9, kind: input, shape index: {}]   ;;  %s6349_s10 = inlined_call_operand.vmem [shape: f32[1,128], index: 10, kind: input, shape index: {}]   ;;  %s6350_s12 = inlined_call_operand.vmem [shape: bf16[128,128], index: 12, kind: output, shape index: {1}]   ;;  %s6351_s11 = inlined_call_operand.vmem [shape: f32[16,128], index: 11, kind: output, shape index: {0}]  }
   0x1   :  { %v4430_v0 = vld [vmem:[%s6339_s4 + $0x4c] ss:$12 sps:$4 sm:$0xff]   ;;  %234 = vmatprep.mubr.bf16.mxu0 %v6354_v1  ;;  %294 = vmatprep.mubr.bf16.mxu1 %v6354_v1  ;;  %v4432_v2 = vld [vmem:[%s6339_s4 + $0x48] ss:$12 sps:$4 sm:$0xff]   ;;  %v4435_v4 = vld [vmem:[%s6339_s4 + $0x30] ss:$12 sps:$4 sm:$0xff]  }
   0x2   :  { %4428 = vset.pattern.permute.xlu0 %v6354_v1  ;;  %4429 = vset.pattern.permute.xlu1 %v6354_v1  ;;  %v4433_v3 = vld [vmem:[%s6339_s4 + $0x34] ss:$12 sps:$4 sm:$0xff]   ;;  %v4436_v5 = vld [vmem:[%s6339_s4 + $0x1c] ss:$12 sps:$4 sm:$0xff]   ;;  %v4438_v6 = vld [vmem:[%s6339_s4 + $0x18] ss:$12 sps:$4 sm:$0xff]  }
   0x3   :  { %210 = vmatprep.subr.bf16.mxu0 %v4430_v0  ;;  %4417 = vmatprep.subr.bf16.mxu1 %v4430_v0  ;;  %v4439_v7 = vld [vmem:[%s6339_s4 + $0x4] ss:$12 sps:$4 sm:$0xff]   ;;  %v4441_v8 = vld [vmem:[%s6339_s4] ss:$12 sps:$4 sm:$0xff]   ;;  %v4948_v18 = vld [vmem:[%s6340_s1 + $0x38] sm:$0xff]  }
   0x4   :  { %211 = vmatpush1.bf16.msra.mxu0 %v4432_v2  ;;  %4421 = vmatpush1.bf16.msra.mxu1 %v4432_v2  ;;  %v4444_v9 = vld [vmem:[%s6339_s4 + $0x50] ss:$12 sps:$4 sm:$0xff]   ;;  %v4442_v10 = vld [vmem:[%s6340_s1] sm:$0xff]   ;;  %v4446_v15 = vld [vmem:[%s6340_s1 + $0x8] sm:$0xff]  }
   0x5   :  { %212 = vmatprep.subr.bf16.mxu0 %v4433_v3  ;;  %4418 = vmatprep.subr.bf16.mxu1 %v4433_v3  ;;  %v4922_v11 = vld [vmem:[%s6340_s1 + $0x30] sm:$0xff]   ;;  %v4445_v12 = vld [vmem:[%s6339_s4 + $0x38] ss:$12 sps:$4 sm:$0xff]   ;;  %v4448_v16 = vld [vmem:[%s6339_s4 + $0x20] ss:$12 sps:$4 sm:$0xff]  }
   0x6   :  { %v4454_v14 = vld [vmem:[%s6341_s5 + $0xb0] ss:$12 sps:$4 sm:$0xff]   ;;  %v4458_v17 = vld [vmem:[%s6341_s5 + $0x98] ss:$12 sps:$4 sm:$0xff]   ;;  %v4449_v19 = vld [vmem:[%s6339_s4 + $0x8] ss:$12 sps:$4 sm:$0xff]  }
   0x7   :  { %v4463_v20 = vld [vmem:[%s6341_s5 + $0x80] ss:$12 sps:$4 sm:$0xff]   ;;  %v4450_v22 = vld [vmem:[%s6340_s1 + $0x10] sm:$0xff]   ;;  %v4462_v27 = vld [vmem:[%s6341_s5 + $0x7c] ss:$12 sps:$4 sm:$0xff]  }
   0x8   :  { %213 = vmatpush1.bf16.msra.mxu0 %v4435_v4  ;;  %4422 = vmatpush1.bf16.msra.mxu1 %v4435_v4  ;;  %v4453_v21 = vld [vmem:[%s6341_s5 + $0xac] ss:$12 sps:$4 sm:$0xff]   ;;  %v4451_v23 = vld [vmem:[%s6341_s5 + $0xa8] ss:$12 sps:$4 sm:$0xff]   ;;  %v4455_v26 = vld [vmem:[%s6341_s5 + $0x90] ss:$12 sps:$4 sm:$0xff]  }
   0x9   :  { %214 = vmatprep.subr.bf16.mxu0 %v4436_v5  ;;  %4419 = vmatprep.subr.bf16.mxu1 %v4436_v5  ;;  %v4457_v24 = vld [vmem:[%s6341_s5 + $0x94] ss:$12 sps:$4 sm:$0xff]   ;;  %v4473_v28 = vld [vmem:[%s6341_s5 + $0x50] ss:$12 sps:$4 sm:$0xff]   ;;  %v4460_v30 = vld [vmem:[%s6341_s5 + $0x78] ss:$12 sps:$4 sm:$0xff]  }
   0xa   :  { %v4467_v25 = vld [vmem:[%s6341_s5 + $0x68] ss:$12 sps:$4 sm:$0xff]   ;;  %v4459_v29 = vld [vmem:[%s6340_s1 + $0x18] sm:$0xff]   ;;  %v4466_v31 = vld [vmem:[%s6341_s5 + $0x64] ss:$12 sps:$4 sm:$0xff]  }
   0xb   :  { %v4468_v32 = vld [vmem:[%s6340_s1 + $0x20] sm:$0xff]   ;;  %v4472_v35 = vld [vmem:[%s6341_s5 + $0x4c] ss:$12 sps:$4 sm:$0xff]   ;;  %v4470_v37 = vld [vmem:[%s6341_s5 + $0x48] ss:$12 sps:$4 sm:$0xff]  }
   0xc   :  { %215 = vmatpush1.bf16.msra.mxu0 %v4438_v6  ;;  %4423 = vmatpush1.bf16.msra.mxu1 %v4438_v6  ;;  %v4477_v33 = vld [vmem:[%s6341_s5 + $0x38] ss:$12 sps:$4 sm:$0xff]   ;;  %v4464_v34 = vld [vmem:[%s6341_s5 + $0x60] ss:$12 sps:$4 sm:$0xff]   ;;  %v4474_v40 = vld [vmem:[%s6341_s5 + $0x30] ss:$12 sps:$4 sm:$0xff]  }
   0xd   :  { %216 = vmatprep.subr.bf16.mxu0 %v4439_v7  ;;  %4420 = vmatprep.subr.bf16.mxu1 %v4439_v7  ;;  %v4469_v36 = vld [vmem:[%s6340_s1 + $0x28] sm:$0xff]   ;;  %v4476_v38 = vld [vmem:[%s6341_s5 + $0x34] ss:$12 sps:$4 sm:$0xff]   ;;  %v4478_v43 = vld [vmem:[%s6341_s5 + $0x18] ss:$12 sps:$4 sm:$0xff]  }
   0xe   :  { %v4481_v39 = vld [vmem:[%s6341_s5 + $0x20] ss:$12 sps:$4 sm:$0xff]   ;;  %v4480_v41 = vld [vmem:[%s6341_s5 + $0x1c] ss:$12 sps:$4 sm:$0xff]   ;;  %v4484_v44 = vld [vmem:[%s6341_s5 + $0x4] ss:$12 sps:$4 sm:$0xff]  }
   0xf   :  { %v4485_v42 = vld [vmem:[%s6341_s5 + $0x8] ss:$12 sps:$4 sm:$0xff]   ;;  %v5056_v45 = vld [vmem:[%s6344_s0] sm:$0xff]  ;;  %v5075_v48 = vld [vmem:[%s6343_s6 + $0xac] ss:$12 sps:$4 sm:$0xff]  }
  0x10   :  { %217 = vmatpush1.bf16.msra.mxu0 %v4441_v8  ;;  %4424 = vmatpush1.bf16.msra.mxu1 %v4441_v8  ;;  %v5061_v46 = vld [vmem:[%s6344_s0 + $0x8] sm:$0xff]  ;;  %vm1054_vm1 = vcmp.gt.s32.totalorder %v5056_v45, 0  ;;  %vm1810_vm3 = vcmp.gt.s32.totalorder %v5056_v45, 2  ;;  %v4486_v52 = vld [vmem:[%s6342_s2] sm:$0xff]   ;;  %v4511_v54 = vld [vmem:[%s6343_s6 + $0xb0] ss:$12 sps:$4 sm:$0xff]  }
  0x11   :  { %4213 = vmatprep.subr.bf16.mxu1 %v4444_v9  ;;  %4237 = vmatprep.subr.bf16.mxu0 %v6352_v13  ;;  %v4482_v47 = vld [vmem:[%s6341_s5] ss:$12 sps:$4 sm:$0xff]   ;;  %vm1055_vm2 = vcmp.gt.s32.totalorder %v5061_v46, 0  ;;  %v1056_v49 = vsel %vm1054_vm1, 1, %v6354_v1  ;;  %v1812_v51 = vsel %vm1810_vm3, 1, %v6354_v1  ;;  %vm2182_vm5 = vcmp.gt.s32.totalorder %v5056_v45, 3 }
  0x12   :  { %v1057_v50 = vsel %vm1055_vm2, 1, %v6354_v1  ;;  %v5089_v53 = vld [vmem:[%s6343_s6 + $0xa8] ss:$12 sps:$4 sm:$0xff]   ;;  %1059 = vperm.xlu0 %4428, %v1056_v49   ;;  %v5104_v56 = vld [vmem:[%s6343_s6 + $0x90] ss:$12 sps:$4 sm:$0xff]   ;;  %v2184_v62 = vsel %vm2182_vm5, 1, %v6354_v1 }
  0x13   :  { %3760 = vmatmul.mubr.msk.bf16.vlgmr.msra.gmra.mxu0 %vm177_vm0, %v4442_v10  ;;  %3766 = vmatmul.mubr.msk.bf16.vlgmr.msra.gmra.mxu1 %vm177_vm0, %v4922_v11  ;;  %6377 = vst [vmem:[#allocation3_spill] sm:$0xff] %v5089_v53  ;;  %v5098_v55 = vld [vmem:[%s6343_s6 + $0x94] ss:$12 sps:$4 sm:$0xff]   ;;  %6379 = vst [vmem:[#allocation5_spill] sm:$0xff] %v5104_v56  ;;  %v4512_v57 = vld [vmem:[%s6343_s6 + $0x98] ss:$12 sps:$4 sm:$0xff]  }
  0x14   :  { %4214 = vmatpush3.bf16.msra.mxu1 %v4444_v9  ;;  %244 = vmatprep.mubr.bf16.mxu0 %v6354_v1  ;;  %6378 = vst [vmem:[#allocation4_spill] sm:$0xff] %v5098_v55  ;;  %v5112_v58 = vld [vmem:[%s6343_s6 + $0x7c] ss:$12 sps:$4 sm:$0xff]   ;;  %v5121_v59 = vld [vmem:[%s6343_s6 + $0x78] ss:$12 sps:$4 sm:$0xff]   ;;  %vm2554_vm6 = vcmp.gt.s32.totalorder %v5056_v45, 4 }
  0x15   :  { %4215 = vmatprep.subr.bf16.mxu1 %v4445_v12  ;;  %304 = vmatprep.mubr.bf16.mxu1 %v6354_v1  ;;  %6380 = vst [vmem:[#allocation6_spill] sm:$0xff] %v5112_v58  ;;  %6381 = vst [vmem:[#allocation7_spill] sm:$0xff] %v5121_v59  ;;  %v4513_v60 = vld [vmem:[%s6343_s6 + $0x80] ss:$12 sps:$4 sm:$0xff]   ;;  %v5132_v61 = vld [vmem:[%s6343_s6 + $0x64] ss:$12 sps:$4 sm:$0xff]  }
  0x16   :  { %4238 = vmatpush3.bf16.msra.mxu0 %v4454_v14  ;;  %1062 = vperm.xlu0 %4428, %v1057_v50   ;;  %6382 = vst [vmem:[#allocation8_spill] sm:$0xff] %v5132_v61  ;;  %v5141_v63 = vld [vmem:[%s6343_s6 + $0x60] ss:$12 sps:$4 sm:$0xff]   ;;  %v4514_v0 = vld [vmem:[%s6343_s6 + $0x68] ss:$12 sps:$4 sm:$0xff]   ;;  %v2556_v9 = vsel %vm2554_vm6, 1, %v6354_v1 }
  0x17   :  { %4239 = vmatprep.subr.bf16.mxu0 %v6352_v13  ;;  %6383 = vst [vmem:[#allocation9_spill] sm:$0xff] %v5141_v63  ;;  %v5149_v2 = vld [vmem:[%s6343_s6 + $0x4c] ss:$12 sps:$4 sm:$0xff]   ;;  %v5157_v3 = vld [vmem:[%s6343_s6 + $0x48] ss:$12 sps:$4 sm:$0xff]   ;;  %vm2926_vm7 = vcmp.gt.s32.totalorder %v5056_v45, 5 }
  0x18   :  { %4216 = vmatpush3.bf16.msra.mxu1 %v4445_v12  ;;  %6384 = vst [vmem:[#allocation10_spill] sm:$0xff] %v5149_v2  ;;  %6385 = vst [vmem:[#allocation11_spill] sm:$0xff] %v5157_v3  ;;  %v4515_v4 = vld [vmem:[%s6343_s6 + $0x50] ss:$12 sps:$4 sm:$0xff]   ;;  %v5165_v5 = vld [vmem:[%s6343_s6 + $0x34] ss:$12 sps:$4 sm:$0xff]  }
  0x19   :  { %4217 = vmatprep.subr.bf16.mxu1 %v4448_v16  ;;  %6386 = vst [vmem:[#allocation12_spill] sm:$0xff] %v5165_v5  ;;  %v5173_v6 = vld [vmem:[%s6343_s6 + $0x30] ss:$12 sps:$4 sm:$0xff]   ;;  %v4516_v7 = vld [vmem:[%s6343_s6 + $0x38] ss:$12 sps:$4 sm:$0xff]   ;;  %v2928_v14 = vsel %vm2926_vm7, 1, %v6354_v1 }
  0x1a   :  { %4240 = vmatpush3.bf16.msra.mxu0 %v4458_v17  ;;  %1815 = vperm.xlu0 %4428, %v1812_v51   ;;  %6387 = vst [vmem:[#allocation13_spill] sm:$0xff] %v5173_v6  ;;  %v5181_v8 = vld [vmem:[%s6343_s6 + $0x1c] ss:$12 sps:$4 sm:$0xff]   ;;  %v4510_v12 = vld [vmem:[%s6343_s6 + $0x4] ss:$12 sps:$4 sm:$0xff]   ;;  %vm3298_vm8 = vcmp.gt.s32.totalorder %v5056_v45, 6 }
  0x1b   :  { %3761 = vmatmul.mubr.msk.bf16.gmra.mxu0 %vm177_vm0, %v4446_v15  ;;  %3767 = vmatmul.mubr.msk.bf16.gmra.mxu1 %vm177_vm0, %v4948_v18  ;;  %6388 = vst [vmem:[#allocation14_spill] sm:$0xff] %v5181_v8  ;;  %v5215_v17 = vld [vmem:[%s6345_s3 + $0x8] sm:$0xff]  ;;  %vm3671_vm9 = vcmp.gt.s32.totalorder %v5061_v46, 7  ;;  %vm1438_vm10 = vcmp.gt.s32.totalorder %v5056_v45, 1  ;;  %vm1439_vm11 = vcmp.gt.s32.totalorder %v5061_v46, 1  ;;  %vm1811_vm12 = vcmp.gt.s32.totalorder %v5061_v46, 2 }
  0x1c   :  { %4218 = vmatpush3.bf16.msra.mxu1 %v4448_v16  ;;  %254 = vmatprep.mubr.bf16.mxu0 %v6354_v1  ;;  %v5210_v16 = vld [vmem:[%s6345_s3] sm:$0xff]  ;;  %6391 = vst [vmem:[#allocation17_spill] sm:$0xff] %v5215_v17  ;;  %vm2183_vm13 = vcmp.gt.s32.totalorder %v5061_v46, 3  ;;  %vm2555_vm14 = vcmp.gt.s32.totalorder %v5061_v46, 4  ;;  %vm2927_vm15 = vcmp.gt.s32.totalorder %v5061_v46, 5  ;;  %vm3670_vm1 = vcmp.gt.s32.totalorder %v5056_v45, 7 }
  0x1d   :  { %4219 = vmatprep.subr.bf16.mxu1 %v4449_v19  ;;  %4221 = vmatprep.mubr.msk.bf16.mxu1 %vm177_vm0, %v4442_v10  ;;  %v5191_v10 = vld [vmem:[%s6343_s6 + $0x18] ss:$12 sps:$4 sm:$0xff]   ;;  %6390 = vst [vmem:[#allocation16_spill] sm:$0xff] %v5210_v16  ;;  %v4526_v51 = vld [vmem:[%s6343_s6 + $0x8] ss:$12 sps:$4 sm:$0xff]  }
  0x1e   :  { %4241 = vmatprep.subr.bf16.mxu0 %v6352_v13  ;;  %2187 = vperm.xlu0 %4428, %v2184_v62   ;;  %6389 = vst [vmem:[#allocation15_spill] sm:$0xff] %v5191_v10 }
  0x1f   :  { %4242 = vmatpush3.bf16.msra.mxu0 %v4463_v20  ;;  %v750_v20 = vpack.c.bf16 %v5215_v17, %v5210_v16 }
  0x20   :  { %4220 = vmatpush3.bf16.msra.mxu1 %v4449_v19  ;;  %4243 = vmatprep.subr.bf16.mxu0 %v6352_v13  ;;  %v3300_v19 = vsel %vm3298_vm8, 1, %v6354_v1 }
  0x21   :  { %645 = vmatprep.subr.bf16.mxu1 %v4453_v21  ;;  %v3673_v21 = vsel %vm3671_vm9, 1, %v6354_v1 }
  0x22   :  { %2559 = vperm.xlu0 %4428, %v2556_v9  }
  0x23   :  { %3762 = vmatmul.mubr.msk.bf16.gmra.mxu0 %vm177_vm0, %v4450_v22  ;;  %4222 = vmatmul.mubr.msk.bf16.vlgmr.msra.gmra.mxu1 %vm177_vm0, %v4446_v15  ;;  %v4508_v15 = vld [vmem:[%s6343_s6] ss:$12 sps:$4 sm:$0xff]  }
  0x24   :  { %646 = vmatpush1.bf16.msra.mxu1 %v4451_v23  ;;  %264 = vmatprep.mubr.bf16.mxu0 %v6354_v1  ;;  %v1441_v23 = vsel %vm1439_vm11, 1, %v6354_v1 }
  0x25   :  { %647 = vmatprep.subr.bf16.mxu1 %v4457_v24  ;;  %4225 = vmatprep.mubr.msk.bf16.mxu1 %vm177_vm0, %v4450_v22  ;;  %v1440_v22 = vsel %vm1438_vm10, 1, %v6354_v1  ;;  %v1813_v24 = vsel %vm1811_vm12, 1, %v6354_v1 }
  0x26   :  { %4244 = vmatpush3.bf16.msra.mxu0 %v4467_v25  ;;  %2931 = vperm.xlu0 %4428, %v2928_v14   ;;  %v2185_v25 = vsel %vm2183_vm13, 1, %v6354_v1 }
  0x27   :  { %4245 = vmatprep.subr.bf16.mxu0 %v6352_v13  ;;  %1443 = vperm.xlu1 %4429, %v1440_v22  }
  0x28   :  { %648 = vmatpush1.bf16.msra.mxu1 %v4455_v26  ;;  %v2557_v26 = vsel %vm2555_vm14, 1, %v6354_v1 }
  0x29   :  { %649 = vmatprep.subr.bf16.mxu1 %v4462_v27  ;;  %v2929_v27 = vsel %vm2927_vm15, 1, %v6354_v1 }
  0x2a   :  { %4246 = vmatpush3.bf16.msra.mxu0 %v4473_v28  ;;  %3303 = vperm.xlu0 %4428, %v3300_v19  }
  0x2b   :  { %3763 = vmatmul.mubr.msk.bf16.gmra.mxu0 %vm177_vm0, %v4459_v29  ;;  %4226 = vmatmul.mubr.msk.bf16.gmra.mxu1 %vm177_vm0, %v4459_v29  ;;  %v3672_v29 = vsel %vm3670_vm1, 1, %v6354_v1 }
  0x2c   :  { %650 = vmatpush1.bf16.msra.mxu1 %v4460_v30  ;;  %274 = vmatprep.mubr.bf16.mxu0 %v6354_v1  ;;  %v4519_v30 = vld [vmem:[%s6343_s6 + $0xb0] ss:$12 sps:$4 sm:$0xff]  }
  0x2d   :  { %651 = vmatprep.subr.bf16.mxu1 %v4466_v31  ;;  %4229 = vmatprep.mubr.msk.bf16.mxu1 %vm177_vm0, %v4468_v32  ;;  %v4520_v31 = vld [vmem:[%s6343_s6 + $0x98] ss:$12 sps:$4 sm:$0xff]  }
  0x2e   :  { %4247 = vmatprep.subr.bf16.mxu0 %v6352_v13  ;;  %3678 = vperm.xlu0 %4428, %v3673_v21  }
  0x2f   :  { %4248 = vmatpush3.bf16.msra.mxu0 %v4477_v33  ;;  %1446 = vperm.xlu1 %4429, %v1441_v23   ;;  %v4522_v33 = vld [vmem:[%s6343_s6 + $0x68] ss:$12 sps:$4 sm:$0xff]  }
  0x30   :  { %652 = vmatpush1.bf16.msra.mxu1 %v4464_v34  ;;  %4249 = vmatprep.subr.bf16.mxu0 %v6352_v13  ;;  %v4523_v34 = vld [vmem:[%s6343_s6 + $0x50] ss:$12 sps:$4 sm:$0xff]  }
  0x31   :  { %653 = vmatprep.subr.bf16.mxu1 %v4472_v35 }
  0x33   :  { %3764 = vmatmul.mubr.msk.bf16.gmra.mxu0 %vm177_vm0, %v4468_v32  ;;  %4230 = vmatmul.mubr.msk.bf16.gmra.mxu1 %vm177_vm0, %v4469_v36  ;;  %v4521_v32 = vld [vmem:[%s6343_s6 + $0x80] ss:$12 sps:$4 sm:$0xff]  }
  0x34   :  { %654 = vmatpush1.bf16.msra.mxu1 %v4470_v37  ;;  %284 = vmatprep.mubr.bf16.mxu0 %v6354_v1 }
  0x35   :  { %655 = vmatprep.subr.bf16.mxu1 %v4476_v38  ;;  %4233 = vmatprep.mubr.msk.bf16.mxu1 %vm177_vm0, %v4922_v11  ;;  %v4517_v11 = vld [vmem:[%s6343_s6 + $0x20] ss:$12 sps:$4 sm:$0xff]  }
  0x36   :  { %4250 = vmatpush3.bf16.msra.mxu0 %v4481_v39  ;;  %1818 = vperm.xlu1 %4429, %v1813_v24   ;;  %v4524_v39 = vld [vmem:[%s6343_s6 + $0x38] ss:$12 sps:$4 sm:$0xff]  }
  0x37   :  { %4251 = vmatprep.subr.bf16.mxu0 %v6352_v13 }
  0x38   :  { %656 = vmatpush1.bf16.msra.mxu1 %v4474_v40 }
  0x39   :  { %657 = vmatprep.subr.bf16.mxu1 %v4480_v41 }
  0x3a   :  { %4252 = vmatpush3.bf16.msra.mxu0 %v4485_v42  ;;  %2190 = vperm.xlu1 %4429, %v2185_v25   ;;  %v496_v25 = vlaneseq }
  0x3b   :  { %3765 = vmatmul.mubr.msk.bf16.gmra.mxu0 %vm177_vm0, %v4469_v36  ;;  %4234 = vmatmul.mubr.msk.bf16.gmra.mxu1 %vm177_vm0, %v4948_v18  ;;  %v4518_v18 = vld [vmem:[%s6343_s6 + $0x8] ss:$12 sps:$4 sm:$0xff]   ;;  %vm3299_vm0 = vcmp.gt.s32.totalorder %v5061_v46, 6 }
  0x3c   :  { %658 = vmatpush1.bf16.msra.mxu1 %v4478_v43  ;;  %677 = vmatprep.mubr.bf16.mxu1 %v6354_v1  ;;  %v3301_v28 = vsel %vm3299_vm0, 1, %v6354_v1 }
  0x3d   :  { %659 = vmatprep.subr.bf16.mxu1 %v4484_v44  ;;  %4253 = vmatprep.mubr.msk.bf16.mxu0 %vm4819_vm4, %v6352_v13  ;;  %v4525_v44 = vld [vmem:[%s6343_s6 + $0x20] ss:$12 sps:$4 sm:$0xff]  }
  0x3e   :  { %4257 = vmatprep.subr.bf16.mxu0 %v6352_v13  ;;  %2562 = vperm.xlu1 %4429, %v2557_v26  }
  0x40   :  { %660 = vmatpush1.bf16.msra.mxu1 %v4482_v47 }
  0x41   :  { %928 = vmatprep.subr.bf16.mxu1 %v5075_v48 }
  0x42   :  { %2934 = vperm.xlu1 %4429, %v2929_v27  }
  0x43   :  { %678 = vmatmul.mubr.bf16.vlgmr.msra.gmra.mxu1 %v4486_v52  ;;  %4254 = vmatmul.mubr.bf16.vlgmr.msra.gmra.mxu0 %v4486_v52 }
  0x44   :  { %929 = vmatpush1.bf16.msra.mxu1 %v5089_v53  ;;  %4258 = vmatpush3.bf16.msra.mxu0 %v4511_v54 }
  0x45   :  { %930 = vmatprep.subr.bf16.mxu1 %v5098_v55  ;;  %960 = vmatprep.mubr.bf16.mxu1 %v6354_v1 }
  0x46   :  { %4259 = vmatprep.subr.bf16.mxu0 %v6352_v13  ;;  %4273 = vmatprep.mubr.msk.bf16.mxu0 %vm4819_vm4, %v6352_v13 }
  0x47   :  { %3306 = vperm.xlu1 %4429, %v3301_v28  }
  0x48   :  { %931 = vmatpush1.bf16.msra.mxu1 %v5104_v56  ;;  %4260 = vmatpush3.bf16.msra.mxu0 %v4512_v57 }
  0x49   :  { %932 = vmatprep.subr.bf16.mxu1 %v5112_v58  ;;  %4261 = vmatprep.subr.bf16.mxu0 %v6352_v13 }
  0x4b   :  { %3675 = vperm.xlu1 %4429, %v3672_v29  }
  0x4c   :  { %933 = vmatpush1.bf16.msra.mxu1 %v5121_v59  ;;  %4262 = vmatpush3.bf16.msra.mxu0 %v4513_v60 }
  0x4d   :  { %934 = vmatprep.subr.bf16.mxu1 %v5132_v61  ;;  %4263 = vmatprep.subr.bf16.mxu0 %v6352_v13 }
  0x50   :  { %935 = vmatpush1.bf16.msra.mxu1 %v5141_v63  ;;  %4264 = vmatpush3.bf16.msra.mxu0 %v4514_v0 }
  0x51   :  { %936 = vmatprep.subr.bf16.mxu1 %v5149_v2  ;;  %4265 = vmatprep.subr.bf16.mxu0 %v6352_v13 }
  0x54   :  { %937 = vmatpush1.bf16.msra.mxu1 %v5157_v3  ;;  %4266 = vmatpush3.bf16.msra.mxu0 %v4515_v4 }
  0x55   :  { %938 = vmatprep.subr.bf16.mxu1 %v5165_v5  ;;  %4267 = vmatprep.subr.bf16.mxu0 %v6352_v13 }
  0x58   :  { %939 = vmatpush1.bf16.msra.mxu1 %v5173_v6  ;;  %4268 = vmatpush3.bf16.msra.mxu0 %v4516_v7 }
  0x59   :  { %940 = vmatprep.subr.bf16.mxu1 %v5181_v8  ;;  %4269 = vmatprep.subr.bf16.mxu0 %v6352_v13 }
  0x5c   :  { %941 = vmatpush1.bf16.msra.mxu1 %v5191_v10  ;;  %4270 = vmatpush3.bf16.msra.mxu0 %v4517_v11 }
  0x5d   :  { %942 = vmatprep.subr.bf16.mxu1 %v4510_v12  ;;  %4271 = vmatprep.subr.bf16.mxu0 %v6352_v13 }
  0x60   :  { %943 = vmatpush1.bf16.msra.mxu1 %v4508_v15  ;;  %4272 = vmatpush3.bf16.msra.mxu0 %v4518_v18 }
  0x61   :  { %1312 = vmatprep.subr.bf16.mxu1 %v5075_v48  ;;  %4277 = vmatprep.subr.bf16.mxu0 %v6352_v13 }
  0x63   :  { %961 = vmatmul.mubr.bf16.vlgmr.msra.gmra.mxu1 %v750_v20  ;;  %4274 = vmatmul.mubr.bf16.vlgmr.msra.gmra.mxu0 %v750_v20 }
  0x64   :  { %1313 = vmatpush1.bf16.msra.mxu1 %v5089_v53  ;;  %1344 = vmatprep.mubr.bf16.mxu1 %v6354_v1  ;;  %v494_v1 = vld [vmem:[%s6346_s7] sm:$0x7] }
  0x65   :  { %1314 = vmatprep.subr.bf16.mxu1 %v5098_v55  ;;  %4293 = vmatprep.mubr.msk.bf16.mxu0 %vm4819_vm4, %v6352_v13 }
  0x66   :  { %4278 = vmatpush3.bf16.msra.mxu0 %v4519_v30  ;;  %v497_v30 = vshrl.u32 %v496_v25, 7 }
  0x67   :  { %4279 = vmatprep.subr.bf16.mxu0 %v6352_v13 }
  0x68   :  { %1315 = vmatpush1.bf16.msra.mxu1 %v5104_v56 }
  0x69   :  { %1316 = vmatprep.subr.bf16.mxu1 %v5112_v58 }
  0x6a   :  { %4280 = vmatpush3.bf16.msra.mxu0 %v4520_v31 }
  0x6b   :  { %4281 = vmatprep.subr.bf16.mxu0 %v6352_v13 }
  0x6c   :  { %1317 = vmatpush1.bf16.msra.mxu1 %v5121_v59 }
  0x6d   :  { %1318 = vmatprep.subr.bf16.mxu1 %v5132_v61 }
  0x6e   :  { %4282 = vmatpush3.bf16.msra.mxu0 %v4521_v32 }
  0x6f   :  { %4283 = vmatprep.subr.bf16.mxu0 %v6352_v13 }
  0x70   :  { %1319 = vmatpush1.bf16.msra.mxu1 %v5141_v63 }
  0x71   :  { %1320 = vmatprep.subr.bf16.mxu1 %v5149_v2 }
  0x72   :  { %4284 = vmatpush3.bf16.msra.mxu0 %v4522_v33 }
  0x73   :  { %4285 = vmatprep.subr.bf16.mxu0 %v6352_v13 }
  0x74   :  { %1321 = vmatpush1.bf16.msra.mxu1 %v5157_v3 }
  0x75   :  { %1322 = vmatprep.subr.bf16.mxu1 %v5165_v5 }
  0x76   :  { %4286 = vmatpush3.bf16.msra.mxu0 %v4523_v34 }
  0x77   :  { %4287 = vmatprep.subr.bf16.mxu0 %v6352_v13 }
  0x78   :  { %1323 = vmatpush1.bf16.msra.mxu1 %v5173_v6 }
  0x79   :  { %1324 = vmatprep.subr.bf16.mxu1 %v5181_v8 }
  0x7a   :  { %4288 = vmatpush3.bf16.msra.mxu0 %v4524_v39  ;;  %v5339_v39 = vsub.s32 0, %v497_v30 }
  0x7b   :  { %4289 = vmatprep.subr.bf16.mxu0 %v6352_v13 }
  0x7c   :  { %1325 = vmatpush1.bf16.msra.mxu1 %v5191_v10  ;;  %v5346_v10 = vsub.s32 1, %v497_v30  ;;  %v499_v25 = vrot.slane %v494_v1, %v5339_v39 }
  0x7d   :  { %1326 = vmatprep.subr.bf16.mxu1 %v4510_v12 }
  0x7e   :  { %4290 = vmatpush3.bf16.msra.mxu0 %v4525_v44  ;;  %v5341_v44 = vsub.s32 2, %v497_v30  ;;  %6396 = vst [vmem:[#allocation22_spill] sm:$0xff] %v5346_v10  ;;  %v503_v63 = vrot.slane %v494_v1, %v5346_v10 }
  0x7f   :  { %4291 = vmatprep.subr.bf16.mxu0 %v6352_v13 }
  0x80   :  { %1327 = vmatpush1.bf16.msra.mxu1 %v4508_v15  ;;  %6395 = vst [vmem:[#allocation21_spill] sm:$0xff] %v5341_v44  ;;  %v507_v5 = vrot.slane %v494_v1, %v5341_v44 }
  0x81   :  { %1684 = vmatprep.subr.bf16.mxu1 %v5075_v48 }
  0x82   :  { %4292 = vmatpush3.bf16.msra.mxu0 %v4526_v51 }
  0x83   :  { %4297 = vmatprep.subr.bf16.mxu0 %v6352_v13 }
  0xd3   :  { %v5281_v35 = vpop.f32.mrf.mxu0  ;;  %v5283_v36 = vpop.f32.mrf.mxu1 }
  0xd5   :  { %v5286_v37 = vpop.f32.mrf.mxu0  ;;  %v5288_v38 = vpop.f32.mrf.mxu1 }
  0xd6   :  { %6392 = vst [vmem:[#allocation18_spill] sm:$0xff] %v5286_v37 }
  0xd7   :  { %v5293_v40 = vpop.f32.mrf.mxu0  ;;  %v5295_v41 = vpop.f32.mrf.mxu1 }
  0xd8   :  { %6393 = vst [vmem:[#allocation19_spill] sm:$0xff] %v5293_v40 }
  0xd9   :  { %v5298_v42 = vpop.f32.mrf.mxu0  ;;  %v5300_v43 = vpop.f32.mrf.mxu1 }
  0xda   :  { %6394 = vst [vmem:[#allocation20_spill] sm:$0xff] %v5298_v42 }
  0xdb   :  { %v5305_v45 = vpop.f32.mrf.mxu0  ;;  %v5307_v46 = vpop.f32.mrf.mxu1 }
  0xdd   :  { %v5310_v47 = vpop.f32.mrf.mxu0  ;;  %v5312_v48 = vpop.f32.mrf.mxu1 }
  0xdf   :  { %v5314_v49 = vpop.f32.mrf.mxu0  ;;  %v5316_v50 = vpop.f32.mrf.mxu1 }
  0xe1   :  { %v5322_v52 = vpop.f32.mrf.mxu0  ;;  %v5324_v54 = vpop.f32.mrf.mxu1 }
  0xe3   :  { %v256_v57 = vpop.f32.mrf.mxu0  ;;  %v4223_v60 = vpop.f32.mrf.mxu1 }
  0xe5   :  { %v258_v62 = vpop.f32.mrf.mxu0  ;;  %v349_v0 = vpop.f32.mrf.mxu1 }
  0xe7   :  { %v5327_v4 = vpop.f32.mrf.mxu0  ;;  %v5329_v7 = vpop.f32.mrf.mxu1 }
  0xe9   :  { %v5331_v9 = vpop.f32.mrf.mxu0  ;;  %v352_v11 = vpop.f32.mrf.mxu1 }
  0xeb   :  { %v266_v12 = vpop.f32.mrf.mxu0  ;;  %v4227_v14 = vpop.f32.mrf.mxu1 }
  0xed   :  { %v268_v15 = vpop.f32.mrf.mxu0  ;;  %v365_v18 = vpop.f32.mrf.mxu1 }
  0xef   :  { %v270_v19 = vpop.f32.mrf.mxu0  ;;  %v4228_v20 = vpop.f32.mrf.mxu1 }
  0xf1   :  { %v272_v21 = vpop.f32.mrf.mxu0  ;;  %v368_v22 = vpop.f32.mrf.mxu1 }
  0xf3   :  { %v276_v23 = vpop.f32.mrf.mxu0  ;;  %v5333_v24 = vpop.f32.mrf.mxu1 }
  0xf5   :  { %v278_v26 = vpop.f32.mrf.mxu0  ;;  %v381_v27 = vpop.f32.mrf.mxu1 }
  0xf7   :  { %v280_v28 = vpop.f32.mrf.mxu0  ;;  %v5335_v29 = vpop.f32.mrf.mxu1 }
  0xf9   :  { %v282_v31 = vpop.f32.mrf.mxu0  ;;  %v384_v32 = vpop.f32.mrf.mxu1 }
  0xfb   :  { %v286_v33 = vpop.f32.mrf.mxu0  ;;  %v5337_v34 = vpop.f32.mrf.mxu1 }
  0xfd   :  { %v288_v51 = vpop.f32.mrf.mxu0  ;;  %v397_v13 = vpop.f32.mrf.mxu1 }
  0xff   :  { %v290_v8 = vpop.f32.mrf.mxu0  ;;  %v4236_v6 = vpop.f32.mrf.mxu1 }
 0x101   :  { %v292_v3 = vpop.f32.mrf.mxu0  ;;  %v400_v2 = vpop.f32.mrf.mxu1 }
 0x103   :  { %v679_v61 = vpop.f32.mrf.mxu1  ;;  %v722_v59 = vpop.f32.mrf.mxu0 }
 0x104   :  { %v680_v58 = vadd.f32 %v679_v61, %v499_v25  ;;  %v723_v56 = vadd.f32 %v722_v59, %v507_v5 }
 0x105   :  { %v681_v55 = vpop.f32.mrf.mxu1  ;;  %v4255_v53 = vpop.f32.mrf.mxu0 }
 0x106   :  { %v5351_v17 = vadd.f32 %v681_v55, %v503_v63  ;;  %v5353_v30 = vadd.f32 %v723_v56, %v349_v0  ;;  %v5356_v16 = vadd.f32 %v680_v58, %v5305_v45  ;;  %v5358_v44 = vadd.f32 %v4223_v60, %v723_v56 }
 0x107   :  { %v683_v42 = vpop.f32.mrf.mxu1  ;;  %v725_v37 = vpop.f32.mrf.mxu0  ;;  %v5360_v40 = vadd.f32 %v680_v58, %v256_v57  ;;  %v5362_v1 = vadd.f32 %v723_v56, %v365_v18  ;;  %v5364_v10 = vadd.f32 %v680_v58, %v266_v12  ;;  %v5378_v60 = vadd.f32 %v680_v58, %v276_v23 }
 0x108   :  { %6397 = vst [vmem:[#allocation23_spill] sm:$0xff] %v5356_v16  ;;  %v684_v59 = vadd.f32 %v683_v42, %v499_v25  ;;  %v726_v61 = vadd.f32 %v725_v37, %v507_v5  ;;  %v5368_v53 = vadd.f32 %v5351_v17, %v5310_v47  ;;  %v5371_v45 = vadd.f32 %v5351_v17, %v258_v62 }
 0x109   :  { %v685_v55 = vpop.f32.mrf.mxu1  ;;  %v4256_v0 = vpop.f32.mrf.mxu0  ;;  %v5373_v16 = vadd.f32 %v4227_v14, %v723_v56  ;;  %v5376_v57 = vadd.f32 %v5351_v17, %v268_v15  ;;  %6398 = vst [vmem:[#allocation24_spill] sm:$0xff] %v5378_v60  ;;  %v5405_v15 = vadd.f32 %v723_v56, %v381_v27  ;;  %v5432_v27 = vadd.f32 %v680_v58, %v5283_v36 }
 0x10a   :  { %v686_v12 = vadd.f32 %v685_v55, %v503_v63  ;;  %v5380_v18 = vadd.f32 %v726_v61, %v352_v11  ;;  %v5383_v5 = vadd.f32 %v684_v59, %v5314_v49  ;;  %v5386_v37 = vadd.f32 %v5329_v7, %v726_v61 }
 0x10b   :  { %v5389_v42 = vadd.f32 %v684_v59, %v5327_v4  ;;  %v5391_v47 = vadd.f32 %v726_v61, %v368_v22  ;;  %v5393_v62 = vadd.f32 %v684_v59, %v270_v19  ;;  %v5401_v11 = vadd.f32 %v4228_v20, %v726_v61  ;;  %6399 = vst [vmem:[#allocation25_spill] sm:$0xff] %v5405_v15 }
 0x10c   :  { %v5396_v14 = vadd.f32 %v686_v12, %v5322_v52  ;;  %v5399_v63 = vadd.f32 %v686_v12, %v5331_v9  ;;  %v5403_v49 = vadd.f32 %v686_v12, %v272_v21  ;;  %v5408_v7 = vadd.f32 %v5351_v17, %v278_v26  ;;  %6410 = vst [vmem:[#allocation36_spill] sm:$0xff] %v5432_v27 }
 0x10d   :  { %v5410_v4 = vadd.f32 %v684_v59, %v280_v28  ;;  %v5412_v22 = vadd.f32 %v726_v61, %v384_v32  ;;  %v5414_v19 = vadd.f32 %v686_v12, %v282_v31  ;;  %v5416_v52 = vadd.f32 %v680_v58, %v286_v33 }
 0x10e   :  { %6400 = vst [vmem:[#allocation26_spill] sm:$0xff] %v5408_v7  ;;  %v5419_v9 = vadd.f32 %v5333_v24, %v723_v56  ;;  %v5422_v20 = vadd.f32 %v5351_v17, %v288_v51  ;;  %v5424_v21 = vadd.f32 %v684_v59, %v290_v8  ;;  %v5427_v23 = vadd.f32 %v5335_v29, %v726_v61 }
 0x10f   :  { %6401 = vst [vmem:[#allocation27_spill] sm:$0xff] %v5410_v4  ;;  %6402 = vst [vmem:[#allocation28_spill] sm:$0xff] %v5412_v22  ;;  %v5429_v26 = vadd.f32 %v686_v12, %v292_v3  ;;  %v5434_v28 = vadd.f32 %v723_v56, %v397_v13  ;;  %v5438_v31 = vadd.f32 %v5351_v17, %v5288_v38 }
 0x110   :  { %6403 = vst [vmem:[#allocation29_spill] sm:$0xff] %v5414_v19  ;;  %6404 = vst [vmem:[#allocation30_spill] sm:$0xff] %v5416_v52  ;;  %v5441_v24 = vadd.f32 %v684_v59, %v5295_v41  ;;  %v5443_v32 = vadd.f32 %v726_v61, %v400_v2  ;;  %v5446_v8 = vadd.f32 %v686_v12, %v5300_v43  ;;  %v783_v43 = vld [vmem:[%s6347_s8] sm:$0x7] }
 0x111   :  { %6405 = vst [vmem:[#allocation31_spill] sm:$0xff] %v5419_v9  ;;  %6406 = vst [vmem:[#allocation32_spill] sm:$0xff] %v5422_v20  ;;  %v5449_v3 = vadd.f32 %v680_v58, %v5307_v46  ;;  %v5452_v36 = vadd.f32 %v5337_v34, %v723_v56  ;;  %v5456_v13 = vadd.f32 %v5351_v17, %v5312_v48  ;;  %v6422_v34 = vld [vmem:[#allocation22_spill] sm:$0xff] }
 0x112   :  { %6407 = vst [vmem:[#allocation33_spill] sm:$0xff] %v5424_v21  ;;  %6408 = vst [vmem:[#allocation34_spill] sm:$0xff] %v5427_v23  ;;  %v5459_v38 = vadd.f32 %v684_v59, %v5316_v50  ;;  %v5461_v41 = vadd.f32 %v4236_v6, %v726_v61  ;;  %v5464_v2 = vadd.f32 %v686_v12, %v5324_v54 }
 0x113   :  { %6409 = vst [vmem:[#allocation35_spill] sm:$0xff] %v5429_v26  ;;  %6411 = vst [vmem:[#allocation37_spill] sm:$0xff] %v5434_v28  ;;  %v788_v46 = vrot.slane %v783_v43, %v5339_v39  ;;  %v744_v33 = vadd.f32 %v680_v58, %v5281_v35  ;;  %v792_v51 = vrot.slane %v783_v43, %v6422_v34 }
 0x114   :  { %6412 = vst [vmem:[#allocation38_spill] sm:$0xff] %v5438_v31  ;;  %6413 = vst [vmem:[#allocation39_spill] sm:$0xff] %v5441_v24 }
 0x115   :  { %6414 = vst [vmem:[#allocation40_spill] sm:$0xff] %v5443_v32  ;;  %6415 = vst [vmem:[#allocation41_spill] sm:$0xff] %v5446_v8  ;;  %v6425_v8 = vld [vmem:[#allocation20_spill] sm:$0xff] }
 0x116   :  { %6416 = vst [vmem:[#allocation42_spill] sm:$0xff] %v5449_v3  ;;  %6417 = vst [vmem:[#allocation43_spill] sm:$0xff] %v5452_v36  ;;  %v6424_v3 = vld [vmem:[#allocation18_spill] sm:$0xff] }
 0x117   :  { %6418 = vst [vmem:[#allocation44_spill] sm:$0xff] %v5456_v13  ;;  %6419 = vst [vmem:[#allocation45_spill] sm:$0xff] %v5459_v38  ;;  %v745_v32 = vadd.f32 %v5351_v17, %v6424_v3 }
 0x118   :  { %6420 = vst [vmem:[#allocation46_spill] sm:$0xff] %v5461_v41  ;;  %6421 = vst [vmem:[#allocation47_spill] sm:$0xff] %v5464_v2  ;;  %v6423_v41 = vld [vmem:[#allocation19_spill] sm:$0xff] }
 0x119   :  { %v747_v36 = vadd.f32 %v684_v59, %v6423_v41 }
 0x123   :  { %v962_v56 = vpop.f32.mrf.mxu1  ;;  %v1005_v29 = vpop.f32.mrf.mxu0 }
 0x124   :  { %v963_v48 = vadd.f32 %v962_v56, %v788_v46 }
 0x125   :  { %v964_v50 = vpop.f32.mrf.mxu1  ;;  %v4275_v25 = vpop.f32.mrf.mxu0 }
 0x126   :  { %v1012_v6 = vadd.f32 %v963_v48, %v744_v33  ;;  %v965_v0 = vadd.f32 %v964_v50, %v792_v51  ;;  %v748_v25 = vadd.f32 %v686_v12, %v6425_v8 }
 0x127   :  { %v966_v61 = vpop.f32.mrf.mxu1  ;;  %v1008_v55 = vpop.f32.mrf.mxu0 }
 0x128   :  { %v3825_v54 = vmul.f32 -1.442695, %v1012_v6  ;;  %v967_v2 = vadd.f32 %v966_v61, %v788_v46  ;;  %v1026_v56 = vadd.f32 %v965_v0, %v745_v32  ;;  %v6426_v46 = vld [vmem:[#allocation21_spill] sm:$0xff] }
 0x129   :  { %v968_v13 = vpop.f32.mrf.mxu1  ;;  %v4276_v38 = vpop.f32.mrf.mxu0  ;;  %v796_v17 = vrot.slane %v783_v43, %v6426_v46 }
 0x12a   :  { %4623 = vpow2.f32 %v3825_v54  ;;  %v1013_v58 = vadd.f32 %v967_v2, %v747_v36  ;;  %v969_v35 = vadd.f32 %v968_v13, %v792_v51  ;;  %v3827_v48 = vmul.f32 -1.442695, %v1026_v56 }
 0x12b   :  { %v1006_v13 = vadd.f32 %v1005_v29, %v796_v17  ;;  %v1009_v51 = vadd.f32 %v1008_v55, %v796_v17 }
 0x12c   :  { %v3826_v28 = vmul.f32 -1.442695, %v1013_v58  ;;  %v1027_v33 = vadd.f32 %v969_v35, %v748_v25  ;;  %v1060_v25 = vpop.permute.xlu0 %1059 }
 0x12d   :  { %vm1064_vm2 = vcmp.eq.s32.totalorder %v1060_v25, 1  ;;  %v6441_v25 = vld [vmem:[#allocation13_spill] sm:$0xff] }
 0x12e   :  { %4625 = vpow2.f32 %v3826_v28  ;;  %v3828_v6 = vmul.f32 -1.442695, %v1027_v33  ;;  %v6427_v33 = vld [vmem:[#allocation16_spill] sm:$0xff] }
 0x12f   :  { %4627 = vpow2.f32 %v3827_v48 }
 0x130   :  { %4629 = vpow2.f32 %v3828_v6 }
 0x137   :  { %v4624_v50 = vpop.eup %4623 }
 0x138   :  { %v1020_v59 = vadd.f32 1.0, %v4624_v50 }
 0x13a   :  { %4631 = vrcp.f32 %v1020_v59 }
 0x13b   :  { %v4626_v38 = vpop.eup %4625 }
 0x13c   :  { %v1021_v41 = vadd.f32 1.0, %v4626_v38  ;;  %v4628_v3 = vpop.eup %4627  ;;  %v6428_v38 = vld [vmem:[#allocation17_spill] sm:$0xff] }
 0x13d   :  { %v4630_v36 = vpop.eup %4629  ;;  %v1034_v32 = vadd.f32 1.0, %v4628_v3 }
 0x13e   :  { %4633 = vrcp.f32 %v1021_v41  ;;  %v1035_v12 = vadd.f32 1.0, %v4630_v36 }
 0x13f   :  { %4635 = vrcp.f32 %v1034_v32 }
 0x140   :  { %4637 = vrcp.f32 %v1035_v12  ;;  %v6430_v12 = vmov 0  }
 0x147   :  { %v4632_v2 = vpop.eup %4631 }
 0x148   :  { %v1040_v28 = vmul.f32 %v4632_v2, %v1006_v13  ;;  %v6429_v2 = vld [vmem:[#allocation3_spill] sm:$0xff] }
 0x14a   :  { %v1042_v8 = vadd.f32 %v1040_v28, %v5353_v30  ;;  %v6431_v28 = vld [vmem:[#allocation4_spill] sm:$0xff] }
 0x14b   :  { %v4634_v61 = vpop.eup %4633 }
 0x14c   :  { %4639 = vtanh.f32 %v1042_v8  ;;  %v1041_v54 = vmul.f32 %v4634_v61, %v1009_v51  ;;  %v4636_v58 = vpop.eup %4635  ;;  %v6432_v8 = vmov 0.0   ;;  %v6433_v51 = vld [vmem:[#allocation5_spill] sm:$0xff]  ;;  %v6434_v61 = vld [vmem:[#allocation6_spill] sm:$0xff] }
 0x14d   :  { %v4638_v43 = vpop.eup %4637  ;;  %v1046_v35 = vsub.f32 1.0, %v4636_v58  ;;  %v1050_v48 = vmul.f32 %v4636_v58, %v6427_v33  ;;  %v6437_v58 = vld [vmem:[#allocation9_spill] sm:$0xff] }
 0x14e   :  { %v1043_v0 = vadd.f32 %v1041_v54, %v5380_v18  ;;  %v1047_v50 = vsub.f32 1.0, %v4638_v43  ;;  %v1051_v41 = vmul.f32 %v4638_v43, %v6428_v38  ;;  %v1063_v18 = vpop.permute.xlu0 %1062  ;;  %v6435_v54 = vld [vmem:[#allocation7_spill] sm:$0xff]  ;;  %v6438_v43 = vld [vmem:[#allocation10_spill] sm:$0xff] }
 0x14f   :  { %vm1065_vm3 = vcmp.eq.s32.totalorder %v1063_v18, 1 }
 0x150   :  { %4641 = vtanh.f32 %v1043_v0  ;;  %v6436_v0 = vld [vmem:[#allocation8_spill] sm:$0xff] }
 0x159   :  { %v4640_v56 = vpop.eup %4639 }
 0x15a   :  { %v1048_v29 = vmul.f32 %v4640_v56, %v1046_v35  ;;  %v6439_v35 = vld [vmem:[#allocation11_spill] sm:$0xff]  ;;  %v6440_v56 = vld [vmem:[#allocation12_spill] sm:$0xff] }
 0x15c   :  { %v1052_v6 = vadd.f32 %v1050_v48, %v1048_v29  ;;  %v6442_v29 = vld [vmem:[#allocation14_spill] sm:$0xff]  ;;  %v5511_v48 = vpop.permute.xlu1 %1443 }
 0x15d   :  { %v4642_v30 = vpop.eup %4641  ;;  %vm1448_vm5 = vcmp.eq.s32.totalorder %v5511_v48, 1 }
 0x15e   :  { %v5480_v55 = vsel %vm1064_vm2, %v1052_v6, 0.0  ;;  %v1049_v59 = vmul.f32 %v4642_v30, %v1047_v50  ;;  %v5485_v3 = vsel %vm1064_vm2, %v1052_v6, %v6427_v33  ;;  %v6443_v33 = vld [vmem:[#allocation15_spill] sm:$0xff]  ;;  %v5515_v50 = vpop.permute.xlu0 %1815  ;;  %v4527_v30 = vld [vmem:[%s6343_s6 + $0xb0] ss:$12 sps:$4 sm:$0xff]  }
 0x15f   :  { %1068 = vadd.xlane.f32.xlu0 %v5480_v55  ;;  %vm1820_vm7 = vcmp.eq.s32.totalorder %v5515_v50, 1 }
 0x160   :  { %v1053_v17 = vadd.f32 %v1051_v41, %v1049_v59  ;;  %v5513_v6 = vpop.permute.xlu1 %1446 }
 0x161   :  { %vm1449_vm6 = vcmp.eq.s32.totalorder %v5513_v6, 1 }
 0x162   :  { %v5487_v36 = vsel %vm1065_vm3, %v1053_v17, 0.0  ;;  %v5490_v32 = vsel %vm1065_vm3, %v1053_v17, %v6428_v38  ;;  %v4528_v38 = vld [vmem:[%s6343_s6 + $0x98] ss:$12 sps:$4 sm:$0xff]   ;;  %v5526_v41 = vpop.permute.xlu0 %2187  ;;  %v4529_v17 = vld [vmem:[%s6343_s6 + $0x80] ss:$12 sps:$4 sm:$0xff]  }
 0x163   :  { %1070 = vadd.xlane.f32.xlu1 %v5487_v36  ;;  %v1134_v13 = vpack.c.bf16 %v5490_v32, %v5485_v3  ;;  %vm2192_vm9 = vcmp.eq.s32.totalorder %v5526_v41, 1 }
 0x164   :  { %v5520_v59 = vpop.permute.xlu1 %1818 }
 0x165   :  { %1345 = vmatmul.mubr.bf16.vlgmr.msra.gmra.mxu1 %v1134_v13  ;;  %4294 = vmatmul.mubr.bf16.vlgmr.msra.gmra.mxu0 %v1134_v13  ;;  %vm1821_vm8 = vcmp.eq.s32.totalorder %v5520_v59, 1 }
 0x166   :  { %1685 = vmatpush1.bf16.msra.mxu1 %v6429_v2  ;;  %1716 = vmatprep.mubr.bf16.mxu1 %v6430_v12  ;;  %v5534_v13 = vpop.permute.xlu0 %2559  ;;  %v4530_v2 = vld [vmem:[%s6343_s6 + $0x68] ss:$12 sps:$4 sm:$0xff]  }
 0x167   :  { %1686 = vmatprep.subr.bf16.mxu1 %v6431_v28  ;;  %4313 = vmatprep.mubr.msk.bf16.mxu0 %vm4819_vm4, %v6432_v8  ;;  %6444 = vst [vmem:[#allocation22_spill] sm:$0xff] %v5534_v13 }
 0x168   :  { %4298 = vmatpush3.bf16.msra.mxu0 %v4527_v30  ;;  %v5528_v18 = vpop.permute.xlu1 %2190 }
 0x169   :  { %4299 = vmatprep.subr.bf16.mxu0 %v6432_v8  ;;  %vm2193_vm10 = vcmp.eq.s32.totalorder %v5528_v18, 1 }
 0x16a   :  { %1687 = vmatpush1.bf16.msra.mxu1 %v6433_v51  ;;  %v4531_v51 = vld [vmem:[%s6343_s6 + $0x50] ss:$12 sps:$4 sm:$0xff]  }
 0x16b   :  { %1688 = vmatprep.subr.bf16.mxu1 %v6434_v61  ;;  %v5546_v61 = vpop.permute.xlu0 %2931 }
 0x16c   :  { %4300 = vmatpush3.bf16.msra.mxu0 %v4528_v38  ;;  %v5540_v28 = vpop.permute.xlu1 %2562  ;;  %6446 = vst [vmem:[#allocation18_spill] sm:$0xff] %v5546_v61 }
 0x16d   :  { %4301 = vmatprep.subr.bf16.mxu0 %v6432_v8  ;;  %6445 = vst [vmem:[#allocation19_spill] sm:$0xff] %v5540_v28 }
 0x16e   :  { %1689 = vmatpush1.bf16.msra.mxu1 %v6435_v54  ;;  %v4532_v54 = vld [vmem:[%s6343_s6 + $0x38] ss:$12 sps:$4 sm:$0xff]  }
 0x16f   :  { %1690 = vmatprep.subr.bf16.mxu1 %v6436_v0 }
 0x170   :  { %4302 = vmatpush3.bf16.msra.mxu0 %v4529_v17  ;;  %v5551_v0 = vpop.permute.xlu1 %2934 }
 0x171   :  { %4303 = vmatprep.subr.bf16.mxu0 %v6432_v8  ;;  %6447 = vst [vmem:[#allocation20_spill] sm:$0xff] %v5551_v0 }
 0x172   :  { %1691 = vmatpush1.bf16.msra.mxu1 %v6437_v58  ;;  %v4533_v58 = vld [vmem:[%s6343_s6 + $0x20] ss:$12 sps:$4 sm:$0xff]  }
 0x173   :  { %1692 = vmatprep.subr.bf16.mxu1 %v6438_v43  ;;  %v5557_v43 = vpop.permute.xlu0 %3303 }
 0x174   :  { %4304 = vmatpush3.bf16.msra.mxu0 %v4530_v2  ;;  %6448 = vst [vmem:[#allocation21_spill] sm:$0xff] %v5557_v43 }
 0x175   :  { %4305 = vmatprep.subr.bf16.mxu0 %v6432_v8 }
 0x176   :  { %1693 = vmatpush1.bf16.msra.mxu1 %v6439_v35  ;;  %v5560_v35 = vpop.permute.xlu1 %3306 }
 0x177   :  { %1694 = vmatprep.subr.bf16.mxu1 %v6440_v56  ;;  %6449 = vst [vmem:[#allocation16_spill] sm:$0xff] %v5560_v35  ;;  %v5565_v56 = vld [vmem:[%s6343_s6] ss:$12 sps:$4 sm:$0xff]  }
 0x178   :  { %4306 = vmatpush3.bf16.msra.mxu0 %v4531_v51 }
 0x179   :  { %4307 = vmatprep.subr.bf16.mxu0 %v6432_v8 }
 0x17a   :  { %1695 = vmatpush1.bf16.msra.mxu1 %v6441_v25  ;;  %v5570_v25 = vld [vmem:[%s6343_s6 + $0x4] ss:$12 sps:$4 sm:$0xff]   ;;  %v5580_v30 = vpop.permute.xlu1 %3675 }
 0x17b   :  { %1696 = vmatprep.subr.bf16.mxu1 %v6442_v29  ;;  %v4537_v29 = vld [vmem:[%s6343_s6 + $0x8] ss:$12 sps:$4 sm:$0xff]   ;;  %6451 = vst [vmem:[#allocation3_spill] sm:$0xff] %v5580_v30 }
 0x17c   :  { %4308 = vmatpush3.bf16.msra.mxu0 %v4532_v54 }
 0x17d   :  { %4309 = vmatprep.subr.bf16.mxu0 %v6432_v8 }
 0x17e   :  { %1697 = vmatpush1.bf16.msra.mxu1 %v6443_v33  ;;  %v5577_v33 = vpop.permute.xlu0 %3678 }
 0x17f   :  { %1698 = vmatprep.subr.bf16.mxu1 %v5570_v25  ;;  %6450 = vst [vmem:[#allocation17_spill] sm:$0xff] %v5577_v33 }
 0x180   :  { %4310 = vmatpush3.bf16.msra.mxu0 %v4533_v58 }
 0x181   :  { %4311 = vmatprep.subr.bf16.mxu0 %v6432_v8 }
 0x182   :  { %1699 = vmatpush1.bf16.msra.mxu1 %v5565_v56 }
 0x184   :  { %4312 = vmatpush3.bf16.msra.mxu0 %v4537_v29 }
 0x185   :  { %4317 = vmatprep.subr.bf16.mxu0 %v6432_v8 }
 0x1e8   :  { %v1069_v38 = vpop.xlane.xlu0 %1068 }
 0x1e9   :  { %v1073_v17 = vmul.f32 0.0078125, %v1069_v38  ;;  %v1167_v38 = vld [vmem:[%s6347_s8] sm:$0x7] }
 0x1ea   :  { %v1176_v30 = vrot.slane %v1167_v38, %v6422_v34 }
 0x1eb   :  { %v5584_v2 = vsub.f32 %v5480_v55, %v1073_v17  ;;  %v1172_v55 = vrot.slane %v1167_v38, %v5339_v39 }
 0x1ec   :  { %v1071_v51 = vpop.xlane.xlu1 %1070 }
 0x1ed   :  { %v1074_v54 = vmul.f32 0.0078125, %v1071_v51  ;;  %v1077_v58 = vmul.f32 %v5584_v2, %v5584_v2 }
 0x1ef   :  { %v5589_v35 = vsub.f32 %v5487_v36, %v1074_v54  ;;  %1079 = vadd.xlane.f32.xlu0 %v1077_v58  ;;  %v6452_v36 = vld [vmem:[#allocation23_spill] sm:$0xff] }
 0x1f1   :  { %v1078_v29 = vmul.f32 %v5589_v35, %v5589_v35 }
 0x1f3   :  { %1081 = vadd.xlane.f32.xlu0 %v1078_v29 }
 0x225   :  { %v1346_v17 = vpop.f32.mrf.mxu1  ;;  %v1389_v33 = vpop.f32.mrf.mxu0 }
 0x226   :  { %v1347_v51 = vadd.f32 %v1346_v17, %v1172_v55 }
 0x227   :  { %v1348_v43 = vpop.f32.mrf.mxu1  ;;  %v4295_v31 = vpop.f32.mrf.mxu0 }
 0x228   :  { %v1396_v54 = vadd.f32 %v1347_v51, %v6452_v36  ;;  %v1349_v0 = vadd.f32 %v1348_v43, %v1176_v30 }
 0x229   :  { %v1350_v58 = vpop.f32.mrf.mxu1  ;;  %v1392_v24 = vpop.f32.mrf.mxu0 }
 0x22a   :  { %v3857_v27 = vmul.f32 -1.442695, %v1396_v54  ;;  %v1351_v29 = vadd.f32 %v1350_v58, %v1172_v55  ;;  %v1410_v20 = vadd.f32 %v1349_v0, %v5368_v53 }
 0x22b   :  { %v1352_v61 = vpop.f32.mrf.mxu1  ;;  %v4296_v23 = vpop.f32.mrf.mxu0 }
 0x22c   :  { %4643 = vpow2.f32 %v3857_v27  ;;  %v1397_v9 = vadd.f32 %v1351_v29, %v5383_v5  ;;  %v1353_v26 = vadd.f32 %v1352_v61, %v1176_v30  ;;  %v3859_v31 = vmul.f32 -1.442695, %v1410_v20 }
 0x22d   :  { %v1180_v5 = vrot.slane %v1167_v38, %v6426_v46 }
 0x22e   :  { %v3858_v17 = vmul.f32 -1.442695, %v1397_v9  ;;  %v1411_v21 = vadd.f32 %v1353_v26, %v5396_v14 }
 0x22f   :  { %v1390_v53 = vadd.f32 %v1389_v33, %v1180_v5  ;;  %v1393_v20 = vadd.f32 %v1392_v24, %v1180_v5 }
 0x230   :  { %4645 = vpow2.f32 %v3858_v17  ;;  %v3860_v52 = vmul.f32 -1.442695, %v1411_v21 }
 0x231   :  { %4647 = vpow2.f32 %v3859_v31 }
 0x232   :  { %4649 = vpow2.f32 %v3860_v52 }
 0x239   :  { %v4644_v51 = vpop.eup %4643 }
 0x23a   :  { %v1404_v36 = vadd.f32 1.0, %v4644_v51 }
 0x23c   :  { %4651 = vrcp.f32 %v1404_v36 }
 0x23d   :  { %v4646_v43 = vpop.eup %4645 }
 0x23e   :  { %v1405_v55 = vadd.f32 1.0, %v4646_v43  ;;  %v4648_v23 = vpop.eup %4647 }
 0x23f   :  { %v4650_v27 = vpop.eup %4649  ;;  %v1418_v61 = vadd.f32 1.0, %v4648_v23 }
 0x240   :  { %4653 = vrcp.f32 %v1405_v55  ;;  %v1419_v0 = vadd.f32 1.0, %v4650_v27 }
 0x241   :  { %4655 = vrcp.f32 %v1418_v61 }
 0x242   :  { %4657 = vrcp.f32 %v1419_v0 }
 0x249   :  { %v4652_v9 = vpop.eup %4651 }
 0x24a   :  { %v1424_v30 = vmul.f32 %v4652_v9, %v1390_v53 }
 0x24c   :  { %v1426_v14 = vadd.f32 %v1424_v30, %v5358_v44  ;;  %v5630_v30 = vld [vmem:[%s6348_s9] ss:$0 sm:$0xff] }
 0x24d   :  { %v4654_v21 = vpop.eup %4653 }
 0x24e   :  { %4659 = vtanh.f32 %v1426_v14  ;;  %v1425_v52 = vmul.f32 %v4654_v21, %v1393_v20  ;;  %v4656_v54 = vpop.eup %4655 }
 0x24f   :  { %v4658_v58 = vpop.eup %4657  ;;  %v1430_v38 = vsub.f32 1.0, %v4656_v54  ;;  %v1434_v33 = vmul.f32 %v4656_v54, %v5485_v3 }
 0x250   :  { %v1427_v26 = vadd.f32 %v1425_v52, %v5386_v37  ;;  %v1431_v51 = vsub.f32 1.0, %v4658_v58  ;;  %v1435_v37 = vmul.f32 %v4658_v58, %v5490_v32  ;;  %v5637_v52 = vld [vmem:[%s6349_s10] ss:$0 sm:$0xff] }
 0x252   :  { %4661 = vtanh.f32 %v1427_v26 }
 0x25b   :  { %v4660_v29 = vpop.eup %4659 }
 0x25c   :  { %v1432_v17 = vmul.f32 %v4660_v29, %v1430_v38  ;;  %v5653_v38 = vld [vmem:[%s6343_s6 + $0xa8] ss:$12 sps:$4 sm:$0xff]   ;;  %v4541_v29 = vld [vmem:[%s6343_s6 + $0xb0] ss:$12 sps:$4 sm:$0xff]  }
 0x25e   :  { %v1436_v31 = vadd.f32 %v1434_v33, %v1432_v17  ;;  %v5663_v17 = vld [vmem:[%s6343_s6 + $0x94] ss:$12 sps:$4 sm:$0xff]   ;;  %v5669_v33 = vld [vmem:[%s6343_s6 + $0x90] ss:$12 sps:$4 sm:$0xff]  }
 0x25f   :  { %v4662_v44 = vpop.eup %4661 }
 0x260   :  { %v5607_v24 = vsel %vm1448_vm5, %v1436_v31, 0.0  ;;  %v5610_v36 = vsel %vm1448_vm5, %v1436_v31, %v5485_v3  ;;  %v1433_v43 = vmul.f32 %v4662_v44, %v1431_v51  ;;  %v4545_v31 = vld [vmem:[%s6343_s6 + $0x98] ss:$12 sps:$4 sm:$0xff]   ;;  %v5679_v51 = vld [vmem:[%s6343_s6 + $0x7c] ss:$12 sps:$4 sm:$0xff]  }
 0x261   :  { %1452 = vadd.xlane.f32.xlu1 %v5607_v24  ;;  %v5685_v44 = vld [vmem:[%s6343_s6 + $0x78] ss:$12 sps:$4 sm:$0xff]  }
 0x262   :  { %v1437_v55 = vadd.f32 %v1435_v37, %v1433_v43  ;;  %v4549_v43 = vld [vmem:[%s6343_s6 + $0x80] ss:$12 sps:$4 sm:$0xff]  }
 0x263   :  { %v5695_v37 = vld [vmem:[%s6343_s6 + $0x60] ss:$12 sps:$4 sm:$0xff]  }
 0x264   :  { %v5615_v23 = vsel %vm1449_vm6, %v1437_v55, 0.0  ;;  %v5618_v48 = vsel %vm1449_vm6, %v1437_v55, %v5490_v32  ;;  %v5700_v55 = vld [vmem:[%s6343_s6 + $0x64] ss:$12 sps:$4 sm:$0xff]  }
 0x265   :  { %1454 = vadd.xlane.f32.xlu0 %v5615_v23  ;;  %v1506_v5 = vpack.c.bf16 %v5618_v48, %v5610_v36 }
 0x267   :  { %1717 = vmatmul.mubr.bf16.vlgmr.msra.gmra.mxu1 %v1506_v5  ;;  %4314 = vmatmul.mubr.bf16.vlgmr.msra.gmra.mxu0 %v1506_v5  ;;  %v4553_v5 = vld [vmem:[%s6343_s6 + $0x68] ss:$12 sps:$4 sm:$0xff]  }
 0x268   :  { %2088 = vmatprep.mubr.bf16.mxu1 %v6430_v12  ;;  %4333 = vmatprep.mubr.msk.bf16.mxu0 %vm4819_vm4, %v6432_v8 }
 0x269   :  { %4318 = vmatpush3.bf16.msra.mxu0 %v4541_v29 }
 0x26a   :  { %4319 = vmatprep.subr.bf16.mxu0 %v6432_v8 }
 0x26d   :  { %4320 = vmatpush3.bf16.msra.mxu0 %v4545_v31 }
 0x26e   :  { %4321 = vmatprep.subr.bf16.mxu0 %v6432_v8 }
 0x271   :  { %4322 = vmatpush3.bf16.msra.mxu0 %v4549_v43 }
 0x272   :  { %4323 = vmatprep.subr.bf16.mxu0 %v6432_v8 }
 0x275   :  { %4324 = vmatpush3.bf16.msra.mxu0 %v4553_v5  ;;  %v1539_v5 = vld [vmem:[%s6347_s8] sm:$0x7] }
 0x276   :  { %4325 = vmatprep.subr.bf16.mxu0 %v6432_v8 }
 0x278   :  { %v1080_v3 = vpop.xlane.xlu0 %1079 }
 0x279   :  { %v1083_v27 = vmul.f32 0.0078125, %v1080_v3  ;;  %v5709_v3 = vld [vmem:[%s6343_s6 + $0x4c] ss:$12 sps:$4 sm:$0xff]  }
 0x27b   :  { %v1085_v6 = vadd.f32 1e-05, %v1083_v27  ;;  %v5716_v27 = vld [vmem:[%s6343_s6 + $0x48] ss:$12 sps:$4 sm:$0xff]  }
 0x27c   :  { %v1082_v61 = vpop.xlane.xlu0 %1081 }
 0x27d   :  { %4663 = vrsqrt.f32 %v1085_v6  ;;  %v1084_v53 = vmul.f32 0.0078125, %v1082_v61  ;;  %v4557_v6 = vld [vmem:[%s6343_s6 + $0x50] ss:$12 sps:$4 sm:$0xff]   ;;  %v5726_v61 = vld [vmem:[%s6343_s6 + $0x34] ss:$12 sps:$4 sm:$0xff]  }
 0x27e   :  { %4326 = vmatpush3.bf16.msra.mxu0 %v4557_v6 }
 0x27f   :  { %v1086_v32 = vadd.f32 1e-05, %v1084_v53  ;;  %v5732_v53 = vld [vmem:[%s6343_s6 + $0x30] ss:$12 sps:$4 sm:$0xff]   ;;  %4327 = vmatprep.subr.bf16.mxu0 %v6432_v8 }
 0x281   :  { %4665 = vrsqrt.f32 %v1086_v32  ;;  %v4561_v32 = vld [vmem:[%s6343_s6 + $0x38] ss:$12 sps:$4 sm:$0xff]  }
 0x282   :  { %4328 = vmatpush3.bf16.msra.mxu0 %v4561_v32 }
 0x283   :  { %4329 = vmatprep.subr.bf16.mxu0 %v6432_v8 }
 0x28a   :  { %v4664_v9 = vpop.eup %4663 }
 0x28b   :  { %v1089_v0 = vmul.f32 %v4664_v9, %v5584_v2  ;;  %v5742_v9 = vld [vmem:[%s6343_s6 + $0x1c] ss:$12 sps:$4 sm:$0xff]  }
 0x28d   :  { %v1097_v20 = vmul.f32 %v5630_v30, %v1089_v0  ;;  %v5748_v0 = vld [vmem:[%s6343_s6 + $0x18] ss:$12 sps:$4 sm:$0xff]  }
 0x28e   :  { %v4666_v14 = vpop.eup %4665 }
 0x28f   :  { %v1090_v21 = vmul.f32 %v4666_v14, %v5589_v35  ;;  %v1105_v54 = vadd.f32 %v5637_v52, %v1097_v20  ;;  %v5648_v35 = vld [vmem:[%s6343_s6 + $0xac] ss:$12 sps:$4 sm:$0xff]   ;;  %v4566_v20 = vld [vmem:[%s6343_s6 + $0x8] ss:$12 sps:$4 sm:$0xff]  }
 0x290   :  { %2056 = vmatprep.subr.bf16.mxu1 %v5648_v35  ;;  %v4565_v14 = vld [vmem:[%s6343_s6 + $0x20] ss:$12 sps:$4 sm:$0xff]  }
 0x291   :  { %v1098_v26 = vmul.f32 %v5630_v30, %v1090_v21  ;;  %2057 = vmatpush1.bf16.msra.mxu1 %v5653_v38  ;;  %4330 = vmatpush3.bf16.msra.mxu0 %v4565_v14 }
 0x292   :  { %2058 = vmatprep.subr.bf16.mxu1 %v5663_v17  ;;  %4331 = vmatprep.subr.bf16.mxu0 %v6432_v8 }
 0x293   :  { %v1106_v2 = vadd.f32 %v5637_v52, %v1098_v26 }
 0x295   :  { %v4076_v58 = vpack.c.bf16 %v1106_v2, %v1105_v54  ;;  %2059 = vmatpush1.bf16.msra.mxu1 %v5669_v33  ;;  %4332 = vmatpush3.bf16.msra.mxu0 %v4566_v20  ;;  %v1548_v20 = vrot.slane %v1539_v5, %v6422_v34 }
 0x296   :  { %2060 = vmatprep.subr.bf16.mxu1 %v5679_v51  ;;  %4337 = vmatprep.subr.bf16.mxu0 %v6432_v8 }
 0x297   :  { %4077 = vst [vmem:[%s6350_s12] sm:$0xff] %v4076_v58  }
 0x299   :  { %2061 = vmatpush1.bf16.msra.mxu1 %v5685_v44 }
 0x29a   :  { %2062 = vmatprep.subr.bf16.mxu1 %v5700_v55 }
 0x29d   :  { %2063 = vmatpush1.bf16.msra.mxu1 %v5695_v37 }
 0x29e   :  { %2064 = vmatprep.subr.bf16.mxu1 %v5709_v3 }
 0x2a1   :  { %2065 = vmatpush1.bf16.msra.mxu1 %v5716_v27 }
 0x2a2   :  { %2066 = vmatprep.subr.bf16.mxu1 %v5726_v61 }
 0x2a5   :  { %2067 = vmatpush1.bf16.msra.mxu1 %v5732_v53 }
 0x2a6   :  { %2068 = vmatprep.subr.bf16.mxu1 %v5742_v9 }
 0x2a9   :  { %2069 = vmatpush1.bf16.msra.mxu1 %v5748_v0 }
 0x2aa   :  { %2070 = vmatprep.subr.bf16.mxu1 %v5570_v25 }
 0x2ad   :  { %2071 = vmatpush1.bf16.msra.mxu1 %v5565_v56 }
 0x2ae   :  { %2428 = vmatprep.subr.bf16.mxu1 %v5648_v35 }
 0x2ea   :  { %v1453_v21 = vpop.xlane.xlu1 %1452 }
 0x2eb   :  { %v1456_v26 = vmul.f32 0.0078125, %v1453_v21 }
 0x2ed   :  { %v5765_v54 = vsub.f32 %v5607_v24, %v1456_v26  ;;  %v1544_v24 = vrot.slane %v1539_v5, %v5339_v39 }
 0x2ee   :  { %v1455_v2 = vpop.xlane.xlu0 %1454 }
 0x2ef   :  { %v1457_v58 = vmul.f32 0.0078125, %v1455_v2  ;;  %v1460_v29 = vmul.f32 %v5765_v54, %v5765_v54 }
 0x2f1   :  { %v5770_v31 = vsub.f32 %v5615_v23, %v1457_v58  ;;  %1462 = vadd.xlane.f32.xlu1 %v1460_v29 }
 0x2f3   :  { %v1461_v43 = vmul.f32 %v5770_v31, %v5770_v31 }
 0x2f5   :  { %1464 = vadd.xlane.f32.xlu0 %v1461_v43 }
 0x327   :  { %v1718_v6 = vpop.f32.mrf.mxu1  ;;  %v1761_v32 = vpop.f32.mrf.mxu0 }
 0x328   :  { %v1719_v14 = vadd.f32 %v1718_v6, %v1544_v24 }
 0x329   :  { %v1720_v21 = vpop.f32.mrf.mxu1  ;;  %v4315_v26 = vpop.f32.mrf.mxu0 }
 0x32a   :  { %v1768_v23 = vadd.f32 %v1719_v14, %v5360_v40  ;;  %v1721_v28 = vadd.f32 %v1720_v21, %v1548_v20 }
 0x32b   :  { %v1722_v2 = vpop.f32.mrf.mxu1  ;;  %v1764_v58 = vpop.f32.mrf.mxu0 }
 0x32c   :  { %v3889_v29 = vmul.f32 -1.442695, %v1768_v23  ;;  %v1723_v43 = vadd.f32 %v1722_v2, %v1544_v24  ;;  %v1782_v7 = vadd.f32 %v1721_v28, %v5371_v45 }
 0x32d   :  { %v1724_v13 = vpop.f32.mrf.mxu1  ;;  %v4316_v22 = vpop.f32.mrf.mxu0 }
 0x32e   :  { %4667 = vpow2.f32 %v3889_v29  ;;  %v1769_v15 = vadd.f32 %v1723_v43, %v5389_v42  ;;  %v1725_v19 = vadd.f32 %v1724_v13, %v1548_v20  ;;  %v3891_v26 = vmul.f32 -1.442695, %v1782_v7 }
 0x32f   :  { %v1552_v42 = vrot.slane %v1539_v5, %v6426_v46 }
 0x330   :  { %v3890_v6 = vmul.f32 -1.442695, %v1769_v15  ;;  %v1783_v4 = vadd.f32 %v1725_v19, %v5399_v63 }
 0x331   :  { %v1762_v45 = vadd.f32 %v1761_v32, %v1552_v42  ;;  %v1765_v7 = vadd.f32 %v1764_v58, %v1552_v42 }
 0x332   :  { %4669 = vpow2.f32 %v3890_v6  ;;  %v3892_v60 = vmul.f32 -1.442695, %v1783_v4 }
 0x333   :  { %4671 = vpow2.f32 %v3891_v26 }
 0x334   :  { %4673 = vpow2.f32 %v3892_v60 }
 0x33b   :  { %v4668_v40 = vpop.eup %4667 }
 0x33c   :  { %v1776_v14 = vadd.f32 1.0, %v4668_v40 }
 0x33e   :  { %4675 = vrcp.f32 %v1776_v14 }
 0x33f   :  { %v4670_v24 = vpop.eup %4669 }
 0x340   :  { %v1777_v21 = vadd.f32 1.0, %v4670_v24  ;;  %v4672_v22 = vpop.eup %4671 }
 0x341   :  { %v4674_v13 = vpop.eup %4673  ;;  %v1790_v20 = vadd.f32 1.0, %v4672_v22 }
 0x342   :  { %4677 = vrcp.f32 %v1777_v21  ;;  %v1791_v28 = vadd.f32 1.0, %v4674_v13 }
 0x343   :  { %4679 = vrcp.f32 %v1790_v20 }
 0x344   :  { %4681 = vrcp.f32 %v1791_v28 }
 0x34b   :  { %v4676_v15 = vpop.eup %4675 }
 0x34c   :  { %v1796_v23 = vmul.f32 %v4676_v15, %v1762_v45 }
 0x34e   :  { %v1798_v63 = vadd.f32 %v1796_v23, %v5362_v1 }
 0x34f   :  { %v4678_v4 = vpop.eup %4677 }
 0x350   :  { %4683 = vtanh.f32 %v1798_v63  ;;  %v1797_v60 = vmul.f32 %v4678_v4, %v1765_v7  ;;  %v4680_v2 = vpop.eup %4679 }
 0x351   :  { %v4682_v29 = vpop.eup %4681  ;;  %v1802_v5 = vsub.f32 1.0, %v4680_v2  ;;  %v1806_v32 = vmul.f32 %v4680_v2, %v5610_v36 }
 0x352   :  { %v1799_v19 = vadd.f32 %v1797_v60, %v5391_v47  ;;  %v1803_v40 = vsub.f32 1.0, %v4682_v29  ;;  %v1807_v47 = vmul.f32 %v4682_v29, %v5618_v48  ;;  %v4572_v29 = vld [vmem:[%s6343_s6 + $0x38] ss:$12 sps:$4 sm:$0xff]  }
 0x354   :  { %4685 = vtanh.f32 %v1799_v19 }
 0x35d   :  { %v4684_v43 = vpop.eup %4683 }
 0x35e   :  { %v1804_v6 = vmul.f32 %v4684_v43, %v1802_v5  ;;  %v4573_v5 = vld [vmem:[%s6343_s6 + $0x20] ss:$12 sps:$4 sm:$0xff]   ;;  %v4574_v43 = vld [vmem:[%s6343_s6 + $0x8] ss:$12 sps:$4 sm:$0xff]  }
 0x360   :  { %v1808_v26 = vadd.f32 %v1806_v32, %v1804_v6 }
 0x361   :  { %v4686_v14 = vpop.eup %4685 }
 0x362   :  { %v5788_v1 = vsel %vm1820_vm7, %v1808_v26, 0.0  ;;  %v5791_v58 = vsel %vm1820_vm7, %v1808_v26, %v5610_v36  ;;  %v1805_v24 = vmul.f32 %v4686_v14, %v1803_v40 }
 0x363   :  { %1824 = vadd.xlane.f32.xlu1 %v5788_v1 }
 0x364   :  { %v1809_v21 = vadd.f32 %v1807_v47, %v1805_v24 }
 0x366   :  { %v5796_v22 = vsel %vm1821_vm8, %v1809_v21, 0.0  ;;  %v5799_v42 = vsel %vm1821_vm8, %v1809_v21, %v5618_v48 }
 0x367   :  { %1826 = vadd.xlane.f32.xlu0 %v5796_v22  ;;  %v1878_v50 = vpack.c.bf16 %v5799_v42, %v5791_v58 }
 0x369   :  { %2089 = vmatmul.mubr.bf16.vlgmr.msra.gmra.mxu1 %v1878_v50  ;;  %4334 = vmatmul.mubr.bf16.vlgmr.msra.gmra.mxu0 %v1878_v50  ;;  %v1911_v50 = vld [vmem:[%s6347_s8] sm:$0x7] }
 0x36a   :  { %2429 = vmatpush1.bf16.msra.mxu1 %v5653_v38  ;;  %2460 = vmatprep.mubr.bf16.mxu1 %v6430_v12 }
 0x36b   :  { %2430 = vmatprep.subr.bf16.mxu1 %v5663_v17  ;;  %4353 = vmatprep.mubr.msk.bf16.mxu0 %vm4819_vm4, %v6432_v8 }
 0x36e   :  { %2431 = vmatpush1.bf16.msra.mxu1 %v5669_v33 }
 0x36f   :  { %2432 = vmatprep.subr.bf16.mxu1 %v5679_v51 }
 0x372   :  { %2433 = vmatpush1.bf16.msra.mxu1 %v5685_v44 }
 0x373   :  { %2434 = vmatprep.subr.bf16.mxu1 %v5700_v55 }
 0x376   :  { %2435 = vmatpush1.bf16.msra.mxu1 %v5695_v37 }
 0x377   :  { %2436 = vmatprep.subr.bf16.mxu1 %v5709_v3 }
 0x37a   :  { %v1463_v59 = vpop.xlane.xlu1 %1462  ;;  %2437 = vmatpush1.bf16.msra.mxu1 %v5716_v27 }
 0x37b   :  { %v1466_v36 = vmul.f32 0.0078125, %v1463_v59  ;;  %2438 = vmatprep.subr.bf16.mxu1 %v5726_v61 }
 0x37d   :  { %v1468_v48 = vadd.f32 1e-05, %v1466_v36 }
 0x37e   :  { %v1465_v13 = vpop.xlane.xlu0 %1464  ;;  %2439 = vmatpush1.bf16.msra.mxu1 %v5732_v53 }
 0x37f   :  { %4687 = vrsqrt.f32 %v1468_v48  ;;  %v1467_v20 = vmul.f32 0.0078125, %v1465_v13  ;;  %2440 = vmatprep.subr.bf16.mxu1 %v5742_v9  ;;  %v1920_v13 = vrot.slane %v1911_v50, %v6422_v34 }
 0x381   :  { %v1469_v45 = vadd.f32 1e-05, %v1467_v20 }
 0x382   :  { %2441 = vmatpush1.bf16.msra.mxu1 %v5748_v0 }
 0x383   :  { %4689 = vrsqrt.f32 %v1469_v45  ;;  %2442 = vmatprep.subr.bf16.mxu1 %v5570_v25  ;;  %v4568_v25 = vld [vmem:[%s6343_s6 + $0x98] ss:$12 sps:$4 sm:$0xff]  }
 0x386   :  { %2443 = vmatpush1.bf16.msra.mxu1 %v5565_v56  ;;  %v4567_v56 = vld [vmem:[%s6343_s6 + $0xb0] ss:$12 sps:$4 sm:$0xff]  }
 0x387   :  { %2800 = vmatprep.subr.bf16.mxu1 %v5648_v35  ;;  %4338 = vmatpush3.bf16.msra.mxu0 %v4567_v56  ;;  %v4569_v35 = vld [vmem:[%s6343_s6 + $0x80] ss:$12 sps:$4 sm:$0xff]  }
 0x388   :  { %4339 = vmatprep.subr.bf16.mxu0 %v6432_v8 }
 0x38b   :  { %4340 = vmatpush3.bf16.msra.mxu0 %v4568_v25 }
 0x38c   :  { %v4688_v15 = vpop.eup %4687  ;;  %4341 = vmatprep.subr.bf16.mxu0 %v6432_v8 }
 0x38d   :  { %v1472_v28 = vmul.f32 %v4688_v15, %v5765_v54  ;;  %v4570_v54 = vld [vmem:[%s6343_s6 + $0x68] ss:$12 sps:$4 sm:$0xff]  }
 0x38f   :  { %v1474_v63 = vmul.f32 %v5630_v30, %v1472_v28  ;;  %4342 = vmatpush3.bf16.msra.mxu0 %v4569_v35 }
 0x390   :  { %v4690_v23 = vpop.eup %4689  ;;  %4343 = vmatprep.subr.bf16.mxu0 %v6432_v8 }
 0x391   :  { %v1473_v7 = vmul.f32 %v4690_v23, %v5770_v31  ;;  %v1476_v60 = vadd.f32 %v5637_v52, %v1474_v63  ;;  %v4571_v31 = vld [vmem:[%s6343_s6 + $0x50] ss:$12 sps:$4 sm:$0xff]  }
 0x393   :  { %v1475_v4 = vmul.f32 %v5630_v30, %v1473_v7  ;;  %4344 = vmatpush3.bf16.msra.mxu0 %v4570_v54 }
 0x394   :  { %4345 = vmatprep.subr.bf16.mxu0 %v6432_v8 }
 0x395   :  { %v1477_v19 = vadd.f32 %v5637_v52, %v1475_v4 }
 0x397   :  { %v4081_v2 = vpack.c.bf16 %v1477_v19, %v1476_v60  ;;  %4346 = vmatpush3.bf16.msra.mxu0 %v4571_v31 }
 0x398   :  { %4347 = vmatprep.subr.bf16.mxu0 %v6432_v8 }
 0x399   :  { %4113 = vst [vmem:[%s6350_s12 + $0x8] sm:$0xff] %v4081_v2  }
 0x39b   :  { %4348 = vmatpush3.bf16.msra.mxu0 %v4572_v29 }
 0x39c   :  { %4349 = vmatprep.subr.bf16.mxu0 %v6432_v8 }
 0x39f   :  { %4350 = vmatpush3.bf16.msra.mxu0 %v4573_v5 }
 0x3a0   :  { %4351 = vmatprep.subr.bf16.mxu0 %v6432_v8 }
 0x3a3   :  { %4352 = vmatpush3.bf16.msra.mxu0 %v4574_v43 }
 0x3a4   :  { %4357 = vmatprep.subr.bf16.mxu0 %v6432_v8 }
 0x3ec   :  { %v1825_v6 = vpop.xlane.xlu1 %1824 }
 0x3ed   :  { %v1828_v32 = vmul.f32 0.0078125, %v1825_v6 }
 0x3ef   :  { %v5865_v26 = vsub.f32 %v5788_v1, %v1828_v32  ;;  %v1916_v1 = vrot.slane %v1911_v50, %v5339_v39 }
 0x3f0   :  { %v1827_v40 = vpop.xlane.xlu0 %1826 }
 0x3f1   :  { %v1829_v14 = vmul.f32 0.0078125, %v1827_v40  ;;  %v1832_v24 = vmul.f32 %v5865_v26, %v5865_v26 }
 0x3f3   :  { %v5870_v47 = vsub.f32 %v5796_v22, %v1829_v14  ;;  %1834 = vadd.xlane.f32.xlu1 %v1832_v24 }
 0x3f5   :  { %v1833_v21 = vmul.f32 %v5870_v47, %v5870_v47 }
 0x3f7   :  { %1836 = vadd.xlane.f32.xlu0 %v1833_v21 }
 0x429   :  { %v2090_v59 = vpop.f32.mrf.mxu1  ;;  %v2133_v36 = vpop.f32.mrf.mxu0 }
 0x42a   :  { %v2091_v48 = vadd.f32 %v2090_v59, %v1916_v1 }
 0x42b   :  { %v2092_v20 = vpop.f32.mrf.mxu1  ;;  %v4335_v45 = vpop.f32.mrf.mxu0 }
 0x42c   :  { %v2140_v22 = vadd.f32 %v2091_v48, %v5364_v10  ;;  %v2093_v63 = vadd.f32 %v2092_v20, %v1920_v13 }
 0x42d   :  { %v2094_v15 = vpop.f32.mrf.mxu1  ;;  %v2136_v28 = vpop.f32.mrf.mxu0 }
 0x42e   :  { %v3921_v23 = vmul.f32 -1.442695, %v2140_v22  ;;  %v2095_v7 = vadd.f32 %v2094_v15, %v1916_v1  ;;  %v2154_v56 = vadd.f32 %v2093_v63, %v5376_v57 }
 0x42f   :  { %v2096_v4 = vpop.f32.mrf.mxu1  ;;  %v4336_v60 = vpop.f32.mrf.mxu0 }
 0x430   :  { %4691 = vpow2.f32 %v3921_v23  ;;  %v2141_v19 = vadd.f32 %v2095_v7, %v5393_v62  ;;  %v2097_v2 = vadd.f32 %v2096_v4, %v1920_v13  ;;  %v3923_v54 = vmul.f32 -1.442695, %v2154_v56 }
 0x431   :  { %v1924_v62 = vrot.slane %v1911_v50, %v6426_v46 }
 0x432   :  { %v3922_v25 = vmul.f32 -1.442695, %v2141_v19  ;;  %v2155_v35 = vadd.f32 %v2097_v2, %v5403_v49 }
 0x433   :  { %v2134_v57 = vadd.f32 %v2133_v36, %v1924_v62  ;;  %v2137_v1 = vadd.f32 %v2136_v28, %v1924_v62 }
 0x434   :  { %4693 = vpow2.f32 %v3922_v25  ;;  %v3924_v31 = vmul.f32 -1.442695, %v2155_v35  ;;  %v4579_v25 = vld [vmem:[%s6343_s6 + $0x50] ss:$12 sps:$4 sm:$0xff]   ;;  %v4580_v35 = vld [vmem:[%s6343_s6 + $0x38] ss:$12 sps:$4 sm:$0xff]  }
 0x435   :  { %4695 = vpow2.f32 %v3923_v54  ;;  %v5955_v54 = vld [vmem:[%s6343_s6] ss:$12 sps:$4 sm:$0xff]  }
 0x436   :  { %4697 = vpow2.f32 %v3924_v31  ;;  %v5960_v31 = vld [vmem:[%s6343_s6 + $0x4] ss:$12 sps:$4 sm:$0xff]  }
 0x43d   :  { %v4692_v10 = vpop.eup %4691 }
 0x43e   :  { %v2148_v29 = vadd.f32 1.0, %v4692_v10  ;;  %v4581_v10 = vld [vmem:[%s6343_s6 + $0x20] ss:$12 sps:$4 sm:$0xff]  }
 0x440   :  { %4699 = vrcp.f32 %v2148_v29  ;;  %v4585_v29 = vld [vmem:[%s6343_s6 + $0x8] ss:$12 sps:$4 sm:$0xff]  }
 0x441   :  { %v4694_v5 = vpop.eup %4693 }
 0x442   :  { %v2149_v43 = vadd.f32 1.0, %v4694_v5  ;;  %v4696_v6 = vpop.eup %4695 }
 0x443   :  { %v4698_v32 = vpop.eup %4697  ;;  %v2162_v40 = vadd.f32 1.0, %v4696_v6 }
 0x444   :  { %4701 = vrcp.f32 %v2149_v43  ;;  %v2163_v24 = vadd.f32 1.0, %v4698_v32 }
 0x445   :  { %4703 = vrcp.f32 %v2162_v40 }
 0x446   :  { %4705 = vrcp.f32 %v2163_v24  ;;  %v2283_v24 = vld [vmem:[%s6347_s8] sm:$0x7] }
 0x44d   :  { %v4700_v14 = vpop.eup %4699 }
 0x44e   :  { %v2168_v21 = vmul.f32 %v4700_v14, %v2134_v57 }
 0x450   :  { %v2170_v49 = vadd.f32 %v2168_v21, %v5373_v16  ;;  %v2288_v21 = vrot.slane %v2283_v24, %v5339_v39 }
 0x451   :  { %v4702_v59 = vpop.eup %4701 }
 0x452   :  { %4707 = vtanh.f32 %v2170_v49  ;;  %v2169_v48 = vmul.f32 %v4702_v59, %v2137_v1  ;;  %v4704_v20 = vpop.eup %4703 }
 0x453   :  { %v4706_v45 = vpop.eup %4705  ;;  %v2174_v50 = vsub.f32 1.0, %v4704_v20  ;;  %v2178_v36 = vmul.f32 %v4704_v20, %v5791_v58 }
 0x454   :  { %v2171_v13 = vadd.f32 %v2169_v48, %v5401_v11  ;;  %v2175_v63 = vsub.f32 1.0, %v4706_v45  ;;  %v2179_v11 = vmul.f32 %v4706_v45, %v5799_v42  ;;  %v2292_v48 = vrot.slane %v2283_v24, %v6422_v34  ;;  %v6453_v45 = vld [vmem:[#allocation24_spill] sm:$0xff] }
 0x456   :  { %4709 = vtanh.f32 %v2171_v13 }
 0x45f   :  { %v4708_v22 = vpop.eup %4707 }
 0x460   :  { %v2176_v15 = vmul.f32 %v4708_v22, %v2174_v50 }
 0x462   :  { %v2180_v23 = vadd.f32 %v2178_v36, %v2176_v15 }
 0x463   :  { %v4710_v7 = vpop.eup %4709 }
 0x464   :  { %v5888_v16 = vsel %vm2192_vm9, %v2180_v23, 0.0  ;;  %v5891_v28 = vsel %vm2192_vm9, %v2180_v23, %v5791_v58  ;;  %v2177_v4 = vmul.f32 %v4710_v7, %v2175_v63 }
 0x465   :  { %2196 = vadd.xlane.f32.xlu1 %v5888_v16 }
 0x466   :  { %v2181_v60 = vadd.f32 %v2179_v11, %v2177_v4  ;;  %v6454_v4 = vld [vmem:[#allocation27_spill] sm:$0xff] }
 0x468   :  { %v5896_v19 = vsel %vm2193_vm10, %v2181_v60, 0.0  ;;  %v5899_v2 = vsel %vm2193_vm10, %v2181_v60, %v5799_v42 }
 0x469   :  { %2198 = vadd.xlane.f32.xlu0 %v5896_v19  ;;  %v2250_v41 = vpack.c.bf16 %v5899_v2, %v5891_v28 }
 0x46b   :  { %2461 = vmatmul.mubr.bf16.vlgmr.msra.gmra.mxu1 %v2250_v41  ;;  %4354 = vmatmul.mubr.bf16.vlgmr.msra.gmra.mxu0 %v2250_v41 }
 0x46c   :  { %2801 = vmatpush1.bf16.msra.mxu1 %v5653_v38  ;;  %2832 = vmatprep.mubr.bf16.mxu1 %v6430_v12 }
 0x46d   :  { %2802 = vmatprep.subr.bf16.mxu1 %v5663_v17  ;;  %4373 = vmatprep.mubr.msk.bf16.mxu0 %vm4819_vm4, %v6432_v8 }
 0x470   :  { %2803 = vmatpush1.bf16.msra.mxu1 %v5669_v33 }
 0x471   :  { %2804 = vmatprep.subr.bf16.mxu1 %v5679_v51 }
 0x474   :  { %2805 = vmatpush1.bf16.msra.mxu1 %v5685_v44 }
 0x475   :  { %2806 = vmatprep.subr.bf16.mxu1 %v5700_v55 }
 0x478   :  { %2807 = vmatpush1.bf16.msra.mxu1 %v5695_v37 }
 0x479   :  { %2808 = vmatprep.subr.bf16.mxu1 %v5709_v3 }
 0x47c   :  { %v1835_v18 = vpop.xlane.xlu1 %1834  ;;  %2809 = vmatpush1.bf16.msra.mxu1 %v5716_v27 }
 0x47d   :  { %v1838_v38 = vmul.f32 0.0078125, %v1835_v18  ;;  %2810 = vmatprep.subr.bf16.mxu1 %v5726_v61 }
 0x47f   :  { %v1840_v17 = vadd.f32 1e-05, %v1838_v38  ;;  %v6456_v38 = vld [vmem:[#allocation29_spill] sm:$0xff] }
 0x480   :  { %v1837_v58 = vpop.xlane.xlu0 %1836  ;;  %2811 = vmatpush1.bf16.msra.mxu1 %v5732_v53 }
 0x481   :  { %4711 = vrsqrt.f32 %v1840_v17  ;;  %v1839_v33 = vmul.f32 0.0078125, %v1837_v58  ;;  %2812 = vmatprep.subr.bf16.mxu1 %v5742_v9  ;;  %v4575_v9 = vld [vmem:[%s6343_s6 + $0xb0] ss:$12 sps:$4 sm:$0xff]  }
 0x482   :  { %4358 = vmatpush3.bf16.msra.mxu0 %v4575_v9 }
 0x483   :  { %v1841_v51 = vadd.f32 1e-05, %v1839_v33  ;;  %4359 = vmatprep.subr.bf16.mxu0 %v6432_v8 }
 0x484   :  { %2813 = vmatpush1.bf16.msra.mxu1 %v5748_v0  ;;  %v4576_v0 = vld [vmem:[%s6343_s6 + $0x98] ss:$12 sps:$4 sm:$0xff]  }
 0x485   :  { %4713 = vrsqrt.f32 %v1841_v51  ;;  %2814 = vmatprep.subr.bf16.mxu1 %v5960_v31 }
 0x486   :  { %4360 = vmatpush3.bf16.msra.mxu0 %v4576_v0 }
 0x487   :  { %4361 = vmatprep.subr.bf16.mxu0 %v6432_v8 }
 0x488   :  { %2815 = vmatpush1.bf16.msra.mxu1 %v5955_v54 }
 0x48e   :  { %v4712_v44 = vpop.eup %4711 }
 0x48f   :  { %v1844_v37 = vmul.f32 %v4712_v44, %v5865_v26  ;;  %v4577_v26 = vld [vmem:[%s6343_s6 + $0x80] ss:$12 sps:$4 sm:$0xff]  }
 0x490   :  { %4362 = vmatpush3.bf16.msra.mxu0 %v4577_v26  ;;  %v6457_v26 = vld [vmem:[#allocation25_spill] sm:$0xff] }
 0x491   :  { %v1846_v3 = vmul.f32 %v5630_v30, %v1844_v37  ;;  %4363 = vmatprep.subr.bf16.mxu0 %v6432_v8 }
 0x492   :  { %v4714_v55 = vpop.eup %4713 }
 0x493   :  { %v1845_v27 = vmul.f32 %v4714_v55, %v5870_v47  ;;  %v1848_v53 = vadd.f32 %v5637_v52, %v1846_v3  ;;  %v4578_v47 = vld [vmem:[%s6343_s6 + $0x68] ss:$12 sps:$4 sm:$0xff]  }
 0x494   :  { %4364 = vmatpush3.bf16.msra.mxu0 %v4578_v47 }
 0x495   :  { %v1847_v61 = vmul.f32 %v5630_v30, %v1845_v27  ;;  %4365 = vmatprep.subr.bf16.mxu0 %v6432_v8  ;;  %v2296_v27 = vrot.slane %v2283_v24, %v6426_v46 }
 0x497   :  { %v1849_v42 = vadd.f32 %v5637_v52, %v1847_v61 }
 0x498   :  { %4366 = vmatpush3.bf16.msra.mxu0 %v4579_v25 }
 0x499   :  { %v4086_v56 = vpack.c.bf16 %v1849_v42, %v1848_v53  ;;  %4367 = vmatprep.subr.bf16.mxu0 %v6432_v8 }
 0x49b   :  { %4114 = vst [vmem:[%s6350_s12 + $0x10] sm:$0xff] %v4086_v56  }
 0x49c   :  { %4368 = vmatpush3.bf16.msra.mxu0 %v4580_v35 }
 0x49d   :  { %4369 = vmatprep.subr.bf16.mxu0 %v6432_v8 }
 0x4a0   :  { %4370 = vmatpush3.bf16.msra.mxu0 %v4581_v10 }
 0x4a1   :  { %4371 = vmatprep.subr.bf16.mxu0 %v6432_v8 }
 0x4a4   :  { %4372 = vmatpush3.bf16.msra.mxu0 %v4585_v29  ;;  %v6458_v29 = vld [vmem:[#allocation28_spill] sm:$0xff] }
 0x4a5   :  { %4377 = vmatprep.subr.bf16.mxu0 %v6432_v8 }
 0x4ee   :  { %v2197_v5 = vpop.xlane.xlu1 %2196 }
 0x4ef   :  { %v2200_v43 = vmul.f32 0.0078125, %v2197_v5 }
 0x4f1   :  { %v5973_v6 = vsub.f32 %v5888_v16, %v2200_v43 }
 0x4f2   :  { %v2199_v62 = vpop.xlane.xlu0 %2198 }
 0x4f3   :  { %v2201_v32 = vmul.f32 0.0078125, %v2199_v62  ;;  %v2204_v40 = vmul.f32 %v5973_v6, %v5973_v6 }
 0x4f5   :  { %v5979_v57 = vsub.f32 %v5896_v19, %v2201_v32  ;;  %2206 = vadd.xlane.f32.xlu1 %v2204_v40  ;;  %v6455_v19 = vld [vmem:[#allocation26_spill] sm:$0xff] }
 0x4f7   :  { %v2205_v14 = vmul.f32 %v5979_v57, %v5979_v57 }
 0x4f9   :  { %2208 = vadd.xlane.f32.xlu0 %v2205_v14 }
 0x52b   :  { %v2462_v49 = vpop.f32.mrf.mxu1  ;;  %v2505_v1 = vpop.f32.mrf.mxu0 }
 0x52c   :  { %v2463_v59 = vadd.f32 %v2462_v49, %v2288_v21  ;;  %v2506_v42 = vadd.f32 %v2505_v1, %v2296_v27 }
 0x52d   :  { %v2464_v13 = vpop.f32.mrf.mxu1  ;;  %v4355_v20 = vpop.f32.mrf.mxu0 }
 0x52e   :  { %v2512_v50 = vadd.f32 %v2463_v59, %v6453_v45  ;;  %v2465_v23 = vadd.f32 %v2464_v13, %v2292_v48  ;;  %v6459_v59 = vld [vmem:[#allocation22_spill] sm:$0xff] }
 0x52f   :  { %v2466_v22 = vpop.f32.mrf.mxu1  ;;  %v2508_v15 = vpop.f32.mrf.mxu0  ;;  %vm2564_vm11 = vcmp.eq.s32.totalorder %v6459_v59, 1 }
 0x530   :  { %v3953_v36 = vmul.f32 -1.442695, %v2512_v50  ;;  %v2467_v63 = vadd.f32 %v2466_v22, %v2288_v21  ;;  %v2526_v41 = vadd.f32 %v2465_v23, %v6455_v19  ;;  %v2509_v25 = vadd.f32 %v2508_v15, %v2296_v27  ;;  %v6460_v22 = vld [vmem:[#allocation19_spill] sm:$0xff] }
 0x531   :  { %v2468_v7 = vpop.f32.mrf.mxu1  ;;  %v4356_v16 = vpop.f32.mrf.mxu0  ;;  %vm2565_vm12 = vcmp.eq.s32.totalorder %v6460_v22, 1  ;;  %v6071_v27 = vld [vmem:[%s6343_s6 + $0x64] ss:$12 sps:$4 sm:$0xff]  }
 0x532   :  { %4715 = vpow2.f32 %v3953_v36  ;;  %v2513_v11 = vadd.f32 %v2467_v63, %v6454_v4  ;;  %v2469_v60 = vadd.f32 %v2468_v7, %v2292_v48  ;;  %v3955_v58 = vmul.f32 -1.442695, %v2526_v41 }
 0x534   :  { %v3954_v18 = vmul.f32 -1.442695, %v2513_v11  ;;  %v2527_v17 = vadd.f32 %v2469_v60, %v6456_v38 }
 0x536   :  { %4717 = vpow2.f32 %v3954_v18  ;;  %v3956_v33 = vmul.f32 -1.442695, %v2527_v17 }
 0x537   :  { %4719 = vpow2.f32 %v3955_v58 }
 0x538   :  { %4721 = vpow2.f32 %v3956_v33 }
 0x53f   :  { %v4716_v51 = vpop.eup %4715 }
 0x540   :  { %v2520_v44 = vadd.f32 1.0, %v4716_v51  ;;  %v6031_v51 = vld [vmem:[%s6343_s6 + $0xa8] ss:$12 sps:$4 sm:$0xff]  }
 0x542   :  { %4723 = vrcp.f32 %v2520_v44  ;;  %v4593_v44 = vld [vmem:[%s6343_s6 + $0x98] ss:$12 sps:$4 sm:$0xff]  }
 0x543   :  { %v4718_v37 = vpop.eup %4717 }
 0x544   :  { %v2521_v55 = vadd.f32 1.0, %v4718_v37  ;;  %v4720_v3 = vpop.eup %4719  ;;  %v6055_v37 = vld [vmem:[%s6343_s6 + $0x7c] ss:$12 sps:$4 sm:$0xff]  }
 0x545   :  { %v4722_v61 = vpop.eup %4721  ;;  %v2534_v53 = vadd.f32 1.0, %v4720_v3  ;;  %v4597_v3 = vld [vmem:[%s6343_s6 + $0x80] ss:$12 sps:$4 sm:$0xff]  }
 0x546   :  { %4725 = vrcp.f32 %v2521_v55  ;;  %v2535_v9 = vadd.f32 1.0, %v4722_v61  ;;  %v6061_v55 = vld [vmem:[%s6343_s6 + $0x78] ss:$12 sps:$4 sm:$0xff]   ;;  %v6077_v61 = vld [vmem:[%s6343_s6 + $0x60] ss:$12 sps:$4 sm:$0xff]  }
 0x547   :  { %4727 = vrcp.f32 %v2534_v53  ;;  %v4601_v53 = vld [vmem:[%s6343_s6 + $0x68] ss:$12 sps:$4 sm:$0xff]  }
 0x548   :  { %4729 = vrcp.f32 %v2535_v9  ;;  %v4605_v9 = vld [vmem:[%s6343_s6 + $0x50] ss:$12 sps:$4 sm:$0xff]  }
 0x54f   :  { %v4724_v56 = vpop.eup %4723 }
 0x550   :  { %v2540_v0 = vmul.f32 %v4724_v56, %v2506_v42  ;;  %v6087_v42 = vld [vmem:[%s6343_s6 + $0x4c] ss:$12 sps:$4 sm:$0xff]   ;;  %v6093_v56 = vld [vmem:[%s6343_s6 + $0x48] ss:$12 sps:$4 sm:$0xff]  }
 0x552   :  { %v2542_v47 = vadd.f32 %v2540_v0, %v6457_v26  ;;  %v6103_v0 = vld [vmem:[%s6343_s6 + $0x34] ss:$12 sps:$4 sm:$0xff]   ;;  %v6109_v26 = vld [vmem:[%s6343_s6 + $0x30] ss:$12 sps:$4 sm:$0xff]  }
 0x553   :  { %v4726_v35 = vpop.eup %4725 }
 0x554   :  { %4731 = vtanh.f32 %v2542_v47  ;;  %v2541_v10 = vmul.f32 %v4726_v35, %v2509_v25  ;;  %v4728_v43 = vpop.eup %4727  ;;  %v4609_v47 = vld [vmem:[%s6343_s6 + $0x38] ss:$12 sps:$4 sm:$0xff]   ;;  %v6119_v25 = vld [vmem:[%s6343_s6 + $0x1c] ss:$12 sps:$4 sm:$0xff]  }
 0x555   :  { %v4730_v62 = vpop.eup %4729  ;;  %v2546_v32 = vsub.f32 1.0, %v4728_v43  ;;  %v2550_v24 = vmul.f32 %v4728_v43, %v5891_v28  ;;  %v6125_v35 = vld [vmem:[%s6343_s6 + $0x18] ss:$12 sps:$4 sm:$0xff]  }
 0x556   :  { %v2543_v5 = vadd.f32 %v2541_v10, %v6458_v29  ;;  %v2547_v49 = vsub.f32 1.0, %v4730_v62  ;;  %v2551_v45 = vmul.f32 %v4730_v62, %v5899_v2  ;;  %v4613_v10 = vld [vmem:[%s6343_s6 + $0x20] ss:$12 sps:$4 sm:$0xff]  }
 0x558   :  { %4733 = vtanh.f32 %v2543_v5  ;;  %v4614_v5 = vld [vmem:[%s6343_s6 + $0x8] ss:$12 sps:$4 sm:$0xff]  }
 0x561   :  { %v4732_v40 = vpop.eup %4731 }
 0x562   :  { %v2548_v14 = vmul.f32 %v4732_v40, %v2546_v32 }
 0x564   :  { %v2552_v21 = vadd.f32 %v2550_v24, %v2548_v14 }
 0x565   :  { %v4734_v1 = vpop.eup %4733 }
 0x566   :  { %v5997_v48 = vsel %vm2564_vm11, %v2552_v21, 0.0  ;;  %v6000_v13 = vsel %vm2564_vm11, %v2552_v21, %v5891_v28  ;;  %v2549_v20 = vmul.f32 %v4734_v1, %v2547_v49  ;;  %v2655_v49 = vld [vmem:[%s6347_s8] sm:$0x7] }
 0x567   :  { %2568 = vadd.xlane.f32.xlu1 %v5997_v48  ;;  %v2660_v1 = vrot.slane %v2655_v49, %v5339_v39 }
 0x568   :  { %v2553_v50 = vadd.f32 %v2551_v45, %v2549_v20  ;;  %v2664_v45 = vrot.slane %v2655_v49, %v6422_v34 }
 0x56a   :  { %v6005_v15 = vsel %vm2565_vm12, %v2553_v50, 0.0  ;;  %v6008_v36 = vsel %vm2565_vm12, %v2553_v50, %v5899_v2 }
 0x56b   :  { %2570 = vadd.xlane.f32.xlu0 %v6005_v15  ;;  %v2622_v23 = vpack.c.bf16 %v6008_v36, %v6000_v13 }
 0x56d   :  { %2833 = vmatmul.mubr.bf16.vlgmr.msra.gmra.mxu1 %v2622_v23  ;;  %4374 = vmatmul.mubr.bf16.vlgmr.msra.gmra.mxu0 %v2622_v23 }
 0x56e   :  { %3204 = vmatprep.mubr.bf16.mxu1 %v6430_v12  ;;  %4393 = vmatprep.mubr.msk.bf16.mxu0 %vm4819_vm4, %v6432_v8 }
 0x57e   :  { %v2207_v28 = vpop.xlane.xlu1 %2206 }
 0x57f   :  { %v2210_v63 = vmul.f32 0.0078125, %v2207_v28 }
 0x581   :  { %v2212_v7 = vadd.f32 1e-05, %v2210_v63 }
 0x582   :  { %v2209_v16 = vpop.xlane.xlu0 %2208 }
 0x583   :  { %4735 = vrsqrt.f32 %v2212_v7  ;;  %v2211_v4 = vmul.f32 0.0078125, %v2209_v16 }
 0x585   :  { %v2213_v2 = vadd.f32 1e-05, %v2211_v4 }
 0x587   :  { %4737 = vrsqrt.f32 %v2213_v2 }
 0x590   :  { %v4736_v11 = vpop.eup %4735 }
 0x591   :  { %v2216_v60 = vmul.f32 %v4736_v11, %v5973_v6  ;;  %v4588_v6 = vld [vmem:[%s6343_s6 + $0xac] ss:$12 sps:$4 sm:$0xff]  }
 0x592   :  { %3172 = vmatprep.subr.bf16.mxu1 %v4588_v6 }
 0x593   :  { %v2218_v41 = vmul.f32 %v5630_v30, %v2216_v60  ;;  %3173 = vmatpush1.bf16.msra.mxu1 %v6031_v51  ;;  %v6462_v60 = vld [vmem:[#allocation33_spill] sm:$0xff] }
 0x594   :  { %v4738_v19 = vpop.eup %4737 }
 0x595   :  { %v2217_v18 = vmul.f32 %v4738_v19, %v5979_v57  ;;  %v2220_v17 = vadd.f32 %v5637_v52, %v2218_v41  ;;  %v6046_v57 = vld [vmem:[%s6343_s6 + $0x90] ss:$12 sps:$4 sm:$0xff]  }
 0x597   :  { %v2219_v38 = vmul.f32 %v5630_v30, %v2217_v18  ;;  %v4589_v30 = vld [vmem:[%s6343_s6 + $0xb0] ss:$12 sps:$4 sm:$0xff]   ;;  %v6463_v18 = vld [vmem:[#allocation32_spill] sm:$0xff] }
 0x598   :  { %4378 = vmatpush3.bf16.msra.mxu0 %v4589_v30 }
 0x599   :  { %v2221_v58 = vadd.f32 %v5637_v52, %v2219_v38  ;;  %v6040_v52 = vld [vmem:[%s6343_s6 + $0x94] ss:$12 sps:$4 sm:$0xff]   ;;  %4379 = vmatprep.subr.bf16.mxu0 %v6432_v8 }
 0x59a   :  { %3174 = vmatprep.subr.bf16.mxu1 %v6040_v52 }
 0x59b   :  { %v4091_v33 = vpack.c.bf16 %v2221_v58, %v2220_v17  ;;  %3175 = vmatpush1.bf16.msra.mxu1 %v6046_v57  ;;  %v6464_v58 = vld [vmem:[#allocation35_spill] sm:$0xff] }
 0x59c   :  { %4380 = vmatpush3.bf16.msra.mxu0 %v4593_v44  ;;  %3176 = vmatprep.subr.bf16.mxu1 %v6055_v37 }
 0x59d   :  { %4115 = vst [vmem:[%s6350_s12 + $0x18] sm:$0xff] %v4091_v33   ;;  %4381 = vmatprep.subr.bf16.mxu0 %v6432_v8 }
 0x59f   :  { %3177 = vmatpush1.bf16.msra.mxu1 %v6061_v55 }
 0x5a0   :  { %4382 = vmatpush3.bf16.msra.mxu0 %v4597_v3  ;;  %3178 = vmatprep.subr.bf16.mxu1 %v6071_v27 }
 0x5a1   :  { %4383 = vmatprep.subr.bf16.mxu0 %v6432_v8 }
 0x5a3   :  { %3179 = vmatpush1.bf16.msra.mxu1 %v6077_v61 }
 0x5a4   :  { %4384 = vmatpush3.bf16.msra.mxu0 %v4601_v53  ;;  %3180 = vmatprep.subr.bf16.mxu1 %v6087_v42 }
 0x5a5   :  { %4385 = vmatprep.subr.bf16.mxu0 %v6432_v8 }
 0x5a7   :  { %3181 = vmatpush1.bf16.msra.mxu1 %v6093_v56 }
 0x5a8   :  { %4386 = vmatpush3.bf16.msra.mxu0 %v4605_v9  ;;  %3182 = vmatprep.subr.bf16.mxu1 %v6103_v0 }
 0x5a9   :  { %4387 = vmatprep.subr.bf16.mxu0 %v6432_v8 }
 0x5ab   :  { %3183 = vmatpush1.bf16.msra.mxu1 %v6109_v26 }
 0x5ac   :  { %4388 = vmatpush3.bf16.msra.mxu0 %v4609_v47  ;;  %3184 = vmatprep.subr.bf16.mxu1 %v6119_v25 }
 0x5ad   :  { %4389 = vmatprep.subr.bf16.mxu0 %v6432_v8 }
 0x5af   :  { %3185 = vmatpush1.bf16.msra.mxu1 %v6125_v35 }
 0x5b0   :  { %4390 = vmatpush3.bf16.msra.mxu0 %v4613_v10  ;;  %3186 = vmatprep.subr.bf16.mxu1 %v5960_v31  ;;  %v2668_v10 = vrot.slane %v2655_v49, %v6426_v46 }
 0x5b1   :  { %4391 = vmatprep.subr.bf16.mxu0 %v6432_v8 }
 0x5b3   :  { %3187 = vmatpush1.bf16.msra.mxu1 %v5955_v54 }
 0x5b4   :  { %4392 = vmatpush3.bf16.msra.mxu0 %v4614_v5  ;;  %3544 = vmatprep.subr.bf16.mxu1 %v4588_v6 }
 0x5b5   :  { %4397 = vmatprep.subr.bf16.mxu0 %v6432_v8 }
 0x5f0   :  { %v2569_v29 = vpop.xlane.xlu1 %2568 }
 0x5f1   :  { %v2572_v43 = vmul.f32 0.0078125, %v2569_v29 }
 0x5f3   :  { %v6139_v62 = vsub.f32 %v5997_v48, %v2572_v43 }
 0x5f4   :  { %v2571_v32 = vpop.xlane.xlu0 %2570 }
 0x5f5   :  { %v2573_v40 = vmul.f32 0.0078125, %v2571_v32  ;;  %v2576_v14 = vmul.f32 %v6139_v62, %v6139_v62 }
 0x5f7   :  { %v6146_v24 = vsub.f32 %v6005_v15, %v2573_v40  ;;  %2578 = vadd.xlane.f32.xlu1 %v2576_v14  ;;  %v6461_v15 = vld [vmem:[#allocation30_spill] sm:$0xff] }
 0x5f9   :  { %v2577_v21 = vmul.f32 %v6146_v24, %v6146_v24 }
 0x5fb   :  { %2580 = vadd.xlane.f32.xlu0 %v2577_v21  ;;  %v6465_v21 = vld [vmem:[#allocation31_spill] sm:$0xff] }
 0x62d   :  { %v2834_v59 = vpop.f32.mrf.mxu1  ;;  %v2877_v48 = vpop.f32.mrf.mxu0 }
 0x62e   :  { %v2835_v20 = vadd.f32 %v2834_v59, %v2660_v1  ;;  %v2878_v43 = vadd.f32 %v2877_v48, %v2668_v10 }
 0x62f   :  { %v2836_v50 = vpop.f32.mrf.mxu1  ;;  %v4375_v22 = vpop.f32.mrf.mxu0 }
 0x630   :  { %v2884_v23 = vadd.f32 %v2835_v20, %v6461_v15  ;;  %v2837_v16 = vadd.f32 %v2836_v50, %v2664_v45  ;;  %v6466_v50 = vld [vmem:[#allocation34_spill] sm:$0xff] }
 0x631   :  { %v2838_v28 = vpop.f32.mrf.mxu1  ;;  %v2880_v63 = vpop.f32.mrf.mxu0 }
 0x632   :  { %v3985_v7 = vmul.f32 -1.442695, %v2884_v23  ;;  %v2839_v4 = vadd.f32 %v2838_v28, %v2660_v1  ;;  %v2898_v38 = vadd.f32 %v2837_v16, %v6463_v18  ;;  %v2881_v59 = vadd.f32 %v2880_v63, %v2668_v10 }
 0x633   :  { %v2840_v2 = vpop.f32.mrf.mxu1  ;;  %v4376_v11 = vpop.f32.mrf.mxu0 }
 0x634   :  { %4739 = vpow2.f32 %v3985_v7  ;;  %v2885_v19 = vadd.f32 %v2839_v4, %v6462_v60  ;;  %v2841_v41 = vadd.f32 %v2840_v2, %v2664_v45  ;;  %v3987_v6 = vmul.f32 -1.442695, %v2898_v38  ;;  %v6467_v11 = vld [vmem:[#allocation18_spill] sm:$0xff]  ;;  %v6468_v38 = vld [vmem:[#allocation20_spill] sm:$0xff] }
 0x635   :  { %vm2936_vm13 = vcmp.eq.s32.totalorder %v6467_v11, 1  ;;  %vm2937_vm14 = vcmp.eq.s32.totalorder %v6468_v38, 1  ;;  %v6472_v38 = vld [vmem:[#allocation41_spill] sm:$0xff] }
 0x636   :  { %v3986_v17 = vmul.f32 -1.442695, %v2885_v19  ;;  %v2899_v33 = vadd.f32 %v2841_v41, %v6464_v58 }
 0x638   :  { %4741 = vpow2.f32 %v3986_v17  ;;  %v3988_v30 = vmul.f32 -1.442695, %v2899_v33 }
 0x639   :  { %4743 = vpow2.f32 %v3987_v6  ;;  %v4618_v6 = vld [vmem:[%s6343_s6 + $0x68] ss:$12 sps:$4 sm:$0xff]  }
 0x63a   :  { %4745 = vpow2.f32 %v3988_v30  ;;  %v4619_v30 = vld [vmem:[%s6343_s6 + $0x50] ss:$12 sps:$4 sm:$0xff]  }
 0x641   :  { %v4740_v44 = vpop.eup %4739 }
 0x642   :  { %v2892_v3 = vadd.f32 1.0, %v4740_v44  ;;  %v4620_v44 = vld [vmem:[%s6343_s6 + $0x38] ss:$12 sps:$4 sm:$0xff]  }
 0x644   :  { %4747 = vrcp.f32 %v2892_v3  ;;  %v4621_v3 = vld [vmem:[%s6343_s6 + $0x20] ss:$12 sps:$4 sm:$0xff]  }
 0x645   :  { %v4742_v53 = vpop.eup %4741 }
 0x646   :  { %v2893_v9 = vadd.f32 1.0, %v4742_v53  ;;  %v4744_v47 = vpop.eup %4743 }
 0x647   :  { %v4746_v29 = vpop.eup %4745  ;;  %v2906_v5 = vadd.f32 1.0, %v4744_v47  ;;  %v4622_v47 = vld [vmem:[%s6343_s6 + $0x8] ss:$12 sps:$4 sm:$0xff]  }
 0x648   :  { %4749 = vrcp.f32 %v2893_v9  ;;  %v2907_v40 = vadd.f32 1.0, %v4746_v29 }
 0x649   :  { %4751 = vrcp.f32 %v2906_v5 }
 0x64a   :  { %4753 = vrcp.f32 %v2907_v40 }
 0x651   :  { %v4748_v32 = vpop.eup %4747 }
 0x652   :  { %v2912_v14 = vmul.f32 %v4748_v32, %v2878_v43 }
 0x654   :  { %v2914_v1 = vadd.f32 %v2912_v14, %v6465_v21  ;;  %v3027_v14 = vld [vmem:[%s6347_s8] sm:$0x7] }
 0x655   :  { %v4750_v20 = vpop.eup %4749 }
 0x656   :  { %4755 = vtanh.f32 %v2914_v1  ;;  %v2913_v45 = vmul.f32 %v4750_v20, %v2881_v59  ;;  %v4752_v15 = vpop.eup %4751  ;;  %v3036_v20 = vrot.slane %v3027_v14, %v6422_v34 }
 0x657   :  { %v4754_v23 = vpop.eup %4753  ;;  %v2918_v49 = vsub.f32 1.0, %v4752_v15  ;;  %v2922_v48 = vmul.f32 %v4752_v15, %v6000_v13 }
 0x658   :  { %v2915_v22 = vadd.f32 %v2913_v45, %v6466_v50  ;;  %v2919_v4 = vsub.f32 1.0, %v4754_v23  ;;  %v2923_v41 = vmul.f32 %v4754_v23, %v6008_v36 }
 0x65a   :  { %4757 = vtanh.f32 %v2915_v22  ;;  %v6469_v22 = vld [vmem:[#allocation36_spill] sm:$0xff] }
 0x663   :  { %v4756_v28 = vpop.eup %4755 }
 0x664   :  { %v2920_v7 = vmul.f32 %v4756_v28, %v2918_v49 }
 0x666   :  { %v2924_v16 = vadd.f32 %v2922_v48, %v2920_v7 }
 0x667   :  { %v4758_v2 = vpop.eup %4757 }
 0x668   :  { %v6164_v63 = vsel %vm2936_vm13, %v2924_v16, 0.0  ;;  %v6167_v60 = vsel %vm2936_vm13, %v2924_v16, %v6000_v13  ;;  %v2921_v19 = vmul.f32 %v4758_v2, %v2919_v4  ;;  %v6470_v2 = vld [vmem:[#allocation39_spill] sm:$0xff] }
 0x669   :  { %2940 = vadd.xlane.f32.xlu1 %v6164_v63 }
 0x66a   :  { %v2925_v18 = vadd.f32 %v2923_v41, %v2921_v19  ;;  %v6471_v19 = vld [vmem:[#allocation38_spill] sm:$0xff] }
 0x66c   :  { %v6172_v17 = vsel %vm2937_vm14, %v2925_v18, 0.0  ;;  %v6175_v58 = vsel %vm2937_vm14, %v2925_v18, %v6008_v36 }
 0x66d   :  { %2942 = vadd.xlane.f32.xlu0 %v6172_v17  ;;  %v2994_v33 = vpack.c.bf16 %v6175_v58, %v6167_v60 }
 0x66f   :  { %3205 = vmatmul.mubr.bf16.vlgmr.msra.gmra.mxu1 %v2994_v33  ;;  %4394 = vmatmul.mubr.bf16.vlgmr.msra.gmra.mxu0 %v2994_v33 }
 0x670   :  { %3545 = vmatpush1.bf16.msra.mxu1 %v6031_v51  ;;  %3576 = vmatprep.mubr.bf16.mxu1 %v6430_v12 }
 0x671   :  { %3546 = vmatprep.subr.bf16.mxu1 %v6040_v52  ;;  %4413 = vmatprep.mubr.msk.bf16.mxu0 %vm4819_vm4, %v6432_v8 }
 0x674   :  { %3547 = vmatpush1.bf16.msra.mxu1 %v6046_v57 }
 0x675   :  { %3548 = vmatprep.subr.bf16.mxu1 %v6055_v37 }
 0x678   :  { %3549 = vmatpush1.bf16.msra.mxu1 %v6061_v55 }
 0x679   :  { %3550 = vmatprep.subr.bf16.mxu1 %v6071_v27 }
 0x67c   :  { %3551 = vmatpush1.bf16.msra.mxu1 %v6077_v61  ;;  %v6202_v61 = vld [vmem:[%s6348_s9] ss:$0 sm:$0xff] }
 0x67d   :  { %3552 = vmatprep.subr.bf16.mxu1 %v6087_v42 }
 0x680   :  { %v2579_v13 = vpop.xlane.xlu1 %2578  ;;  %3553 = vmatpush1.bf16.msra.mxu1 %v6093_v56 }
 0x681   :  { %v2582_v12 = vmul.f32 0.0078125, %v2579_v13  ;;  %3554 = vmatprep.subr.bf16.mxu1 %v6103_v0 }
 0x683   :  { %v2584_v36 = vadd.f32 1e-05, %v2582_v12 }
 0x684   :  { %v2581_v51 = vpop.xlane.xlu0 %2580  ;;  %3555 = vmatpush1.bf16.msra.mxu1 %v6109_v26 }
 0x685   :  { %4759 = vrsqrt.f32 %v2584_v36  ;;  %v2583_v52 = vmul.f32 0.0078125, %v2581_v51  ;;  %3556 = vmatprep.subr.bf16.mxu1 %v6119_v25 }
 0x687   :  { %v2585_v57 = vadd.f32 1e-05, %v2583_v52 }
 0x688   :  { %3557 = vmatpush1.bf16.msra.mxu1 %v6125_v35  ;;  %v4615_v35 = vld [vmem:[%s6343_s6 + $0xb0] ss:$12 sps:$4 sm:$0xff]  }
 0x689   :  { %4761 = vrsqrt.f32 %v2585_v57  ;;  %3558 = vmatprep.subr.bf16.mxu1 %v5960_v31  ;;  %v6210_v31 = vld [vmem:[%s6349_s10] ss:$0 sm:$0xff]  ;;  %4398 = vmatpush3.bf16.msra.mxu0 %v4615_v35 }
 0x68a   :  { %4399 = vmatprep.subr.bf16.mxu0 %v6432_v8 }
 0x68c   :  { %3559 = vmatpush1.bf16.msra.mxu1 %v5955_v54 }
 0x692   :  { %v4760_v37 = vpop.eup %4759 }
 0x693   :  { %v2588_v55 = vmul.f32 %v4760_v37, %v6139_v62  ;;  %v4616_v62 = vld [vmem:[%s6343_s6 + $0x98] ss:$12 sps:$4 sm:$0xff]   ;;  %v3040_v37 = vrot.slane %v3027_v14, %v6426_v46 }
 0x694   :  { %4400 = vmatpush3.bf16.msra.mxu0 %v4616_v62 }
 0x695   :  { %v2590_v42 = vmul.f32 %v6202_v61, %v2588_v55  ;;  %4401 = vmatprep.subr.bf16.mxu0 %v6432_v8 }
 0x696   :  { %v4762_v27 = vpop.eup %4761 }
 0x697   :  { %v2589_v56 = vmul.f32 %v4762_v27, %v6146_v24  ;;  %v2592_v54 = vadd.f32 %v6210_v31, %v2590_v42  ;;  %v4617_v24 = vld [vmem:[%s6343_s6 + $0x80] ss:$12 sps:$4 sm:$0xff]  }
 0x698   :  { %4402 = vmatpush3.bf16.msra.mxu0 %v4617_v24 }
 0x699   :  { %v2591_v0 = vmul.f32 %v6202_v61, %v2589_v56  ;;  %4403 = vmatprep.subr.bf16.mxu0 %v6432_v8 }
 0x69b   :  { %v2593_v26 = vadd.f32 %v6210_v31, %v2591_v0 }
 0x69c   :  { %4404 = vmatpush3.bf16.msra.mxu0 %v4618_v6  ;;  %v6474_v6 = vld [vmem:[#allocation40_spill] sm:$0xff] }
 0x69d   :  { %v4096_v25 = vpack.c.bf16 %v2593_v26, %v2592_v54  ;;  %4405 = vmatprep.subr.bf16.mxu0 %v6432_v8  ;;  %v6473_v26 = vld [vmem:[#allocation37_spill] sm:$0xff] }
 0x69f   :  { %4116 = vst [vmem:[%s6350_s12 + $0x20] sm:$0xff] %v4096_v25  }
 0x6a0   :  { %4406 = vmatpush3.bf16.msra.mxu0 %v4619_v30 }
 0x6a1   :  { %4407 = vmatprep.subr.bf16.mxu0 %v6432_v8 }
 0x6a4   :  { %4408 = vmatpush3.bf16.msra.mxu0 %v4620_v44 }
 0x6a5   :  { %4409 = vmatprep.subr.bf16.mxu0 %v6432_v8 }
 0x6a8   :  { %4410 = vmatpush3.bf16.msra.mxu0 %v4621_v3 }
 0x6a9   :  { %4411 = vmatprep.subr.bf16.mxu0 %v6432_v8  ;;  %v3032_v8 = vrot.slane %v3027_v14, %v5339_v39  ;;  %v6475_v14 = vld [vmem:[#allocation21_spill] sm:$0xff] }
 0x6aa   :  { %vm3308_vm4 = vcmp.eq.s32.totalorder %v6475_v14, 1 }
 0x6ac   :  { %4412 = vmatpush3.bf16.msra.mxu0 %v4622_v47 }
 0x6f2   :  { %v2941_v53 = vpop.xlane.xlu1 %2940 }
 0x6f3   :  { %v2944_v9 = vmul.f32 0.0078125, %v2941_v53 }
 0x6f5   :  { %v6248_v10 = vsub.f32 %v6164_v63, %v2944_v9 }
 0x6f6   :  { %v2943_v29 = vpop.xlane.xlu0 %2942 }
 0x6f7   :  { %v2945_v5 = vmul.f32 0.0078125, %v2943_v29  ;;  %v2948_v43 = vmul.f32 %v6248_v10, %v6248_v10 }
 0x6f9   :  { %v6254_v32 = vsub.f32 %v6172_v17, %v2945_v5  ;;  %2950 = vadd.xlane.f32.xlu1 %v2948_v43 }
 0x6fb   :  { %v2949_v40 = vmul.f32 %v6254_v32, %v6254_v32 }
 0x6fd   :  { %2952 = vadd.xlane.f32.xlu0 %v2949_v40 }
 0x72f   :  { %v3206_v21 = vpop.f32.mrf.mxu1  ;;  %v3249_v1 = vpop.f32.mrf.mxu0 }
 0x730   :  { %v3207_v59 = vadd.f32 %v3206_v21, %v3032_v8  ;;  %v3250_v42 = vadd.f32 %v3249_v1, %v3040_v37 }
 0x731   :  { %v3208_v45 = vpop.f32.mrf.mxu1  ;;  %v4395_v50 = vpop.f32.mrf.mxu0 }
 0x732   :  { %v3256_v15 = vadd.f32 %v3207_v59, %v6469_v22  ;;  %v3209_v7 = vadd.f32 %v3208_v45, %v3036_v20  ;;  %v6476_v45 = vld [vmem:[#allocation16_spill] sm:$0xff] }
 0x733   :  { %v3210_v23 = vpop.f32.mrf.mxu1  ;;  %v3252_v49 = vpop.f32.mrf.mxu0  ;;  %vm3309_vm15 = vcmp.eq.s32.totalorder %v6476_v45, 1 }
 0x734   :  { %v4017_v28 = vmul.f32 -1.442695, %v3256_v15  ;;  %v3211_v48 = vadd.f32 %v3210_v23, %v3032_v8  ;;  %v3270_v41 = vadd.f32 %v3209_v7, %v6471_v19  ;;  %v3253_v35 = vadd.f32 %v3252_v49, %v3040_v37 }
 0x735   :  { %v3212_v16 = vpop.f32.mrf.mxu1  ;;  %v4396_v4 = vpop.f32.mrf.mxu0 }
 0x736   :  { %4763 = vpow2.f32 %v4017_v28  ;;  %v3257_v11 = vadd.f32 %v3211_v48, %v6470_v2  ;;  %v3213_v63 = vadd.f32 %v3212_v16, %v3036_v20  ;;  %v4019_v33 = vmul.f32 -1.442695, %v3270_v41 }
 0x738   :  { %v4018_v18 = vmul.f32 -1.442695, %v3257_v11  ;;  %v3271_v17 = vadd.f32 %v3213_v63, %v6472_v38 }
 0x73a   :  { %4765 = vpow2.f32 %v4018_v18  ;;  %v4020_v13 = vmul.f32 -1.442695, %v3271_v17 }
 0x73b   :  { %4767 = vpow2.f32 %v4019_v33 }
 0x73c   :  { %4769 = vpow2.f32 %v4020_v13 }
 0x743   :  { %v4764_v12 = vpop.eup %4763 }
 0x744   :  { %v3264_v36 = vadd.f32 1.0, %v4764_v12 }
 0x746   :  { %4771 = vrcp.f32 %v3264_v36 }
 0x747   :  { %v4766_v51 = vpop.eup %4765 }
 0x748   :  { %v3265_v52 = vadd.f32 1.0, %v4766_v51  ;;  %v4768_v57 = vpop.eup %4767  ;;  %v3399_v51 = vld [vmem:[%s6347_s8] sm:$0x7] }
 0x749   :  { %v4770_v55 = vpop.eup %4769  ;;  %v3278_v27 = vadd.f32 1.0, %v4768_v57 }
 0x74a   :  { %4773 = vrcp.f32 %v3265_v52  ;;  %v3279_v0 = vadd.f32 1.0, %v4770_v55  ;;  %v3404_v52 = vrot.slane %v3399_v51, %v5339_v39 }
 0x74b   :  { %4775 = vrcp.f32 %v3278_v27  ;;  %v3408_v27 = vrot.slane %v3399_v51, %v6422_v34  ;;  %v6480_v34 = vld [vmem:[#allocation47_spill] sm:$0xff] }
 0x74c   :  { %4777 = vrcp.f32 %v3279_v0  ;;  %v6477_v0 = vld [vmem:[#allocation42_spill] sm:$0xff] }
 0x753   :  { %v4772_v56 = vpop.eup %4771 }
 0x754   :  { %v3284_v54 = vmul.f32 %v4772_v56, %v3250_v42 }
 0x756   :  { %v3286_v25 = vadd.f32 %v3284_v54, %v6473_v26 }
 0x757   :  { %v4774_v62 = vpop.eup %4773 }
 0x758   :  { %4779 = vtanh.f32 %v3286_v25  ;;  %v3285_v24 = vmul.f32 %v4774_v62, %v3253_v35  ;;  %v4776_v44 = vpop.eup %4775 }
 0x759   :  { %v4778_v3 = vpop.eup %4777  ;;  %v3290_v53 = vsub.f32 1.0, %v4776_v44  ;;  %v3294_v29 = vmul.f32 %v4776_v44, %v6167_v60  ;;  %v6478_v44 = vld [vmem:[#allocation45_spill] sm:$0xff] }
 0x75a   :  { %v3287_v30 = vadd.f32 %v3285_v24, %v6474_v6  ;;  %v3291_v43 = vsub.f32 1.0, %v4778_v3  ;;  %v3295_v59 = vmul.f32 %v4778_v3, %v6175_v58 }
 0x75c   :  { %4781 = vtanh.f32 %v3287_v30 }
 0x765   :  { %v4780_v9 = vpop.eup %4779 }
 0x766   :  { %v3292_v47 = vmul.f32 %v4780_v9, %v3290_v53  ;;  %v6479_v53 = vld [vmem:[#allocation44_spill] sm:$0xff] }
 0x768   :  { %v3296_v5 = vadd.f32 %v3294_v29, %v3292_v47 }
 0x769   :  { %v4782_v40 = vpop.eup %4781 }
 0x76a   :  { %v3310_v8 = vsel %vm3308_vm4, %v3296_v5, 0.0  ;;  %v6273_v21 = vsel %vm3308_vm4, %v3296_v5, %v6167_v60  ;;  %v3293_v1 = vmul.f32 %v4782_v40, %v3291_v43 }
 0x76b   :  { %3312 = vadd.xlane.f32.xlu1 %v3310_v8 }
 0x76c   :  { %v3297_v20 = vadd.f32 %v3295_v59, %v3293_v1 }
 0x76e   :  { %v3311_v50 = vsel %vm3309_vm15, %v3297_v20, 0.0  ;;  %v6278_v22 = vsel %vm3309_vm15, %v3297_v20, %v6175_v58  ;;  %v3412_v20 = vrot.slane %v3399_v51, %v6426_v46 }
 0x76f   :  { %3314 = vadd.xlane.f32.xlu0 %v3311_v50  ;;  %v3366_v15 = vpack.c.bf16 %v6278_v22, %v6273_v21 }
 0x771   :  { %3577 = vmatmul.mubr.bf16.vlgmr.msra.gmra.mxu1 %v3366_v15  ;;  %4414 = vmatmul.mubr.bf16.vlgmr.msra.gmra.mxu0 %v3366_v15 }
 0x782   :  { %v2951_v23 = vpop.xlane.xlu1 %2950 }
 0x783   :  { %v2954_v60 = vmul.f32 0.0078125, %v2951_v23 }
 0x785   :  { %v2956_v49 = vadd.f32 1e-05, %v2954_v60 }
 0x786   :  { %v2953_v28 = vpop.xlane.xlu0 %2952 }
 0x787   :  { %4783 = vrsqrt.f32 %v2956_v49  ;;  %v2955_v7 = vmul.f32 0.0078125, %v2953_v28  ;;  %v6481_v28 = vld [vmem:[#allocation43_spill] sm:$0xff] }
 0x789   :  { %v2957_v48 = vadd.f32 1e-05, %v2955_v7 }
 0x78b   :  { %4785 = vrsqrt.f32 %v2957_v48 }
 0x794   :  { %v4784_v16 = vpop.eup %4783 }
 0x795   :  { %v2960_v4 = vmul.f32 %v4784_v16, %v6248_v10 }
 0x797   :  { %v2962_v58 = vmul.f32 %v6202_v61, %v2960_v4 }
 0x798   :  { %v4786_v2 = vpop.eup %4785 }
 0x799   :  { %v2961_v11 = vmul.f32 %v4786_v2, %v6254_v32  ;;  %v2964_v19 = vadd.f32 %v6210_v31, %v2962_v58  ;;  %v6482_v2 = vld [vmem:[#allocation46_spill] sm:$0xff] }
 0x79b   :  { %v2963_v63 = vmul.f32 %v6202_v61, %v2961_v11 }
 0x79d   :  { %v2965_v41 = vadd.f32 %v6210_v31, %v2963_v63 }
 0x79f   :  { %v4101_v18 = vpack.c.bf16 %v2965_v41, %v2964_v19 }
 0x7a1   :  { %4117 = vst [vmem:[%s6350_s12 + $0x28] sm:$0xff] %v4101_v18  }
 0x7f4   :  { %v3313_v38 = vpop.xlane.xlu1 %3312 }
 0x7f5   :  { %v3316_v17 = vmul.f32 0.0078125, %v3313_v38 }
 0x7f7   :  { %v6291_v33 = vsub.f32 %v3310_v8, %v3316_v17 }
 0x7f8   :  { %v3315_v10 = vpop.xlane.xlu0 %3314 }
 0x7f9   :  { %v3317_v13 = vmul.f32 0.0078125, %v3315_v10  ;;  %v3320_v32 = vmul.f32 %v6291_v33, %v6291_v33 }
 0x7fb   :  { %v6295_v12 = vsub.f32 %v3311_v50, %v3317_v13  ;;  %3322 = vadd.xlane.f32.xlu1 %v3320_v32  ;;  %v6483_v13 = vld [vmem:[#allocation3_spill] sm:$0xff] }
 0x7fc   :  { %vm3680_vm0 = vcmp.eq.s32.totalorder %v6483_v13, 1 }
 0x7fd   :  { %v3321_v36 = vmul.f32 %v6295_v12, %v6295_v12 }
 0x7ff   :  { %3324 = vadd.xlane.f32.xlu0 %v3321_v36 }
 0x831   :  { %v3578_v57 = vpop.f32.mrf.mxu1  ;;  %v3621_v37 = vpop.f32.mrf.mxu0 }
 0x832   :  { %v3579_v55 = vadd.f32 %v3578_v57, %v3404_v52  ;;  %v3622_v15 = vadd.f32 %v3621_v37, %v3412_v20  ;;  %v6484_v37 = vld [vmem:[#allocation17_spill] sm:$0xff] }
 0x833   :  { %v3580_v42 = vpop.f32.mrf.mxu1  ;;  %v4415_v56 = vpop.f32.mrf.mxu0  ;;  %vm3681_vm1 = vcmp.eq.s32.totalorder %v6484_v37, 1 }
 0x834   :  { %v3628_v54 = vadd.f32 %v3579_v55, %v6477_v0  ;;  %v3581_v62 = vadd.f32 %v3580_v42, %v3408_v27 }
 0x835   :  { %v3582_v26 = vpop.f32.mrf.mxu1  ;;  %v3624_v25 = vpop.f32.mrf.mxu0 }
 0x836   :  { %v4049_v35 = vmul.f32 -1.442695, %v3628_v54  ;;  %v3583_v24 = vadd.f32 %v3582_v26, %v3404_v52  ;;  %v3642_v9 = vadd.f32 %v3581_v62, %v6479_v53  ;;  %v3625_v48 = vadd.f32 %v3624_v25, %v3412_v20 }
 0x837   :  { %v3584_v6 = vpop.f32.mrf.mxu1  ;;  %v4416_v30 = vpop.f32.mrf.mxu0 }
 0x838   :  { %4787 = vpow2.f32 %v4049_v35  ;;  %v3629_v3 = vadd.f32 %v3583_v24, %v6478_v44  ;;  %v3585_v39 = vadd.f32 %v3584_v6, %v3408_v27  ;;  %v4051_v5 = vmul.f32 -1.442695, %v3642_v9 }
 0x83a   :  { %v4050_v47 = vmul.f32 -1.442695, %v3629_v3  ;;  %v3643_v29 = vadd.f32 %v3585_v39, %v6480_v34 }
 0x83c   :  { %4789 = vpow2.f32 %v4050_v47  ;;  %v4052_v43 = vmul.f32 -1.442695, %v3643_v29 }
 0x83d   :  { %4791 = vpow2.f32 %v4051_v5 }
 0x83e   :  { %4793 = vpow2.f32 %v4052_v43 }
 0x845   :  { %v4788_v40 = vpop.eup %4787 }
 0x846   :  { %v3636_v14 = vadd.f32 1.0, %v4788_v40 }
 0x848   :  { %4795 = vrcp.f32 %v3636_v14 }
 0x849   :  { %v4790_v8 = vpop.eup %4789 }
 0x84a   :  { %v3637_v1 = vadd.f32 1.0, %v4790_v8  ;;  %v4792_v59 = vpop.eup %4791 }
 0x84b   :  { %v4794_v45 = vpop.eup %4793  ;;  %v3650_v50 = vadd.f32 1.0, %v4792_v59 }
 0x84c   :  { %4797 = vrcp.f32 %v3637_v1  ;;  %v3651_v60 = vadd.f32 1.0, %v4794_v45 }
 0x84d   :  { %4799 = vrcp.f32 %v3650_v50 }
 0x84e   :  { %4801 = vrcp.f32 %v3651_v60 }
 0x855   :  { %v4796_v23 = vpop.eup %4795 }
 0x856   :  { %v3656_v49 = vmul.f32 %v4796_v23, %v3622_v15 }
 0x858   :  { %v3658_v7 = vadd.f32 %v3656_v49, %v6481_v28 }
 0x859   :  { %v4798_v16 = vpop.eup %4797 }
 0x85a   :  { %4803 = vtanh.f32 %v3658_v7  ;;  %v3657_v4 = vmul.f32 %v4798_v16, %v3625_v48  ;;  %v4800_v11 = vpop.eup %4799 }
 0x85b   :  { %v4802_v63 = vpop.eup %4801  ;;  %v3662_v46 = vsub.f32 1.0, %v4800_v11  ;;  %v3666_v18 = vmul.f32 %v4800_v11, %v6273_v21 }
 0x85c   :  { %v3659_v58 = vadd.f32 %v3657_v4, %v6482_v2  ;;  %v3663_v17 = vsub.f32 1.0, %v4802_v63  ;;  %v3667_v52 = vmul.f32 %v4802_v63, %v6278_v22 }
 0x85e   :  { %4805 = vtanh.f32 %v3659_v58 }
 0x867   :  { %v4804_v19 = vpop.eup %4803 }
 0x868   :  { %v3664_v41 = vmul.f32 %v4804_v19, %v3662_v46 }
 0x86a   :  { %v3668_v38 = vadd.f32 %v3666_v18, %v3664_v41 }
 0x86b   :  { %v4806_v10 = vpop.eup %4805 }
 0x86c   :  { %v3682_v32 = vsel %vm3680_vm0, %v3668_v38, 0.0  ;;  %v3721_v36 = vsel %vm3680_vm0, %v3668_v38, %v6273_v21  ;;  %v3665_v51 = vmul.f32 %v4806_v10, %v3663_v17 }
 0x86d   :  { %3723 = vst [vmem:[%s6351_s11] sm:$0xff] %v3721_v36  ;;  %3684 = vadd.xlane.f32.xlu1 %v3682_v32 }
 0x86e   :  { %v3669_v57 = vadd.f32 %v3667_v52, %v3665_v51 }
 0x870   :  { %v3683_v55 = vsel %vm3681_vm1, %v3669_v57, 0.0  ;;  %v3722_v27 = vsel %vm3681_vm1, %v3669_v57, %v6278_v22 }
 0x871   :  { %3724 = vst [vmem:[%s6351_s11 + $0x8] sm:$0xff] %v3722_v27  ;;  %3686 = vadd.xlane.f32.xlu0 %v3683_v55 }
 0x884   :  { %v3323_v21 = vpop.xlane.xlu1 %3322 }
 0x885   :  { %v3326_v42 = vmul.f32 0.0078125, %v3323_v21 }
 0x887   :  { %v3328_v56 = vadd.f32 1e-05, %v3326_v42 }
 0x888   :  { %v3325_v0 = vpop.xlane.xlu0 %3324 }
 0x889   :  { %4807 = vrsqrt.f32 %v3328_v56  ;;  %v3327_v54 = vmul.f32 0.0078125, %v3325_v0 }
 0x88b   :  { %v3329_v26 = vadd.f32 1e-05, %v3327_v54 }
 0x88d   :  { %4809 = vrsqrt.f32 %v3329_v26 }
 0x896   :  { %v4808_v25 = vpop.eup %4807 }
 0x897   :  { %v3332_v35 = vmul.f32 %v4808_v25, %v6291_v33 }
 0x899   :  { %v3334_v24 = vmul.f32 %v6202_v61, %v3332_v35 }
 0x89a   :  { %v4810_v62 = vpop.eup %4809 }
 0x89b   :  { %v3333_v22 = vmul.f32 %v4810_v62, %v6295_v12  ;;  %v3336_v30 = vadd.f32 %v6210_v31, %v3334_v24 }
 0x89d   :  { %v3335_v6 = vmul.f32 %v6202_v61, %v3333_v22 }
 0x89f   :  { %v3337_v44 = vadd.f32 %v6210_v31, %v3335_v6 }
 0x8a1   :  { %v4106_v3 = vpack.c.bf16 %v3337_v44, %v3336_v30 }
 0x8a3   :  { %4118 = vst [vmem:[%s6350_s12 + $0x30] sm:$0xff] %v4106_v3  }
 0x8f6   :  { %v3685_v39 = vpop.xlane.xlu1 %3684 }
 0x8f7   :  { %v3688_v53 = vmul.f32 0.0078125, %v3685_v39 }
 0x8f9   :  { %v3690_v9 = vsub.f32 %v3682_v32, %v3688_v53 }
 0x8fa   :  { %v3687_v33 = vpop.xlane.xlu0 %3686 }
 0x8fb   :  { %v3689_v47 = vmul.f32 0.0078125, %v3687_v33  ;;  %v3692_v34 = vmul.f32 %v3690_v9, %v3690_v9 }
 0x8fd   :  { %v3691_v29 = vsub.f32 %v3683_v55, %v3689_v47  ;;  %3694 = vadd.xlane.f32.xlu1 %v3692_v34 }
 0x8ff   :  { %v3693_v12 = vmul.f32 %v3691_v29, %v3691_v29 }
 0x901   :  { %3696 = vadd.xlane.f32.xlu0 %v3693_v12 }
 0x986   :  { %v3695_v5 = vpop.xlane.xlu1 %3694 }
 0x987   :  { %v3698_v43 = vmul.f32 0.0078125, %v3695_v5 }
 0x989   :  { %v3700_v40 = vadd.f32 1e-05, %v3698_v43 }
 0x98a   :  { %v3697_v14 = vpop.xlane.xlu0 %3696 }
 0x98b   :  { %4811 = vrsqrt.f32 %v3700_v40  ;;  %v3699_v8 = vmul.f32 0.0078125, %v3697_v14 }
 0x98d   :  { %v3701_v1 = vadd.f32 1e-05, %v3699_v8 }
 0x98f   :  { %4813 = vrsqrt.f32 %v3701_v1 }
 0x998   :  { %v4812_v59 = vpop.eup %4811 }
 0x999   :  { %v3704_v20 = vmul.f32 %v4812_v59, %v3690_v9 }
 0x99b   :  { %v3706_v50 = vmul.f32 %v6202_v61, %v3704_v20 }
 0x99c   :  { %v4814_v45 = vpop.eup %4813 }
 0x99d   :  { %v3705_v15 = vmul.f32 %v4814_v45, %v3691_v29  ;;  %v3708_v60 = vadd.f32 %v6210_v31, %v3706_v50 }
 0x99f   :  { %v3707_v23 = vmul.f32 %v6202_v61, %v3705_v15 }
 0x9a1   :  { %v3709_v49 = vadd.f32 %v6210_v31, %v3707_v23 }
 0x9a3   :  { %v4111_v28 = vpack.c.bf16 %v3709_v49, %v3708_v60 }
 0x9a5   :  { %4119 = vst [vmem:[%s6350_s12 + $0x38] sm:$0xff] %v4111_v28  }

</bundles_post_ra>
